<compile_context>
chip_gen: v6e
topology: v6e:2x2x1
jax: 0.10.0
libtpu: 0.0.40
codegen_flags: <defaults>
</compile_context>

<pallas_src>
import functools
import math

import jax
import jax.numpy as jnp
from jax.experimental import pallas as pl
from jax.experimental.pallas import tpu as pltpu

# ----------------------------- model config (small synthetic) ---------------
PAD_IDX = 1
VOCAB_SIZE = 50
NUM_TAGS = 7
EMB_DIM = 32          # embedding_dim      (real module: 300)
LM_DIM = 64           # pretrained LM dim  (real module: 768)
D_MODEL = 32          # d_model            (real module: 512)
LM_LAYERS = 2         # TODO(synk): real pretrained RoBERTa-base encoder has 12 layers
LM_HEADS = 4
LM_FF = 4 * LM_DIM
ENC_HEADS = 4
ENC_FF = 2 * D_MODEL
EPS = 1e-5
FC_PAD = 128          # lane-dense padded width for the final classifier output
NEG_INF = -1e9

_VMEM = pltpu.MemorySpace.VMEM


# ----------------------------- packed bias/LN vector layout ------------------
def _vector_layout():
    """Static layout of every (1, N) bias / LayerNorm vector inside one packed
    (1, TOTAL) f32 buffer.  Each segment starts at a 128-aligned lane offset."""
    def layer_names(pre, d, ff):
        return [(pre + "bqkv", 3 * d), (pre + "bo", d),
                (pre + "ln1_g", d), (pre + "ln1_b", d),
                (pre + "b1", ff), (pre + "b2", d),
                (pre + "ln2_g", d), (pre + "ln2_b", d)]

    names = [("proj_lm_b", LM_DIM)]
    for li in range(LM_LAYERS):
        names += layer_names(f"lm{li}_", LM_DIM, LM_FF)
    names += [("proj_m_b", D_MODEL), ("ln_g", D_MODEL), ("ln_b", D_MODEL)]
    names += layer_names("enc_", D_MODEL, ENC_FF)
    names += [("fc_b", FC_PAD)]

    off, cur = {}, 0
    for n, sz in names:
        off[n] = (cur, sz)
        cur += -(-sz // 128) * 128          # pad every slot to a multiple of 128 lanes
    return names, off, cur


_VEC_NAMES, _VEC_OFF, _VEC_TOTAL = _vector_layout()


# ----------------------------- in-kernel helpers -----------------------------
def _bf16(x):
    return x.astype(jnp.bfloat16)


def _ln(x, g, b):
    """LayerNorm over the last dim, f32 statistics."""
    mu = jnp.mean(x, axis=-1, keepdims=True)
    var = jnp.mean(jnp.square(x - mu), axis=-1, keepdims=True)
    return (x - mu) * jax.lax.rsqrt(var + EPS) * g + b


def _mm(x, w_ref):
    """bf16 MXU matmul with f32 accumulation; weight already bf16 in VMEM."""
    return jnp.dot(_bf16(x), w_ref[...], preferred_element_type=jnp.float32)


def _attention(x, bias, wqkv_ref, wo_ref, vec, pre, heads, att_ref):
    """Multi-head self-attention over the whole (B*S, D) slab.

    `bias` is (B*S, B*S): -1e9 on padded keys and cross-batch pairs, so the
    batch-folded attention is exactly per-sequence.
    """
    D = x.shape[-1]
    Dh = D // heads

    # fused QKV projection: one MXU pass with N = 3*D
    qkv = _mm(x, wqkv_ref) + vec(pre + "bqkv")                      # (BS, 3D) f32
    # scale folded into q; q/k/v cast to bf16 ONCE (hoisted out of head loop)
    q = _bf16(qkv[:, :D] * (1.0 / math.sqrt(Dh)))
    k = _bf16(qkv[:, D:2 * D])
    v = _bf16(qkv[:, 2 * D:])

    for h in range(heads):                                          # static loop
        sl = slice(h * Dh, (h + 1) * Dh)
        s = jax.lax.dot_general(q[:, sl], k[:, sl], (((1,), (1,)), ((), ())),
                                preferred_element_type=jnp.float32)  # (BS, BS)
        s = s + bias
        s = s - jnp.max(s, axis=-1, keepdims=True)
        p = jnp.exp(s)
        p = p * pl.reciprocal(jnp.sum(p, axis=-1, keepdims=True), approx=True)
        # write this head's output straight into its lane slice of the scratch
        att_ref[:, sl] = jnp.dot(_bf16(p), v[:, sl],
                                 preferred_element_type=jnp.float32)

    # output projection
    return _mm(att_ref[:, :D], wo_ref) + vec(pre + "bo")


def _enc_layer(x, bias, wqkv_ref, wo_ref, w1_ref, w2_ref, vec, pre, heads, act,
               att_ref):
    """One post-LN transformer encoder layer, fully VMEM-resident."""
    att = _attention(x, bias, wqkv_ref, wo_ref, vec, pre, heads, att_ref)
    x1 = _ln(x + att, vec(pre + "ln1_g"), vec(pre + "ln1_b"))

    h = _mm(x1, w1_ref) + vec(pre + "b1")
    if act == "gelu":
        # TODO(synk): PyTorch RoBERTa uses exact erf GELU; tanh approximation kept.
        h = jax.nn.gelu(h, approximate=True)
    else:
        h = jnp.maximum(h, 0.0)
    h = _mm(h, w2_ref) + vec(pre + "b2")
    return _ln(x1 + h, vec(pre + "ln2_g"), vec(pre + "ln2_b"))


# ----------------------------- fully fused forward kernel --------------------
def _forward_kernel(*refs, n_lm, lm_heads, enc_heads, off):
    """Whole RoBERTaModel forward for the batch in one invocation.

    Input ref order: x0, attn_bias, packed_vec, proj_lm_w,
                     [wqkv, wo, w1, w2] * n_lm, proj_m_w,
                     wqkv, wo, w1, w2 (task encoder), fc_w,
                     then out_ref, att_scratch.
    """
    it = iter(refs)
    x_ref, bias_ref, vec_ref = next(it), next(it), next(it)
    proj_lm_w = next(it)
    lm_w = [(next(it), next(it), next(it), next(it)) for _ in range(n_lm)]
    proj_m_w = next(it)
    enc_w = (next(it), next(it), next(it), next(it))
    fc_w = next(it)
    o_ref = next(it)
    att_ref = next(it)

    def vec(name):
        s, n = off[name]
        return vec_ref[:, s:s + n]          # static, lane-aligned slice -> (1, n)

    bias = bias_ref[...]                    # (BS, BS) additive attention bias

    # proj_to_language_model
    x = _mm(x_ref[...], proj_lm_w) + vec("proj_lm_b")               # (BS, LM_DIM)

    # pretrained language-model encoder (GELU FFN)
    for li in range(n_lm):
        wqkv, wo, w1, w2 = lm_w[li]
        x = _enc_layer(x, bias, wqkv, wo, w1, w2, vec, f"lm{li}_",
                       lm_heads, "gelu", att_ref)

    # proj_to_model + LayerNorm (fused)
    x = _ln(_mm(x, proj_m_w) + vec("proj_m_b"), vec("ln_g"), vec("ln_b"))

    # task EncoderLayer (ReLU FFN)
    x = _enc_layer(x, bias, *enc_w, vec, "enc_", enc_heads, "relu", att_ref)

    # fc -> lane-dense padded logits (only HBM store of the kernel)
    o_ref[...] = _mm(x, fc_w) + vec("fc_b")


# ----------------------------- plain-JAX glue --------------------------------
def sinusoid_pos_embedding(seq_len, dim):
    # Standard sinusoidal table (sin | cos halves).
    # TODO(synk): repo-specific `normalize=True` scaling not reproducible without source.
    pos = jnp.arange(seq_len, dtype=jnp.float32)[:, None]
    i = jnp.arange(dim // 2, dtype=jnp.float32)[None, :]
    angle = pos / jnp.power(10000.0, 2.0 * i / dim)
    return jnp.concatenate([jnp.sin(angle), jnp.cos(angle)], axis=-1)


def _init_layer_weights(key, d, ff):
    ks = jax.random.split(key, 6)

    def w(k, din, dout):
        return (0.02 * jax.random.normal(k, (din, dout), jnp.float32)).astype(jnp.bfloat16)

    wq, wk, wv = w(ks[0], d, d), w(ks[1], d, d), w(ks[2], d, d)
    return {"wqkv": jnp.concatenate([wq, wk, wv], axis=1),   # fused (D, 3D) bf16
            "wo": w(ks[3], d, d),
            "w1": w(ks[4], d, ff),
            "w2": w(ks[5], ff, d)}


def init_params(key):
    keys = jax.random.split(key, 6 + LM_LAYERS)
    p = {}
    emb = 0.02 * jax.random.normal(keys[0], (VOCAB_SIZE, EMB_DIM), jnp.float32)
    p["emb"] = emb.at[PAD_IDX].set(0.0)                      # padding_idx row is zero
    p["proj_lm_w"] = (0.02 * jax.random.normal(keys[1], (EMB_DIM, LM_DIM),
                                               jnp.float32)).astype(jnp.bfloat16)
    p["lm_layers"] = [_init_layer_weights(keys[2 + i], LM_DIM, LM_FF)
                      for i in range(LM_LAYERS)]             # synthetic "pretrained" encoder
    p["proj_m_w"] = (0.02 * jax.random.normal(keys[2 + LM_LAYERS], (LM_DIM, D_MODEL),
                                              jnp.float32)).astype(jnp.bfloat16)
    p["enc_layer"] = _init_layer_weights(keys[3 + LM_LAYERS], D_MODEL, ENC_FF)
    fc_w = 0.02 * jax.random.normal(keys[4 + LM_LAYERS], (D_MODEL, NUM_TAGS), jnp.float32)
    # Pad classifier to 128 output lanes -> lane-dense (unmasked) stores.
    p["fc_w"] = jnp.pad(fc_w, ((0, 0), (0, FC_PAD - NUM_TAGS))).astype(jnp.bfloat16)

    # Packed (1, TOTAL) buffer holding every bias / LayerNorm vector.
    vals = {name: (jnp.ones((sz,), jnp.float32) if name.endswith("_g")
                   else jnp.zeros((sz,), jnp.float32))
            for name, sz in _VEC_NAMES}
    buf = jnp.zeros((1, _VEC_TOTAL), jnp.float32)
    for name, sz in _VEC_NAMES:
        s, _ = _VEC_OFF[name]
        buf = buf.at[0, s:s + sz].set(vals[name])
    p["vec"] = buf
    return p


def roberta_forward(params, tokens):
    B, S = tokens.shape
    BS = B * S

    # generate_padding_mask -> additive key bias.  Because the batch is folded
    # into the M dimension inside the kernel, the bias also carries a
    # block-diagonal term so attention never crosses sequence boundaries.
    key_pad = (tokens == PAD_IDX).reshape(BS)
    batch_id = jnp.repeat(jnp.arange(B, dtype=jnp.int32), S)
    masked = key_pad[None, :] | (batch_id[:, None] != batch_id[None, :])
    attn_bias = jnp.where(masked, NEG_INF, 0.0).astype(jnp.float32)   # (BS, BS)

    emb = jnp.take(params["emb"], tokens, axis=0)            # embedding gather (glue)
    pos = sinusoid_pos_embedding(S, EMB_DIM)                 # pos_embedding
    x0 = (emb + pos[None]).reshape(BS, EMB_DIM).astype(jnp.float32)

    # weight inputs in the kernel's fixed order
    w_list = [params["proj_lm_w"]]
    for lp in params["lm_layers"]:
        w_list += [lp["wqkv"], lp["wo"], lp["w1"], lp["w2"]]
    w_list.append(params["proj_m_w"])
    ep = params["enc_layer"]
    w_list += [ep["wqkv"], ep["wo"], ep["w1"], ep["w2"]]
    w_list.append(params["fc_w"])

    kernel = functools.partial(_forward_kernel, n_lm=LM_LAYERS,
                               lm_heads=LM_HEADS, enc_heads=ENC_HEADS,
                               off=_VEC_OFF)

    n_in = 3 + len(w_list)
    logits = pl.pallas_call(
        kernel,
        out_shape=jax.ShapeDtypeStruct((BS, FC_PAD), jnp.float32),
        in_specs=[pl.BlockSpec(memory_space=_VMEM)] * n_in,
        out_specs=pl.BlockSpec(memory_space=_VMEM),
        scratch_shapes=[pltpu.VMEM((BS, LM_DIM), jnp.float32)],  # per-head att staging
    )(x0, attn_bias, params["vec"], *w_list)

    # dropout: identity at inference time
    return logits[:, :NUM_TAGS].reshape(B, S, NUM_TAGS)


if __name__ == "__main__":
    key = jax.random.PRNGKey(0)
    pkey, tkey = jax.random.split(key)
    params = init_params(pkey)

    B, S = 2, 8
    tokens = jax.random.randint(tkey, (B, S), 2, VOCAB_SIZE, dtype=jnp.int32)
    tokens = tokens.at[:, -2:].set(PAD_IDX)   # last two positions are padding

    out = jax.jit(roberta_forward)(params, tokens)
    jax.block_until_ready(out)
    assert out.shape == (B, S, NUM_TAGS) and out.dtype == jnp.float32
    print("KERNEL_OK")
</pallas_src>

<mosaic_0001>
module attributes {stable_mosaic.version = 11 : i64} {
  func.func @_forward_kernel(%arg0: memref<16x32xf32, #tpu.memory_space<vmem>>, %arg1: memref<16x16xf32, #tpu.memory_space<vmem>>, %arg2: memref<1x4224xf32, #tpu.memory_space<vmem>>, %arg3: memref<32x64xbf16, #tpu.memory_space<vmem>>, %arg4: memref<64x192xbf16, #tpu.memory_space<vmem>>, %arg5: memref<64x64xbf16, #tpu.memory_space<vmem>>, %arg6: memref<64x256xbf16, #tpu.memory_space<vmem>>, %arg7: memref<256x64xbf16, #tpu.memory_space<vmem>>, %arg8: memref<64x192xbf16, #tpu.memory_space<vmem>>, %arg9: memref<64x64xbf16, #tpu.memory_space<vmem>>, %arg10: memref<64x256xbf16, #tpu.memory_space<vmem>>, %arg11: memref<256x64xbf16, #tpu.memory_space<vmem>>, %arg12: memref<64x32xbf16, #tpu.memory_space<vmem>>, %arg13: memref<32x96xbf16, #tpu.memory_space<vmem>>, %arg14: memref<32x32xbf16, #tpu.memory_space<vmem>>, %arg15: memref<32x64xbf16, #tpu.memory_space<vmem>>, %arg16: memref<64x32xbf16, #tpu.memory_space<vmem>>, %arg17: memref<32x128xbf16, #tpu.memory_space<vmem>>, %arg18: memref<16x128xf32, #tpu.memory_space<vmem>>, %arg19: memref<16x64xf32, #tpu.memory_space<vmem>>) attributes {dimension_semantics = [], scalar_prefetch = 0 : i64, scratch_operands = 1 : i64, tpu.core_type = #tpu.core_type<tc>} {
    %c0 = arith.constant 0 : index
    %c0_0 = arith.constant 0 : index
    %0 = vector.load %arg1[%c0, %c0_0] : memref<16x16xf32, #tpu.memory_space<vmem>>, vector<16x16xf32>
    %c0_1 = arith.constant 0 : index
    %c0_2 = arith.constant 0 : index
    %1 = vector.load %arg0[%c0_1, %c0_2] : memref<16x32xf32, #tpu.memory_space<vmem>>, vector<16x32xf32>
    %2 = arith.truncf %1 : vector<16x32xf32> to vector<16x32xbf16>
    %c0_3 = arith.constant 0 : index
    %c0_4 = arith.constant 0 : index
    %3 = vector.load %arg3[%c0_3, %c0_4] : memref<32x64xbf16, #tpu.memory_space<vmem>>, vector<32x64xbf16>
    %cst = arith.constant dense<0.000000e+00> : vector<16x64xf32>
    %4 = tpu.matmul %2, %3, %cst {dimension_numbers = #tpu.dot_dimension_numbers<[1], [0], [0], [1], [0, 0, 1, 1], [], []>} : vector<16x32xbf16>, vector<32x64xbf16>, vector<16x64xf32> -> vector<16x64xf32>
    %c0_5 = arith.constant 0 : index
    %c0_6 = arith.constant 0 : index
    %5 = vector.load %arg2[%c0_5, %c0_6] : memref<1x4224xf32, #tpu.memory_space<vmem>>, vector<1x64xf32>
    %6 = vector.broadcast %5 : vector<1x64xf32> to vector<16x64xf32>
    %7 = arith.addf %4, %6 : vector<16x64xf32>
    %8 = arith.truncf %7 : vector<16x64xf32> to vector<16x64xbf16>
    %c0_7 = arith.constant 0 : index
    %c0_8 = arith.constant 0 : index
    %9 = vector.load %arg4[%c0_7, %c0_8] : memref<64x192xbf16, #tpu.memory_space<vmem>>, vector<64x192xbf16>
    %cst_9 = arith.constant dense<0.000000e+00> : vector<16x192xf32>
    %10 = tpu.matmul %8, %9, %cst_9 {dimension_numbers = #tpu.dot_dimension_numbers<[1], [0], [0], [1], [0, 0, 1, 1], [], []>} : vector<16x64xbf16>, vector<64x192xbf16>, vector<16x192xf32> -> vector<16x192xf32>
    %c0_10 = arith.constant 0 : index
    %c128 = arith.constant 128 : index
    %11 = vector.load %arg2[%c0_10, %c128] : memref<1x4224xf32, #tpu.memory_space<vmem>>, vector<1x192xf32>
    %12 = vector.broadcast %11 : vector<1x192xf32> to vector<16x192xf32>
    %13 = arith.addf %10, %12 : vector<16x192xf32>
    %14 = vector.extract_strided_slice %13 {offsets = [0, 0], sizes = [16, 64], strides = [1, 1]} : vector<16x192xf32> to vector<16x64xf32>
    %cst_11 = arith.constant 2.500000e-01 : f32
    %15 = vector.broadcast %cst_11 : f32 to vector<16x64xf32>
    %16 = arith.mulf %14, %15 : vector<16x64xf32>
    %17 = arith.truncf %16 : vector<16x64xf32> to vector<16x64xbf16>
    %18 = vector.extract_strided_slice %13 {offsets = [0, 64], sizes = [16, 64], strides = [1, 1]} : vector<16x192xf32> to vector<16x64xf32>
    %19 = arith.truncf %18 : vector<16x64xf32> to vector<16x64xbf16>
    %20 = vector.extract_strided_slice %13 {offsets = [0, 128], sizes = [16, 64], strides = [1, 1]} : vector<16x192xf32> to vector<16x64xf32>
    %21 = arith.truncf %20 : vector<16x64xf32> to vector<16x64xbf16>
    %22 = vector.extract_strided_slice %17 {offsets = [0, 0], sizes = [16, 16], strides = [1, 1]} : vector<16x64xbf16> to vector<16x16xbf16>
    %23 = vector.extract_strided_slice %19 {offsets = [0, 0], sizes = [16, 16], strides = [1, 1]} : vector<16x64xbf16> to vector<16x16xbf16>
    %cst_12 = arith.constant dense<0.000000e+00> : vector<16x16xf32>
    %24 = tpu.matmul %22, %23, %cst_12 {dimension_numbers = #tpu.dot_dimension_numbers<[1], [1], [0], [0], [0, 0, 1, 0], [], []>} : vector<16x16xbf16>, vector<16x16xbf16>, vector<16x16xf32> -> vector<16x16xf32>
    %25 = arith.addf %24, %0 : vector<16x16xf32>
    %cst_13 = arith.constant dense<0xFF800000> : vector<16xf32>
    %26 = vector.multi_reduction <maximumf>, %25, %cst_13 [1] : vector<16x16xf32> to vector<16xf32>
    %27 = vector.shape_cast %26 : vector<16xf32> to vector<16x1xf32>
    %28 = vector.broadcast %27 : vector<16x1xf32> to vector<16x16xf32>
    %29 = arith.subf %25, %28 : vector<16x16xf32>
    %30 = math.exp %29 : vector<16x16xf32>
    %cst_14 = arith.constant dense<0.000000e+00> : vector<16xf32>
    %31 = vector.multi_reduction <add>, %30, %cst_14 [1] : vector<16x16xf32> to vector<16xf32>
    %32 = vector.shape_cast %31 : vector<16xf32> to vector<16x1xf32>
    %33 = tpu.reciprocal %32 {approx = true} : vector<16x1xf32> -> vector<16x1xf32>
    %34 = vector.broadcast %33 : vector<16x1xf32> to vector<16x16xf32>
    %35 = arith.mulf %30, %34 : vector<16x16xf32>
    %36 = arith.truncf %35 : vector<16x16xf32> to vector<16x16xbf16>
    %37 = vector.extract_strided_slice %21 {offsets = [0, 0], sizes = [16, 16], strides = [1, 1]} : vector<16x64xbf16> to vector<16x16xbf16>
    %cst_15 = arith.constant dense<0.000000e+00> : vector<16x16xf32>
    %38 = tpu.matmul %36, %37, %cst_15 {dimension_numbers = #tpu.dot_dimension_numbers<[1], [0], [0], [1], [0, 0, 1, 1], [], []>} : vector<16x16xbf16>, vector<16x16xbf16>, vector<16x16xf32> -> vector<16x16xf32>
    %c0_16 = arith.constant 0 : index
    %c0_17 = arith.constant 0 : index
    %39 = vector.load %arg19[%c0_16, %c0_17] : memref<16x64xf32, #tpu.memory_space<vmem>>, vector<16x16xf32>
    tpu.vector_store %arg19[%c0_16, %c0_17], %38 {strides = array<i32>} : memref<16x64xf32, #tpu.memory_space<vmem>>, vector<16x16xf32>,
    %40 = vector.extract_strided_slice %17 {offsets = [0, 16], sizes = [16, 16], strides = [1, 1]} : vector<16x64xbf16> to vector<16x16xbf16>
    %41 = vector.extract_strided_slice %19 {offsets = [0, 16], sizes = [16, 16], strides = [1, 1]} : vector<16x64xbf16> to vector<16x16xbf16>
    %cst_18 = arith.constant dense<0.000000e+00> : vector<16x16xf32>
    %42 = tpu.matmul %40, %41, %cst_18 {dimension_numbers = #tpu.dot_dimension_numbers<[1], [1], [0], [0], [0, 0, 1, 0], [], []>} : vector<16x16xbf16>, vector<16x16xbf16>, vector<16x16xf32> -> vector<16x16xf32>
    %43 = arith.addf %42, %0 : vector<16x16xf32>
    %cst_19 = arith.constant dense<0xFF800000> : vector<16xf32>
    %44 = vector.multi_reduction <maximumf>, %43, %cst_19 [1] : vector<16x16xf32> to vector<16xf32>
    %45 = vector.shape_cast %44 : vector<16xf32> to vector<16x1xf32>
    %46 = vector.broadcast %45 : vector<16x1xf32> to vector<16x16xf32>
    %47 = arith.subf %43, %46 : vector<16x16xf32>
    %48 = math.exp %47 : vector<16x16xf32>
    %cst_20 = arith.constant dense<0.000000e+00> : vector<16xf32>
    %49 = vector.multi_reduction <add>, %48, %cst_20 [1] : vector<16x16xf32> to vector<16xf32>
    %50 = vector.shape_cast %49 : vector<16xf32> to vector<16x1xf32>
    %51 = tpu.reciprocal %50 {approx = true} : vector<16x1xf32> -> vector<16x1xf32>
    %52 = vector.broadcast %51 : vector<16x1xf32> to vector<16x16xf32>
    %53 = arith.mulf %48, %52 : vector<16x16xf32>
    %54 = arith.truncf %53 : vector<16x16xf32> to vector<16x16xbf16>
    %55 = vector.extract_strided_slice %21 {offsets = [0, 16], sizes = [16, 16], strides = [1, 1]} : vector<16x64xbf16> to vector<16x16xbf16>
    %cst_21 = arith.constant dense<0.000000e+00> : vector<16x16xf32>
    %56 = tpu.matmul %54, %55, %cst_21 {dimension_numbers = #tpu.dot_dimension_numbers<[1], [0], [0], [1], [0, 0, 1, 1], [], []>} : vector<16x16xbf16>, vector<16x16xbf16>, vector<16x16xf32> -> vector<16x16xf32>
    %c0_22 = arith.constant 0 : index
    %c16 = arith.constant 16 : index
    %57 = vector.load %arg19[%c0_22, %c16] : memref<16x64xf32, #tpu.memory_space<vmem>>, vector<16x16xf32>
    tpu.vector_store %arg19[%c0_22, %c16], %56 {strides = array<i32>} : memref<16x64xf32, #tpu.memory_space<vmem>>, vector<16x16xf32>,
    %58 = vector.extract_strided_slice %17 {offsets = [0, 32], sizes = [16, 16], strides = [1, 1]} : vector<16x64xbf16> to vector<16x16xbf16>
    %59 = vector.extract_strided_slice %19 {offsets = [0, 32], sizes = [16, 16], strides = [1, 1]} : vector<16x64xbf16> to vector<16x16xbf16>
    %cst_23 = arith.constant dense<0.000000e+00> : vector<16x16xf32>
    %60 = tpu.matmul %58, %59, %cst_23 {dimension_numbers = #tpu.dot_dimension_numbers<[1], [1], [0], [0], [0, 0, 1, 0], [], []>} : vector<16x16xbf16>, vector<16x16xbf16>, vector<16x16xf32> -> vector<16x16xf32>
    %61 = arith.addf %60, %0 : vector<16x16xf32>
    %cst_24 = arith.constant dense<0xFF800000> : vector<16xf32>
    %62 = vector.multi_reduction <maximumf>, %61, %cst_24 [1] : vector<16x16xf32> to vector<16xf32>
    %63 = vector.shape_cast %62 : vector<16xf32> to vector<16x1xf32>
    %64 = vector.broadcast %63 : vector<16x1xf32> to vector<16x16xf32>
    %65 = arith.subf %61, %64 : vector<16x16xf32>
    %66 = math.exp %65 : vector<16x16xf32>
    %cst_25 = arith.constant dense<0.000000e+00> : vector<16xf32>
    %67 = vector.multi_reduction <add>, %66, %cst_25 [1] : vector<16x16xf32> to vector<16xf32>
    %68 = vector.shape_cast %67 : vector<16xf32> to vector<16x1xf32>
    %69 = tpu.reciprocal %68 {approx = true} : vector<16x1xf32> -> vector<16x1xf32>
    %70 = vector.broadcast %69 : vector<16x1xf32> to vector<16x16xf32>
    %71 = arith.mulf %66, %70 : vector<16x16xf32>
    %72 = arith.truncf %71 : vector<16x16xf32> to vector<16x16xbf16>
    %73 = vector.extract_strided_slice %21 {offsets = [0, 32], sizes = [16, 16], strides = [1, 1]} : vector<16x64xbf16> to vector<16x16xbf16>
    %cst_26 = arith.constant dense<0.000000e+00> : vector<16x16xf32>
    %74 = tpu.matmul %72, %73, %cst_26 {dimension_numbers = #tpu.dot_dimension_numbers<[1], [0], [0], [1], [0, 0, 1, 1], [], []>} : vector<16x16xbf16>, vector<16x16xbf16>, vector<16x16xf32> -> vector<16x16xf32>
    %c0_27 = arith.constant 0 : index
    %c32 = arith.constant 32 : index
    %75 = vector.load %arg19[%c0_27, %c32] : memref<16x64xf32, #tpu.memory_space<vmem>>, vector<16x16xf32>
    tpu.vector_store %arg19[%c0_27, %c32], %74 {strides = array<i32>} : memref<16x64xf32, #tpu.memory_space<vmem>>, vector<16x16xf32>,
    %76 = vector.extract_strided_slice %17 {offsets = [0, 48], sizes = [16, 16], strides = [1, 1]} : vector<16x64xbf16> to vector<16x16xbf16>
    %77 = vector.extract_strided_slice %19 {offsets = [0, 48], sizes = [16, 16], strides = [1, 1]} : vector<16x64xbf16> to vector<16x16xbf16>
    %cst_28 = arith.constant dense<0.000000e+00> : vector<16x16xf32>
    %78 = tpu.matmul %76, %77, %cst_28 {dimension_numbers = #tpu.dot_dimension_numbers<[1], [1], [0], [0], [0, 0, 1, 0], [], []>} : vector<16x16xbf16>, vector<16x16xbf16>, vector<16x16xf32> -> vector<16x16xf32>
    %79 = arith.addf %78, %0 : vector<16x16xf32>
    %cst_29 = arith.constant dense<0xFF800000> : vector<16xf32>
    %80 = vector.multi_reduction <maximumf>, %79, %cst_29 [1] : vector<16x16xf32> to vector<16xf32>
    %81 = vector.shape_cast %80 : vector<16xf32> to vector<16x1xf32>
    %82 = vector.broadcast %81 : vector<16x1xf32> to vector<16x16xf32>
    %83 = arith.subf %79, %82 : vector<16x16xf32>
    %84 = math.exp %83 : vector<16x16xf32>
    %cst_30 = arith.constant dense<0.000000e+00> : vector<16xf32>
    %85 = vector.multi_reduction <add>, %84, %cst_30 [1] : vector<16x16xf32> to vector<16xf32>
    %86 = vector.shape_cast %85 : vector<16xf32> to vector<16x1xf32>
    %87 = tpu.reciprocal %86 {approx = true} : vector<16x1xf32> -> vector<16x1xf32>
    %88 = vector.broadcast %87 : vector<16x1xf32> to vector<16x16xf32>
    %89 = arith.mulf %84, %88 : vector<16x16xf32>
    %90 = arith.truncf %89 : vector<16x16xf32> to vector<16x16xbf16>
    %91 = vector.extract_strided_slice %21 {offsets = [0, 48], sizes = [16, 16], strides = [1, 1]} : vector<16x64xbf16> to vector<16x16xbf16>
    %cst_31 = arith.constant dense<0.000000e+00> : vector<16x16xf32>
    %92 = tpu.matmul %90, %91, %cst_31 {dimension_numbers = #tpu.dot_dimension_numbers<[1], [0], [0], [1], [0, 0, 1, 1], [], []>} : vector<16x16xbf16>, vector<16x16xbf16>, vector<16x16xf32> -> vector<16x16xf32>
    %c0_32 = arith.constant 0 : index
    %c48 = arith.constant 48 : index
    %93 = vector.load %arg19[%c0_32, %c48] : memref<16x64xf32, #tpu.memory_space<vmem>>, vector<16x16xf32>
    tpu.vector_store %arg19[%c0_32, %c48], %92 {strides = array<i32>} : memref<16x64xf32, #tpu.memory_space<vmem>>, vector<16x16xf32>,
    %c0_33 = arith.constant 0 : index
    %c0_34 = arith.constant 0 : index
    %94 = vector.load %arg19[%c0_33, %c0_34] : memref<16x64xf32, #tpu.memory_space<vmem>>, vector<16x64xf32>
    %95 = arith.truncf %94 : vector<16x64xf32> to vector<16x64xbf16>
    %c0_35 = arith.constant 0 : index
    %c0_36 = arith.constant 0 : index
    %96 = vector.load %arg5[%c0_35, %c0_36] : memref<64x64xbf16, #tpu.memory_space<vmem>>, vector<64x64xbf16>
    %cst_37 = arith.constant dense<0.000000e+00> : vector<16x64xf32>
    %97 = tpu.matmul %95, %96, %cst_37 {dimension_numbers = #tpu.dot_dimension_numbers<[1], [0], [0], [1], [0, 0, 1, 1], [], []>} : vector<16x64xbf16>, vector<64x64xbf16>, vector<16x64xf32> -> vector<16x64xf32>
    %c0_38 = arith.constant 0 : index
    %c384 = arith.constant 384 : index
    %98 = vector.load %arg2[%c0_38, %c384] : memref<1x4224xf32, #tpu.memory_space<vmem>>, vector<1x64xf32>
    %99 = vector.broadcast %98 : vector<1x64xf32> to vector<16x64xf32>
    %100 = arith.addf %97, %99 : vector<16x64xf32>
    %101 = arith.addf %7, %100 : vector<16x64xf32>
    %c0_39 = arith.constant 0 : index
    %c512 = arith.constant 512 : index
    %102 = vector.load %arg2[%c0_39, %c512] : memref<1x4224xf32, #tpu.memory_space<vmem>>, vector<1x64xf32>
    %c0_40 = arith.constant 0 : index
    %c640 = arith.constant 640 : index
    %103 = vector.load %arg2[%c0_40, %c640] : memref<1x4224xf32, #tpu.memory_space<vmem>>, vector<1x64xf32>
    %cst_41 = arith.constant dense<0.000000e+00> : vector<16xf32>
    %104 = vector.multi_reduction <add>, %101, %cst_41 [1] : vector<16x64xf32> to vector<16xf32>
    %105 = vector.shape_cast %104 : vector<16xf32> to vector<16x1xf32>
    %cst_42 = arith.constant 6.400000e+01 : f32
    %106 = vector.broadcast %cst_42 : f32 to vector<16x1xf32>
    %107 = arith.divf %105, %106 : vector<16x1xf32>
    %108 = vector.broadcast %107 : vector<16x1xf32> to vector<16x64xf32>
    %109 = arith.subf %101, %108 : vector<16x64xf32>
    %110 = arith.mulf %109, %109 : vector<16x64xf32>
    %cst_43 = arith.constant dense<0.000000e+00> : vector<16xf32>
    %111 = vector.multi_reduction <add>, %110, %cst_43 [1] : vector<16x64xf32> to vector<16xf32>
    %112 = vector.shape_cast %111 : vector<16xf32> to vector<16x1xf32>
    %cst_44 = arith.constant 6.400000e+01 : f32
    %113 = vector.broadcast %cst_44 : f32 to vector<16x1xf32>
    %114 = arith.divf %112, %113 : vector<16x1xf32>
    %115 = vector.broadcast %107 : vector<16x1xf32> to vector<16x64xf32>
    %116 = arith.subf %101, %115 : vector<16x64xf32>
    %cst_45 = arith.constant 9.99999974E-6 : f32
    %117 = vector.broadcast %cst_45 : f32 to vector<16x1xf32>
    %118 = arith.addf %114, %117 : vector<16x1xf32>
    %119 = math.rsqrt %118 : vector<16x1xf32>
    %120 = vector.broadcast %119 : vector<16x1xf32> to vector<16x64xf32>
    %121 = arith.mulf %116, %120 : vector<16x64xf32>
    %122 = vector.broadcast %102 : vector<1x64xf32> to vector<16x64xf32>
    %123 = arith.mulf %121, %122 : vector<16x64xf32>
    %124 = vector.broadcast %103 : vector<1x64xf32> to vector<16x64xf32>
    %125 = arith.addf %123, %124 : vector<16x64xf32>
    %126 = arith.truncf %125 : vector<16x64xf32> to vector<16x64xbf16>
    %c0_46 = arith.constant 0 : index
    %c0_47 = arith.constant 0 : index
    %127 = vector.load %arg6[%c0_46, %c0_47] : memref<64x256xbf16, #tpu.memory_space<vmem>>, vector<64x256xbf16>
    %cst_48 = arith.constant dense<0.000000e+00> : vector<16x256xf32>
    %128 = tpu.matmul %126, %127, %cst_48 {dimension_numbers = #tpu.dot_dimension_numbers<[1], [0], [0], [1], [0, 0, 1, 1], [], []>} : vector<16x64xbf16>, vector<64x256xbf16>, vector<16x256xf32> -> vector<16x256xf32>
    %c0_49 = arith.constant 0 : index
    %c768 = arith.constant 768 : index
    %129 = vector.load %arg2[%c0_49, %c768] : memref<1x4224xf32, #tpu.memory_space<vmem>>, vector<1x256xf32>
    %130 = vector.broadcast %129 : vector<1x256xf32> to vector<16x256xf32>
    %131 = arith.addf %128, %130 : vector<16x256xf32>
    %132 = arith.mulf %131, %131 : vector<16x256xf32>
    %133 = arith.mulf %131, %132 : vector<16x256xf32>
    %cst_50 = arith.constant 4.471500e-02 : f32
    %134 = vector.broadcast %cst_50 : f32 to vector<16x256xf32>
    %135 = arith.mulf %134, %133 : vector<16x256xf32>
    %136 = arith.addf %131, %135 : vector<16x256xf32>
    %cst_51 = arith.constant 0.797884583 : f32
    %137 = vector.broadcast %cst_51 : f32 to vector<16x256xf32>
    %138 = arith.mulf %137, %136 : vector<16x256xf32>
    %139 = math.tanh %138 : vector<16x256xf32>
    %cst_52 = arith.constant 1.000000e+00 : f32
    %140 = vector.broadcast %cst_52 : f32 to vector<16x256xf32>
    %141 = arith.addf %140, %139 : vector<16x256xf32>
    %cst_53 = arith.constant 5.000000e-01 : f32
    %142 = vector.broadcast %cst_53 : f32 to vector<16x256xf32>
    %143 = arith.mulf %142, %141 : vector<16x256xf32>
    %144 = arith.mulf %131, %143 : vector<16x256xf32>
    %145 = arith.truncf %144 : vector<16x256xf32> to vector<16x256xbf16>
    %c0_54 = arith.constant 0 : index
    %c0_55 = arith.constant 0 : index
    %146 = vector.load %arg7[%c0_54, %c0_55] : memref<256x64xbf16, #tpu.memory_space<vmem>>, vector<256x64xbf16>
    %cst_56 = arith.constant dense<0.000000e+00> : vector<16x64xf32>
    %147 = tpu.matmul %145, %146, %cst_56 {dimension_numbers = #tpu.dot_dimension_numbers<[1], [0], [0], [1], [0, 0, 1, 1], [], []>} : vector<16x256xbf16>, vector<256x64xbf16>, vector<16x64xf32> -> vector<16x64xf32>
    %c0_57 = arith.constant 0 : index
    %c1024 = arith.constant 1024 : index
    %148 = vector.load %arg2[%c0_57, %c1024] : memref<1x4224xf32, #tpu.memory_space<vmem>>, vector<1x64xf32>
    %149 = vector.broadcast %148 : vector<1x64xf32> to vector<16x64xf32>
    %150 = arith.addf %147, %149 : vector<16x64xf32>
    %151 = arith.addf %125, %150 : vector<16x64xf32>
    %c0_58 = arith.constant 0 : index
    %c1152 = arith.constant 1152 : index
    %152 = vector.load %arg2[%c0_58, %c1152] : memref<1x4224xf32, #tpu.memory_space<vmem>>, vector<1x64xf32>
    %c0_59 = arith.constant 0 : index
    %c1280 = arith.constant 1280 : index
    %153 = vector.load %arg2[%c0_59, %c1280] : memref<1x4224xf32, #tpu.memory_space<vmem>>, vector<1x64xf32>
    %cst_60 = arith.constant dense<0.000000e+00> : vector<16xf32>
    %154 = vector.multi_reduction <add>, %151, %cst_60 [1] : vector<16x64xf32> to vector<16xf32>
    %155 = vector.shape_cast %154 : vector<16xf32> to vector<16x1xf32>
    %cst_61 = arith.constant 6.400000e+01 : f32
    %156 = vector.broadcast %cst_61 : f32 to vector<16x1xf32>
    %157 = arith.divf %155, %156 : vector<16x1xf32>
    %158 = vector.broadcast %157 : vector<16x1xf32> to vector<16x64xf32>
    %159 = arith.subf %151, %158 : vector<16x64xf32>
    %160 = arith.mulf %159, %159 : vector<16x64xf32>
    %cst_62 = arith.constant dense<0.000000e+00> : vector<16xf32>
    %161 = vector.multi_reduction <add>, %160, %cst_62 [1] : vector<16x64xf32> to vector<16xf32>
    %162 = vector.shape_cast %161 : vector<16xf32> to vector<16x1xf32>
    %cst_63 = arith.constant 6.400000e+01 : f32
    %163 = vector.broadcast %cst_63 : f32 to vector<16x1xf32>
    %164 = arith.divf %162, %163 : vector<16x1xf32>
    %165 = vector.broadcast %157 : vector<16x1xf32> to vector<16x64xf32>
    %166 = arith.subf %151, %165 : vector<16x64xf32>
    %cst_64 = arith.constant 9.99999974E-6 : f32
    %167 = vector.broadcast %cst_64 : f32 to vector<16x1xf32>
    %168 = arith.addf %164, %167 : vector<16x1xf32>
    %169 = math.rsqrt %168 : vector<16x1xf32>
    %170 = vector.broadcast %169 : vector<16x1xf32> to vector<16x64xf32>
    %171 = arith.mulf %166, %170 : vector<16x64xf32>
    %172 = vector.broadcast %152 : vector<1x64xf32> to vector<16x64xf32>
    %173 = arith.mulf %171, %172 : vector<16x64xf32>
    %174 = vector.broadcast %153 : vector<1x64xf32> to vector<16x64xf32>
    %175 = arith.addf %173, %174 : vector<16x64xf32>
    %176 = arith.truncf %175 : vector<16x64xf32> to vector<16x64xbf16>
    %c0_65 = arith.constant 0 : index
    %c0_66 = arith.constant 0 : index
    %177 = vector.load %arg8[%c0_65, %c0_66] : memref<64x192xbf16, #tpu.memory_space<vmem>>, vector<64x192xbf16>
    %cst_67 = arith.constant dense<0.000000e+00> : vector<16x192xf32>
    %178 = tpu.matmul %176, %177, %cst_67 {dimension_numbers = #tpu.dot_dimension_numbers<[1], [0], [0], [1], [0, 0, 1, 1], [], []>} : vector<16x64xbf16>, vector<64x192xbf16>, vector<16x192xf32> -> vector<16x192xf32>
    %c0_68 = arith.constant 0 : index
    %c1408 = arith.constant 1408 : index
    %179 = vector.load %arg2[%c0_68, %c1408] : memref<1x4224xf32, #tpu.memory_space<vmem>>, vector<1x192xf32>
    %180 = vector.broadcast %179 : vector<1x192xf32> to vector<16x192xf32>
    %181 = arith.addf %178, %180 : vector<16x192xf32>
    %182 = vector.extract_strided_slice %181 {offsets = [0, 0], sizes = [16, 64], strides = [1, 1]} : vector<16x192xf32> to vector<16x64xf32>
    %cst_69 = arith.constant 2.500000e-01 : f32
    %183 = vector.broadcast %cst_69 : f32 to vector<16x64xf32>
    %184 = arith.mulf %182, %183 : vector<16x64xf32>
    %185 = arith.truncf %184 : vector<16x64xf32> to vector<16x64xbf16>
    %186 = vector.extract_strided_slice %181 {offsets = [0, 64], sizes = [16, 64], strides = [1, 1]} : vector<16x192xf32> to vector<16x64xf32>
    %187 = arith.truncf %186 : vector<16x64xf32> to vector<16x64xbf16>
    %188 = vector.extract_strided_slice %181 {offsets = [0, 128], sizes = [16, 64], strides = [1, 1]} : vector<16x192xf32> to vector<16x64xf32>
    %189 = arith.truncf %188 : vector<16x64xf32> to vector<16x64xbf16>
    %190 = vector.extract_strided_slice %185 {offsets = [0, 0], sizes = [16, 16], strides = [1, 1]} : vector<16x64xbf16> to vector<16x16xbf16>
    %191 = vector.extract_strided_slice %187 {offsets = [0, 0], sizes = [16, 16], strides = [1, 1]} : vector<16x64xbf16> to vector<16x16xbf16>
    %cst_70 = arith.constant dense<0.000000e+00> : vector<16x16xf32>
    %192 = tpu.matmul %190, %191, %cst_70 {dimension_numbers = #tpu.dot_dimension_numbers<[1], [1], [0], [0], [0, 0, 1, 0], [], []>} : vector<16x16xbf16>, vector<16x16xbf16>, vector<16x16xf32> -> vector<16x16xf32>
    %193 = arith.addf %192, %0 : vector<16x16xf32>
    %cst_71 = arith.constant dense<0xFF800000> : vector<16xf32>
    %194 = vector.multi_reduction <maximumf>, %193, %cst_71 [1] : vector<16x16xf32> to vector<16xf32>
    %195 = vector.shape_cast %194 : vector<16xf32> to vector<16x1xf32>
    %196 = vector.broadcast %195 : vector<16x1xf32> to vector<16x16xf32>
    %197 = arith.subf %193, %196 : vector<16x16xf32>
    %198 = math.exp %197 : vector<16x16xf32>
    %cst_72 = arith.constant dense<0.000000e+00> : vector<16xf32>
    %199 = vector.multi_reduction <add>, %198, %cst_72 [1] : vector<16x16xf32> to vector<16xf32>
    %200 = vector.shape_cast %199 : vector<16xf32> to vector<16x1xf32>
    %201 = tpu.reciprocal %200 {approx = true} : vector<16x1xf32> -> vector<16x1xf32>
    %202 = vector.broadcast %201 : vector<16x1xf32> to vector<16x16xf32>
    %203 = arith.mulf %198, %202 : vector<16x16xf32>
    %204 = arith.truncf %203 : vector<16x16xf32> to vector<16x16xbf16>
    %205 = vector.extract_strided_slice %189 {offsets = [0, 0], sizes = [16, 16], strides = [1, 1]} : vector<16x64xbf16> to vector<16x16xbf16>
    %cst_73 = arith.constant dense<0.000000e+00> : vector<16x16xf32>
    %206 = tpu.matmul %204, %205, %cst_73 {dimension_numbers = #tpu.dot_dimension_numbers<[1], [0], [0], [1], [0, 0, 1, 1], [], []>} : vector<16x16xbf16>, vector<16x16xbf16>, vector<16x16xf32> -> vector<16x16xf32>
    %c0_74 = arith.constant 0 : index
    %c0_75 = arith.constant 0 : index
    %207 = vector.load %arg19[%c0_74, %c0_75] : memref<16x64xf32, #tpu.memory_space<vmem>>, vector<16x16xf32>
    tpu.vector_store %arg19[%c0_74, %c0_75], %206 {strides = array<i32>} : memref<16x64xf32, #tpu.memory_space<vmem>>, vector<16x16xf32>,
    %208 = vector.extract_strided_slice %185 {offsets = [0, 16], sizes = [16, 16], strides = [1, 1]} : vector<16x64xbf16> to vector<16x16xbf16>
    %209 = vector.extract_strided_slice %187 {offsets = [0, 16], sizes = [16, 16], strides = [1, 1]} : vector<16x64xbf16> to vector<16x16xbf16>
    %cst_76 = arith.constant dense<0.000000e+00> : vector<16x16xf32>
    %210 = tpu.matmul %208, %209, %cst_76 {dimension_numbers = #tpu.dot_dimension_numbers<[1], [1], [0], [0], [0, 0, 1, 0], [], []>} : vector<16x16xbf16>, vector<16x16xbf16>, vector<16x16xf32> -> vector<16x16xf32>
    %211 = arith.addf %210, %0 : vector<16x16xf32>
    %cst_77 = arith.constant dense<0xFF800000> : vector<16xf32>
    %212 = vector.multi_reduction <maximumf>, %211, %cst_77 [1] : vector<16x16xf32> to vector<16xf32>
    %213 = vector.shape_cast %212 : vector<16xf32> to vector<16x1xf32>
    %214 = vector.broadcast %213 : vector<16x1xf32> to vector<16x16xf32>
    %215 = arith.subf %211, %214 : vector<16x16xf32>
    %216 = math.exp %215 : vector<16x16xf32>
    %cst_78 = arith.constant dense<0.000000e+00> : vector<16xf32>
    %217 = vector.multi_reduction <add>, %216, %cst_78 [1] : vector<16x16xf32> to vector<16xf32>
    %218 = vector.shape_cast %217 : vector<16xf32> to vector<16x1xf32>
    %219 = tpu.reciprocal %218 {approx = true} : vector<16x1xf32> -> vector<16x1xf32>
    %220 = vector.broadcast %219 : vector<16x1xf32> to vector<16x16xf32>
    %221 = arith.mulf %216, %220 : vector<16x16xf32>
    %222 = arith.truncf %221 : vector<16x16xf32> to vector<16x16xbf16>
    %223 = vector.extract_strided_slice %189 {offsets = [0, 16], sizes = [16, 16], strides = [1, 1]} : vector<16x64xbf16> to vector<16x16xbf16>
    %cst_79 = arith.constant dense<0.000000e+00> : vector<16x16xf32>
    %224 = tpu.matmul %222, %223, %cst_79 {dimension_numbers = #tpu.dot_dimension_numbers<[1], [0], [0], [1], [0, 0, 1, 1], [], []>} : vector<16x16xbf16>, vector<16x16xbf16>, vector<16x16xf32> -> vector<16x16xf32>
    %c0_80 = arith.constant 0 : index
    %c16_81 = arith.constant 16 : index
    %225 = vector.load %arg19[%c0_80, %c16_81] : memref<16x64xf32, #tpu.memory_space<vmem>>, vector<16x16xf32>
    tpu.vector_store %arg19[%c0_80, %c16_81], %224 {strides = array<i32>} : memref<16x64xf32, #tpu.memory_space<vmem>>, vector<16x16xf32>,
    %226 = vector.extract_strided_slice %185 {offsets = [0, 32], sizes = [16, 16], strides = [1, 1]} : vector<16x64xbf16> to vector<16x16xbf16>
    %227 = vector.extract_strided_slice %187 {offsets = [0, 32], sizes = [16, 16], strides = [1, 1]} : vector<16x64xbf16> to vector<16x16xbf16>
    %cst_82 = arith.constant dense<0.000000e+00> : vector<16x16xf32>
    %228 = tpu.matmul %226, %227, %cst_82 {dimension_numbers = #tpu.dot_dimension_numbers<[1], [1], [0], [0], [0, 0, 1, 0], [], []>} : vector<16x16xbf16>, vector<16x16xbf16>, vector<16x16xf32> -> vector<16x16xf32>
    %229 = arith.addf %228, %0 : vector<16x16xf32>
    %cst_83 = arith.constant dense<0xFF800000> : vector<16xf32>
    %230 = vector.multi_reduction <maximumf>, %229, %cst_83 [1] : vector<16x16xf32> to vector<16xf32>
    %231 = vector.shape_cast %230 : vector<16xf32> to vector<16x1xf32>
    %232 = vector.broadcast %231 : vector<16x1xf32> to vector<16x16xf32>
    %233 = arith.subf %229, %232 : vector<16x16xf32>
    %234 = math.exp %233 : vector<16x16xf32>
    %cst_84 = arith.constant dense<0.000000e+00> : vector<16xf32>
    %235 = vector.multi_reduction <add>, %234, %cst_84 [1] : vector<16x16xf32> to vector<16xf32>
    %236 = vector.shape_cast %235 : vector<16xf32> to vector<16x1xf32>
    %237 = tpu.reciprocal %236 {approx = true} : vector<16x1xf32> -> vector<16x1xf32>
    %238 = vector.broadcast %237 : vector<16x1xf32> to vector<16x16xf32>
    %239 = arith.mulf %234, %238 : vector<16x16xf32>
    %240 = arith.truncf %239 : vector<16x16xf32> to vector<16x16xbf16>
    %241 = vector.extract_strided_slice %189 {offsets = [0, 32], sizes = [16, 16], strides = [1, 1]} : vector<16x64xbf16> to vector<16x16xbf16>
    %cst_85 = arith.constant dense<0.000000e+00> : vector<16x16xf32>
    %242 = tpu.matmul %240, %241, %cst_85 {dimension_numbers = #tpu.dot_dimension_numbers<[1], [0], [0], [1], [0, 0, 1, 1], [], []>} : vector<16x16xbf16>, vector<16x16xbf16>, vector<16x16xf32> -> vector<16x16xf32>
    %c0_86 = arith.constant 0 : index
    %c32_87 = arith.constant 32 : index
    %243 = vector.load %arg19[%c0_86, %c32_87] : memref<16x64xf32, #tpu.memory_space<vmem>>, vector<16x16xf32>
    tpu.vector_store %arg19[%c0_86, %c32_87], %242 {strides = array<i32>} : memref<16x64xf32, #tpu.memory_space<vmem>>, vector<16x16xf32>,
    %244 = vector.extract_strided_slice %185 {offsets = [0, 48], sizes = [16, 16], strides = [1, 1]} : vector<16x64xbf16> to vector<16x16xbf16>
    %245 = vector.extract_strided_slice %187 {offsets = [0, 48], sizes = [16, 16], strides = [1, 1]} : vector<16x64xbf16> to vector<16x16xbf16>
    %cst_88 = arith.constant dense<0.000000e+00> : vector<16x16xf32>
    %246 = tpu.matmul %244, %245, %cst_88 {dimension_numbers = #tpu.dot_dimension_numbers<[1], [1], [0], [0], [0, 0, 1, 0], [], []>} : vector<16x16xbf16>, vector<16x16xbf16>, vector<16x16xf32> -> vector<16x16xf32>
    %247 = arith.addf %246, %0 : vector<16x16xf32>
    %cst_89 = arith.constant dense<0xFF800000> : vector<16xf32>
    %248 = vector.multi_reduction <maximumf>, %247, %cst_89 [1] : vector<16x16xf32> to vector<16xf32>
    %249 = vector.shape_cast %248 : vector<16xf32> to vector<16x1xf32>
    %250 = vector.broadcast %249 : vector<16x1xf32> to vector<16x16xf32>
    %251 = arith.subf %247, %250 : vector<16x16xf32>
    %252 = math.exp %251 : vector<16x16xf32>
    %cst_90 = arith.constant dense<0.000000e+00> : vector<16xf32>
    %253 = vector.multi_reduction <add>, %252, %cst_90 [1] : vector<16x16xf32> to vector<16xf32>
    %254 = vector.shape_cast %253 : vector<16xf32> to vector<16x1xf32>
    %255 = tpu.reciprocal %254 {approx = true} : vector<16x1xf32> -> vector<16x1xf32>
    %256 = vector.broadcast %255 : vector<16x1xf32> to vector<16x16xf32>
    %257 = arith.mulf %252, %256 : vector<16x16xf32>
    %258 = arith.truncf %257 : vector<16x16xf32> to vector<16x16xbf16>
    %259 = vector.extract_strided_slice %189 {offsets = [0, 48], sizes = [16, 16], strides = [1, 1]} : vector<16x64xbf16> to vector<16x16xbf16>
    %cst_91 = arith.constant dense<0.000000e+00> : vector<16x16xf32>
    %260 = tpu.matmul %258, %259, %cst_91 {dimension_numbers = #tpu.dot_dimension_numbers<[1], [0], [0], [1], [0, 0, 1, 1], [], []>} : vector<16x16xbf16>, vector<16x16xbf16>, vector<16x16xf32> -> vector<16x16xf32>
    %c0_92 = arith.constant 0 : index
    %c48_93 = arith.constant 48 : index
    %261 = vector.load %arg19[%c0_92, %c48_93] : memref<16x64xf32, #tpu.memory_space<vmem>>, vector<16x16xf32>
    tpu.vector_store %arg19[%c0_92, %c48_93], %260 {strides = array<i32>} : memref<16x64xf32, #tpu.memory_space<vmem>>, vector<16x16xf32>,
    %c0_94 = arith.constant 0 : index
    %c0_95 = arith.constant 0 : index
    %262 = vector.load %arg19[%c0_94, %c0_95] : memref<16x64xf32, #tpu.memory_space<vmem>>, vector<16x64xf32>
    %263 = arith.truncf %262 : vector<16x64xf32> to vector<16x64xbf16>
    %c0_96 = arith.constant 0 : index
    %c0_97 = arith.constant 0 : index
    %264 = vector.load %arg9[%c0_96, %c0_97] : memref<64x64xbf16, #tpu.memory_space<vmem>>, vector<64x64xbf16>
    %cst_98 = arith.constant dense<0.000000e+00> : vector<16x64xf32>
    %265 = tpu.matmul %263, %264, %cst_98 {dimension_numbers = #tpu.dot_dimension_numbers<[1], [0], [0], [1], [0, 0, 1, 1], [], []>} : vector<16x64xbf16>, vector<64x64xbf16>, vector<16x64xf32> -> vector<16x64xf32>
    %c0_99 = arith.constant 0 : index
    %c1664 = arith.constant 1664 : index
    %266 = vector.load %arg2[%c0_99, %c1664] : memref<1x4224xf32, #tpu.memory_space<vmem>>, vector<1x64xf32>
    %267 = vector.broadcast %266 : vector<1x64xf32> to vector<16x64xf32>
    %268 = arith.addf %265, %267 : vector<16x64xf32>
    %269 = arith.addf %175, %268 : vector<16x64xf32>
    %c0_100 = arith.constant 0 : index
    %c1792 = arith.constant 1792 : index
    %270 = vector.load %arg2[%c0_100, %c1792] : memref<1x4224xf32, #tpu.memory_space<vmem>>, vector<1x64xf32>
    %c0_101 = arith.constant 0 : index
    %c1920 = arith.constant 1920 : index
    %271 = vector.load %arg2[%c0_101, %c1920] : memref<1x4224xf32, #tpu.memory_space<vmem>>, vector<1x64xf32>
    %cst_102 = arith.constant dense<0.000000e+00> : vector<16xf32>
    %272 = vector.multi_reduction <add>, %269, %cst_102 [1] : vector<16x64xf32> to vector<16xf32>
    %273 = vector.shape_cast %272 : vector<16xf32> to vector<16x1xf32>
    %cst_103 = arith.constant 6.400000e+01 : f32
    %274 = vector.broadcast %cst_103 : f32 to vector<16x1xf32>
    %275 = arith.divf %273, %274 : vector<16x1xf32>
    %276 = vector.broadcast %275 : vector<16x1xf32> to vector<16x64xf32>
    %277 = arith.subf %269, %276 : vector<16x64xf32>
    %278 = arith.mulf %277, %277 : vector<16x64xf32>
    %cst_104 = arith.constant dense<0.000000e+00> : vector<16xf32>
    %279 = vector.multi_reduction <add>, %278, %cst_104 [1] : vector<16x64xf32> to vector<16xf32>
    %280 = vector.shape_cast %279 : vector<16xf32> to vector<16x1xf32>
    %cst_105 = arith.constant 6.400000e+01 : f32
    %281 = vector.broadcast %cst_105 : f32 to vector<16x1xf32>
    %282 = arith.divf %280, %281 : vector<16x1xf32>
    %283 = vector.broadcast %275 : vector<16x1xf32> to vector<16x64xf32>
    %284 = arith.subf %269, %283 : vector<16x64xf32>
    %cst_106 = arith.constant 9.99999974E-6 : f32
    %285 = vector.broadcast %cst_106 : f32 to vector<16x1xf32>
    %286 = arith.addf %282, %285 : vector<16x1xf32>
    %287 = math.rsqrt %286 : vector<16x1xf32>
    %288 = vector.broadcast %287 : vector<16x1xf32> to vector<16x64xf32>
    %289 = arith.mulf %284, %288 : vector<16x64xf32>
    %290 = vector.broadcast %270 : vector<1x64xf32> to vector<16x64xf32>
    %291 = arith.mulf %289, %290 : vector<16x64xf32>
    %292 = vector.broadcast %271 : vector<1x64xf32> to vector<16x64xf32>
    %293 = arith.addf %291, %292 : vector<16x64xf32>
    %294 = arith.truncf %293 : vector<16x64xf32> to vector<16x64xbf16>
    %c0_107 = arith.constant 0 : index
    %c0_108 = arith.constant 0 : index
    %295 = vector.load %arg10[%c0_107, %c0_108] : memref<64x256xbf16, #tpu.memory_space<vmem>>, vector<64x256xbf16>
    %cst_109 = arith.constant dense<0.000000e+00> : vector<16x256xf32>
    %296 = tpu.matmul %294, %295, %cst_109 {dimension_numbers = #tpu.dot_dimension_numbers<[1], [0], [0], [1], [0, 0, 1, 1], [], []>} : vector<16x64xbf16>, vector<64x256xbf16>, vector<16x256xf32> -> vector<16x256xf32>
    %c0_110 = arith.constant 0 : index
    %c2048 = arith.constant 2048 : index
    %297 = vector.load %arg2[%c0_110, %c2048] : memref<1x4224xf32, #tpu.memory_space<vmem>>, vector<1x256xf32>
    %298 = vector.broadcast %297 : vector<1x256xf32> to vector<16x256xf32>
    %299 = arith.addf %296, %298 : vector<16x256xf32>
    %300 = arith.mulf %299, %299 : vector<16x256xf32>
    %301 = arith.mulf %299, %300 : vector<16x256xf32>
    %cst_111 = arith.constant 4.471500e-02 : f32
    %302 = vector.broadcast %cst_111 : f32 to vector<16x256xf32>
    %303 = arith.mulf %302, %301 : vector<16x256xf32>
    %304 = arith.addf %299, %303 : vector<16x256xf32>
    %cst_112 = arith.constant 0.797884583 : f32
    %305 = vector.broadcast %cst_112 : f32 to vector<16x256xf32>
    %306 = arith.mulf %305, %304 : vector<16x256xf32>
    %307 = math.tanh %306 : vector<16x256xf32>
    %cst_113 = arith.constant 1.000000e+00 : f32
    %308 = vector.broadcast %cst_113 : f32 to vector<16x256xf32>
    %309 = arith.addf %308, %307 : vector<16x256xf32>
    %cst_114 = arith.constant 5.000000e-01 : f32
    %310 = vector.broadcast %cst_114 : f32 to vector<16x256xf32>
    %311 = arith.mulf %310, %309 : vector<16x256xf32>
    %312 = arith.mulf %299, %311 : vector<16x256xf32>
    %313 = arith.truncf %312 : vector<16x256xf32> to vector<16x256xbf16>
    %c0_115 = arith.constant 0 : index
    %c0_116 = arith.constant 0 : index
    %314 = vector.load %arg11[%c0_115, %c0_116] : memref<256x64xbf16, #tpu.memory_space<vmem>>, vector<256x64xbf16>
    %cst_117 = arith.constant dense<0.000000e+00> : vector<16x64xf32>
    %315 = tpu.matmul %313, %314, %cst_117 {dimension_numbers = #tpu.dot_dimension_numbers<[1], [0], [0], [1], [0, 0, 1, 1], [], []>} : vector<16x256xbf16>, vector<256x64xbf16>, vector<16x64xf32> -> vector<16x64xf32>
    %c0_118 = arith.constant 0 : index
    %c2304 = arith.constant 2304 : index
    %316 = vector.load %arg2[%c0_118, %c2304] : memref<1x4224xf32, #tpu.memory_space<vmem>>, vector<1x64xf32>
    %317 = vector.broadcast %316 : vector<1x64xf32> to vector<16x64xf32>
    %318 = arith.addf %315, %317 : vector<16x64xf32>
    %319 = arith.addf %293, %318 : vector<16x64xf32>
    %c0_119 = arith.constant 0 : index
    %c2432 = arith.constant 2432 : index
    %320 = vector.load %arg2[%c0_119, %c2432] : memref<1x4224xf32, #tpu.memory_space<vmem>>, vector<1x64xf32>
    %c0_120 = arith.constant 0 : index
    %c2560 = arith.constant 2560 : index
    %321 = vector.load %arg2[%c0_120, %c2560] : memref<1x4224xf32, #tpu.memory_space<vmem>>, vector<1x64xf32>
    %cst_121 = arith.constant dense<0.000000e+00> : vector<16xf32>
    %322 = vector.multi_reduction <add>, %319, %cst_121 [1] : vector<16x64xf32> to vector<16xf32>
    %323 = vector.shape_cast %322 : vector<16xf32> to vector<16x1xf32>
    %cst_122 = arith.constant 6.400000e+01 : f32
    %324 = vector.broadcast %cst_122 : f32 to vector<16x1xf32>
    %325 = arith.divf %323, %324 : vector<16x1xf32>
    %326 = vector.broadcast %325 : vector<16x1xf32> to vector<16x64xf32>
    %327 = arith.subf %319, %326 : vector<16x64xf32>
    %328 = arith.mulf %327, %327 : vector<16x64xf32>
    %cst_123 = arith.constant dense<0.000000e+00> : vector<16xf32>
    %329 = vector.multi_reduction <add>, %328, %cst_123 [1] : vector<16x64xf32> to vector<16xf32>
    %330 = vector.shape_cast %329 : vector<16xf32> to vector<16x1xf32>
    %cst_124 = arith.constant 6.400000e+01 : f32
    %331 = vector.broadcast %cst_124 : f32 to vector<16x1xf32>
    %332 = arith.divf %330, %331 : vector<16x1xf32>
    %333 = vector.broadcast %325 : vector<16x1xf32> to vector<16x64xf32>
    %334 = arith.subf %319, %333 : vector<16x64xf32>
    %cst_125 = arith.constant 9.99999974E-6 : f32
    %335 = vector.broadcast %cst_125 : f32 to vector<16x1xf32>
    %336 = arith.addf %332, %335 : vector<16x1xf32>
    %337 = math.rsqrt %336 : vector<16x1xf32>
    %338 = vector.broadcast %337 : vector<16x1xf32> to vector<16x64xf32>
    %339 = arith.mulf %334, %338 : vector<16x64xf32>
    %340 = vector.broadcast %320 : vector<1x64xf32> to vector<16x64xf32>
    %341 = arith.mulf %339, %340 : vector<16x64xf32>
    %342 = vector.broadcast %321 : vector<1x64xf32> to vector<16x64xf32>
    %343 = arith.addf %341, %342 : vector<16x64xf32>
    %344 = arith.truncf %343 : vector<16x64xf32> to vector<16x64xbf16>
    %c0_126 = arith.constant 0 : index
    %c0_127 = arith.constant 0 : index
    %345 = vector.load %arg12[%c0_126, %c0_127] : memref<64x32xbf16, #tpu.memory_space<vmem>>, vector<64x32xbf16>
    %cst_128 = arith.constant dense<0.000000e+00> : vector<16x32xf32>
    %346 = tpu.matmul %344, %345, %cst_128 {dimension_numbers = #tpu.dot_dimension_numbers<[1], [0], [0], [1], [0, 0, 1, 1], [], []>} : vector<16x64xbf16>, vector<64x32xbf16>, vector<16x32xf32> -> vector<16x32xf32>
    %c0_129 = arith.constant 0 : index
    %c2688 = arith.constant 2688 : index
    %347 = vector.load %arg2[%c0_129, %c2688] : memref<1x4224xf32, #tpu.memory_space<vmem>>, vector<1x32xf32>
    %348 = vector.broadcast %347 : vector<1x32xf32> to vector<16x32xf32>
    %349 = arith.addf %346, %348 : vector<16x32xf32>
    %c0_130 = arith.constant 0 : index
    %c2816 = arith.constant 2816 : index
    %350 = vector.load %arg2[%c0_130, %c2816] : memref<1x4224xf32, #tpu.memory_space<vmem>>, vector<1x32xf32>
    %c0_131 = arith.constant 0 : index
    %c2944 = arith.constant 2944 : index
    %351 = vector.load %arg2[%c0_131, %c2944] : memref<1x4224xf32, #tpu.memory_space<vmem>>, vector<1x32xf32>
    %cst_132 = arith.constant dense<0.000000e+00> : vector<16xf32>
    %352 = vector.multi_reduction <add>, %349, %cst_132 [1] : vector<16x32xf32> to vector<16xf32>
    %353 = vector.shape_cast %352 : vector<16xf32> to vector<16x1xf32>
    %cst_133 = arith.constant 3.200000e+01 : f32
    %354 = vector.broadcast %cst_133 : f32 to vector<16x1xf32>
    %355 = arith.divf %353, %354 : vector<16x1xf32>
    %356 = vector.broadcast %355 : vector<16x1xf32> to vector<16x32xf32>
    %357 = arith.subf %349, %356 : vector<16x32xf32>
    %358 = arith.mulf %357, %357 : vector<16x32xf32>
    %cst_134 = arith.constant dense<0.000000e+00> : vector<16xf32>
    %359 = vector.multi_reduction <add>, %358, %cst_134 [1] : vector<16x32xf32> to vector<16xf32>
    %360 = vector.shape_cast %359 : vector<16xf32> to vector<16x1xf32>
    %cst_135 = arith.constant 3.200000e+01 : f32
    %361 = vector.broadcast %cst_135 : f32 to vector<16x1xf32>
    %362 = arith.divf %360, %361 : vector<16x1xf32>
    %363 = vector.broadcast %355 : vector<16x1xf32> to vector<16x32xf32>
    %364 = arith.subf %349, %363 : vector<16x32xf32>
    %cst_136 = arith.constant 9.99999974E-6 : f32
    %365 = vector.broadcast %cst_136 : f32 to vector<16x1xf32>
    %366 = arith.addf %362, %365 : vector<16x1xf32>
    %367 = math.rsqrt %366 : vector<16x1xf32>
    %368 = vector.broadcast %367 : vector<16x1xf32> to vector<16x32xf32>
    %369 = arith.mulf %364, %368 : vector<16x32xf32>
    %370 = vector.broadcast %350 : vector<1x32xf32> to vector<16x32xf32>
    %371 = arith.mulf %369, %370 : vector<16x32xf32>
    %372 = vector.broadcast %351 : vector<1x32xf32> to vector<16x32xf32>
    %373 = arith.addf %371, %372 : vector<16x32xf32>
    %374 = arith.truncf %373 : vector<16x32xf32> to vector<16x32xbf16>
    %c0_137 = arith.constant 0 : index
    %c0_138 = arith.constant 0 : index
    %375 = vector.load %arg13[%c0_137, %c0_138] : memref<32x96xbf16, #tpu.memory_space<vmem>>, vector<32x96xbf16>
    %cst_139 = arith.constant dense<0.000000e+00> : vector<16x96xf32>
    %376 = tpu.matmul %374, %375, %cst_139 {dimension_numbers = #tpu.dot_dimension_numbers<[1], [0], [0], [1], [0, 0, 1, 1], [], []>} : vector<16x32xbf16>, vector<32x96xbf16>, vector<16x96xf32> -> vector<16x96xf32>
    %c0_140 = arith.constant 0 : index
    %c3072 = arith.constant 3072 : index
    %377 = vector.load %arg2[%c0_140, %c3072] : memref<1x4224xf32, #tpu.memory_space<vmem>>, vector<1x96xf32>
    %378 = vector.broadcast %377 : vector<1x96xf32> to vector<16x96xf32>
    %379 = arith.addf %376, %378 : vector<16x96xf32>
    %380 = vector.extract_strided_slice %379 {offsets = [0, 0], sizes = [16, 32], strides = [1, 1]} : vector<16x96xf32> to vector<16x32xf32>
    %cst_141 = arith.constant 0.353553385 : f32
    %381 = vector.broadcast %cst_141 : f32 to vector<16x32xf32>
    %382 = arith.mulf %380, %381 : vector<16x32xf32>
    %383 = arith.truncf %382 : vector<16x32xf32> to vector<16x32xbf16>
    %384 = vector.extract_strided_slice %379 {offsets = [0, 32], sizes = [16, 32], strides = [1, 1]} : vector<16x96xf32> to vector<16x32xf32>
    %385 = arith.truncf %384 : vector<16x32xf32> to vector<16x32xbf16>
    %386 = vector.extract_strided_slice %379 {offsets = [0, 64], sizes = [16, 32], strides = [1, 1]} : vector<16x96xf32> to vector<16x32xf32>
    %387 = arith.truncf %386 : vector<16x32xf32> to vector<16x32xbf16>
    %388 = vector.extract_strided_slice %383 {offsets = [0, 0], sizes = [16, 8], strides = [1, 1]} : vector<16x32xbf16> to vector<16x8xbf16>
    %389 = vector.extract_strided_slice %385 {offsets = [0, 0], sizes = [16, 8], strides = [1, 1]} : vector<16x32xbf16> to vector<16x8xbf16>
    %cst_142 = arith.constant dense<0.000000e+00> : vector<16x16xf32>
    %390 = tpu.matmul %388, %389, %cst_142 {dimension_numbers = #tpu.dot_dimension_numbers<[1], [1], [0], [0], [0, 0, 1, 0], [], []>} : vector<16x8xbf16>, vector<16x8xbf16>, vector<16x16xf32> -> vector<16x16xf32>
    %391 = arith.addf %390, %0 : vector<16x16xf32>
    %cst_143 = arith.constant dense<0xFF800000> : vector<16xf32>
    %392 = vector.multi_reduction <maximumf>, %391, %cst_143 [1] : vector<16x16xf32> to vector<16xf32>
    %393 = vector.shape_cast %392 : vector<16xf32> to vector<16x1xf32>
    %394 = vector.broadcast %393 : vector<16x1xf32> to vector<16x16xf32>
    %395 = arith.subf %391, %394 : vector<16x16xf32>
    %396 = math.exp %395 : vector<16x16xf32>
    %cst_144 = arith.constant dense<0.000000e+00> : vector<16xf32>
    %397 = vector.multi_reduction <add>, %396, %cst_144 [1] : vector<16x16xf32> to vector<16xf32>
    %398 = vector.shape_cast %397 : vector<16xf32> to vector<16x1xf32>
    %399 = tpu.reciprocal %398 {approx = true} : vector<16x1xf32> -> vector<16x1xf32>
    %400 = vector.broadcast %399 : vector<16x1xf32> to vector<16x16xf32>
    %401 = arith.mulf %396, %400 : vector<16x16xf32>
    %402 = arith.truncf %401 : vector<16x16xf32> to vector<16x16xbf16>
    %403 = vector.extract_strided_slice %387 {offsets = [0, 0], sizes = [16, 8], strides = [1, 1]} : vector<16x32xbf16> to vector<16x8xbf16>
    %cst_145 = arith.constant dense<0.000000e+00> : vector<16x8xf32>
    %404 = tpu.matmul %402, %403, %cst_145 {dimension_numbers = #tpu.dot_dimension_numbers<[1], [0], [0], [1], [0, 0, 1, 1], [], []>} : vector<16x16xbf16>, vector<16x8xbf16>, vector<16x8xf32> -> vector<16x8xf32>
    %c0_146 = arith.constant 0 : index
    %c0_147 = arith.constant 0 : index
    %405 = vector.load %arg19[%c0_146, %c0_147] : memref<16x64xf32, #tpu.memory_space<vmem>>, vector<16x8xf32>
    tpu.vector_store %arg19[%c0_146, %c0_147], %404 {strides = array<i32>} : memref<16x64xf32, #tpu.memory_space<vmem>>, vector<16x8xf32>,
    %406 = vector.extract_strided_slice %383 {offsets = [0, 8], sizes = [16, 8], strides = [1, 1]} : vector<16x32xbf16> to vector<16x8xbf16>
    %407 = vector.extract_strided_slice %385 {offsets = [0, 8], sizes = [16, 8], strides = [1, 1]} : vector<16x32xbf16> to vector<16x8xbf16>
    %cst_148 = arith.constant dense<0.000000e+00> : vector<16x16xf32>
    %408 = tpu.matmul %406, %407, %cst_148 {dimension_numbers = #tpu.dot_dimension_numbers<[1], [1], [0], [0], [0, 0, 1, 0], [], []>} : vector<16x8xbf16>, vector<16x8xbf16>, vector<16x16xf32> -> vector<16x16xf32>
    %409 = arith.addf %408, %0 : vector<16x16xf32>
    %cst_149 = arith.constant dense<0xFF800000> : vector<16xf32>
    %410 = vector.multi_reduction <maximumf>, %409, %cst_149 [1] : vector<16x16xf32> to vector<16xf32>
    %411 = vector.shape_cast %410 : vector<16xf32> to vector<16x1xf32>
    %412 = vector.broadcast %411 : vector<16x1xf32> to vector<16x16xf32>
    %413 = arith.subf %409, %412 : vector<16x16xf32>
    %414 = math.exp %413 : vector<16x16xf32>
    %cst_150 = arith.constant dense<0.000000e+00> : vector<16xf32>
    %415 = vector.multi_reduction <add>, %414, %cst_150 [1] : vector<16x16xf32> to vector<16xf32>
    %416 = vector.shape_cast %415 : vector<16xf32> to vector<16x1xf32>
    %417 = tpu.reciprocal %416 {approx = true} : vector<16x1xf32> -> vector<16x1xf32>
    %418 = vector.broadcast %417 : vector<16x1xf32> to vector<16x16xf32>
    %419 = arith.mulf %414, %418 : vector<16x16xf32>
    %420 = arith.truncf %419 : vector<16x16xf32> to vector<16x16xbf16>
    %421 = vector.extract_strided_slice %387 {offsets = [0, 8], sizes = [16, 8], strides = [1, 1]} : vector<16x32xbf16> to vector<16x8xbf16>
    %cst_151 = arith.constant dense<0.000000e+00> : vector<16x8xf32>
    %422 = tpu.matmul %420, %421, %cst_151 {dimension_numbers = #tpu.dot_dimension_numbers<[1], [0], [0], [1], [0, 0, 1, 1], [], []>} : vector<16x16xbf16>, vector<16x8xbf16>, vector<16x8xf32> -> vector<16x8xf32>
    %c0_152 = arith.constant 0 : index
    %c8 = arith.constant 8 : index
    %423 = vector.load %arg19[%c0_152, %c8] : memref<16x64xf32, #tpu.memory_space<vmem>>, vector<16x8xf32>
    tpu.vector_store %arg19[%c0_152, %c8], %422 {strides = array<i32>} : memref<16x64xf32, #tpu.memory_space<vmem>>, vector<16x8xf32>,
    %424 = vector.extract_strided_slice %383 {offsets = [0, 16], sizes = [16, 8], strides = [1, 1]} : vector<16x32xbf16> to vector<16x8xbf16>
    %425 = vector.extract_strided_slice %385 {offsets = [0, 16], sizes = [16, 8], strides = [1, 1]} : vector<16x32xbf16> to vector<16x8xbf16>
    %cst_153 = arith.constant dense<0.000000e+00> : vector<16x16xf32>
    %426 = tpu.matmul %424, %425, %cst_153 {dimension_numbers = #tpu.dot_dimension_numbers<[1], [1], [0], [0], [0, 0, 1, 0], [], []>} : vector<16x8xbf16>, vector<16x8xbf16>, vector<16x16xf32> -> vector<16x16xf32>
    %427 = arith.addf %426, %0 : vector<16x16xf32>
    %cst_154 = arith.constant dense<0xFF800000> : vector<16xf32>
    %428 = vector.multi_reduction <maximumf>, %427, %cst_154 [1] : vector<16x16xf32> to vector<16xf32>
    %429 = vector.shape_cast %428 : vector<16xf32> to vector<16x1xf32>
    %430 = vector.broadcast %429 : vector<16x1xf32> to vector<16x16xf32>
    %431 = arith.subf %427, %430 : vector<16x16xf32>
    %432 = math.exp %431 : vector<16x16xf32>
    %cst_155 = arith.constant dense<0.000000e+00> : vector<16xf32>
    %433 = vector.multi_reduction <add>, %432, %cst_155 [1] : vector<16x16xf32> to vector<16xf32>
    %434 = vector.shape_cast %433 : vector<16xf32> to vector<16x1xf32>
    %435 = tpu.reciprocal %434 {approx = true} : vector<16x1xf32> -> vector<16x1xf32>
    %436 = vector.broadcast %435 : vector<16x1xf32> to vector<16x16xf32>
    %437 = arith.mulf %432, %436 : vector<16x16xf32>
    %438 = arith.truncf %437 : vector<16x16xf32> to vector<16x16xbf16>
    %439 = vector.extract_strided_slice %387 {offsets = [0, 16], sizes = [16, 8], strides = [1, 1]} : vector<16x32xbf16> to vector<16x8xbf16>
    %cst_156 = arith.constant dense<0.000000e+00> : vector<16x8xf32>
    %440 = tpu.matmul %438, %439, %cst_156 {dimension_numbers = #tpu.dot_dimension_numbers<[1], [0], [0], [1], [0, 0, 1, 1], [], []>} : vector<16x16xbf16>, vector<16x8xbf16>, vector<16x8xf32> -> vector<16x8xf32>
    %c0_157 = arith.constant 0 : index
    %c16_158 = arith.constant 16 : index
    %441 = vector.load %arg19[%c0_157, %c16_158] : memref<16x64xf32, #tpu.memory_space<vmem>>, vector<16x8xf32>
    tpu.vector_store %arg19[%c0_157, %c16_158], %440 {strides = array<i32>} : memref<16x64xf32, #tpu.memory_space<vmem>>, vector<16x8xf32>,
    %442 = vector.extract_strided_slice %383 {offsets = [0, 24], sizes = [16, 8], strides = [1, 1]} : vector<16x32xbf16> to vector<16x8xbf16>
    %443 = vector.extract_strided_slice %385 {offsets = [0, 24], sizes = [16, 8], strides = [1, 1]} : vector<16x32xbf16> to vector<16x8xbf16>
    %cst_159 = arith.constant dense<0.000000e+00> : vector<16x16xf32>
    %444 = tpu.matmul %442, %443, %cst_159 {dimension_numbers = #tpu.dot_dimension_numbers<[1], [1], [0], [0], [0, 0, 1, 0], [], []>} : vector<16x8xbf16>, vector<16x8xbf16>, vector<16x16xf32> -> vector<16x16xf32>
    %445 = arith.addf %444, %0 : vector<16x16xf32>
    %cst_160 = arith.constant dense<0xFF800000> : vector<16xf32>
    %446 = vector.multi_reduction <maximumf>, %445, %cst_160 [1] : vector<16x16xf32> to vector<16xf32>
    %447 = vector.shape_cast %446 : vector<16xf32> to vector<16x1xf32>
    %448 = vector.broadcast %447 : vector<16x1xf32> to vector<16x16xf32>
    %449 = arith.subf %445, %448 : vector<16x16xf32>
    %450 = math.exp %449 : vector<16x16xf32>
    %cst_161 = arith.constant dense<0.000000e+00> : vector<16xf32>
    %451 = vector.multi_reduction <add>, %450, %cst_161 [1] : vector<16x16xf32> to vector<16xf32>
    %452 = vector.shape_cast %451 : vector<16xf32> to vector<16x1xf32>
    %453 = tpu.reciprocal %452 {approx = true} : vector<16x1xf32> -> vector<16x1xf32>
    %454 = vector.broadcast %453 : vector<16x1xf32> to vector<16x16xf32>
    %455 = arith.mulf %450, %454 : vector<16x16xf32>
    %456 = arith.truncf %455 : vector<16x16xf32> to vector<16x16xbf16>
    %457 = vector.extract_strided_slice %387 {offsets = [0, 24], sizes = [16, 8], strides = [1, 1]} : vector<16x32xbf16> to vector<16x8xbf16>
    %cst_162 = arith.constant dense<0.000000e+00> : vector<16x8xf32>
    %458 = tpu.matmul %456, %457, %cst_162 {dimension_numbers = #tpu.dot_dimension_numbers<[1], [0], [0], [1], [0, 0, 1, 1], [], []>} : vector<16x16xbf16>, vector<16x8xbf16>, vector<16x8xf32> -> vector<16x8xf32>
    %c0_163 = arith.constant 0 : index
    %c24 = arith.constant 24 : index
    %459 = vector.load %arg19[%c0_163, %c24] : memref<16x64xf32, #tpu.memory_space<vmem>>, vector<16x8xf32>
    tpu.vector_store %arg19[%c0_163, %c24], %458 {strides = array<i32>} : memref<16x64xf32, #tpu.memory_space<vmem>>, vector<16x8xf32>,
    %c0_164 = arith.constant 0 : index
    %c0_165 = arith.constant 0 : index
    %460 = vector.load %arg19[%c0_164, %c0_165] : memref<16x64xf32, #tpu.memory_space<vmem>>, vector<16x32xf32>
    %461 = arith.truncf %460 : vector<16x32xf32> to vector<16x32xbf16>
    %c0_166 = arith.constant 0 : index
    %c0_167 = arith.constant 0 : index
    %462 = vector.load %arg14[%c0_166, %c0_167] : memref<32x32xbf16, #tpu.memory_space<vmem>>, vector<32x32xbf16>
    %cst_168 = arith.constant dense<0.000000e+00> : vector<16x32xf32>
    %463 = tpu.matmul %461, %462, %cst_168 {dimension_numbers = #tpu.dot_dimension_numbers<[1], [0], [0], [1], [0, 0, 1, 1], [], []>} : vector<16x32xbf16>, vector<32x32xbf16>, vector<16x32xf32> -> vector<16x32xf32>
    %c0_169 = arith.constant 0 : index
    %c3200 = arith.constant 3200 : index
    %464 = vector.load %arg2[%c0_169, %c3200] : memref<1x4224xf32, #tpu.memory_space<vmem>>, vector<1x32xf32>
    %465 = vector.broadcast %464 : vector<1x32xf32> to vector<16x32xf32>
    %466 = arith.addf %463, %465 : vector<16x32xf32>
    %467 = arith.addf %373, %466 : vector<16x32xf32>
    %c0_170 = arith.constant 0 : index
    %c3328 = arith.constant 3328 : index
    %468 = vector.load %arg2[%c0_170, %c3328] : memref<1x4224xf32, #tpu.memory_space<vmem>>, vector<1x32xf32>
    %c0_171 = arith.constant 0 : index
    %c3456 = arith.constant 3456 : index
    %469 = vector.load %arg2[%c0_171, %c3456] : memref<1x4224xf32, #tpu.memory_space<vmem>>, vector<1x32xf32>
    %cst_172 = arith.constant dense<0.000000e+00> : vector<16xf32>
    %470 = vector.multi_reduction <add>, %467, %cst_172 [1] : vector<16x32xf32> to vector<16xf32>
    %471 = vector.shape_cast %470 : vector<16xf32> to vector<16x1xf32>
    %cst_173 = arith.constant 3.200000e+01 : f32
    %472 = vector.broadcast %cst_173 : f32 to vector<16x1xf32>
    %473 = arith.divf %471, %472 : vector<16x1xf32>
    %474 = vector.broadcast %473 : vector<16x1xf32> to vector<16x32xf32>
    %475 = arith.subf %467, %474 : vector<16x32xf32>
    %476 = arith.mulf %475, %475 : vector<16x32xf32>
    %cst_174 = arith.constant dense<0.000000e+00> : vector<16xf32>
    %477 = vector.multi_reduction <add>, %476, %cst_174 [1] : vector<16x32xf32> to vector<16xf32>
    %478 = vector.shape_cast %477 : vector<16xf32> to vector<16x1xf32>
    %cst_175 = arith.constant 3.200000e+01 : f32
    %479 = vector.broadcast %cst_175 : f32 to vector<16x1xf32>
    %480 = arith.divf %478, %479 : vector<16x1xf32>
    %481 = vector.broadcast %473 : vector<16x1xf32> to vector<16x32xf32>
    %482 = arith.subf %467, %481 : vector<16x32xf32>
    %cst_176 = arith.constant 9.99999974E-6 : f32
    %483 = vector.broadcast %cst_176 : f32 to vector<16x1xf32>
    %484 = arith.addf %480, %483 : vector<16x1xf32>
    %485 = math.rsqrt %484 : vector<16x1xf32>
    %486 = vector.broadcast %485 : vector<16x1xf32> to vector<16x32xf32>
    %487 = arith.mulf %482, %486 : vector<16x32xf32>
    %488 = vector.broadcast %468 : vector<1x32xf32> to vector<16x32xf32>
    %489 = arith.mulf %487, %488 : vector<16x32xf32>
    %490 = vector.broadcast %469 : vector<1x32xf32> to vector<16x32xf32>
    %491 = arith.addf %489, %490 : vector<16x32xf32>
    %492 = arith.truncf %491 : vector<16x32xf32> to vector<16x32xbf16>
    %c0_177 = arith.constant 0 : index
    %c0_178 = arith.constant 0 : index
    %493 = vector.load %arg15[%c0_177, %c0_178] : memref<32x64xbf16, #tpu.memory_space<vmem>>, vector<32x64xbf16>
    %cst_179 = arith.constant dense<0.000000e+00> : vector<16x64xf32>
    %494 = tpu.matmul %492, %493, %cst_179 {dimension_numbers = #tpu.dot_dimension_numbers<[1], [0], [0], [1], [0, 0, 1, 1], [], []>} : vector<16x32xbf16>, vector<32x64xbf16>, vector<16x64xf32> -> vector<16x64xf32>
    %c0_180 = arith.constant 0 : index
    %c3584 = arith.constant 3584 : index
    %495 = vector.load %arg2[%c0_180, %c3584] : memref<1x4224xf32, #tpu.memory_space<vmem>>, vector<1x64xf32>
    %496 = vector.broadcast %495 : vector<1x64xf32> to vector<16x64xf32>
    %497 = arith.addf %494, %496 : vector<16x64xf32>
    %cst_181 = arith.constant 0.000000e+00 : f32
    %498 = vector.broadcast %cst_181 : f32 to vector<16x64xf32>
    %499 = arith.maximumf %497, %498 : vector<16x64xf32>
    %500 = arith.truncf %499 : vector<16x64xf32> to vector<16x64xbf16>
    %c0_182 = arith.constant 0 : index
    %c0_183 = arith.constant 0 : index
    %501 = vector.load %arg16[%c0_182, %c0_183] : memref<64x32xbf16, #tpu.memory_space<vmem>>, vector<64x32xbf16>
    %cst_184 = arith.constant dense<0.000000e+00> : vector<16x32xf32>
    %502 = tpu.matmul %500, %501, %cst_184 {dimension_numbers = #tpu.dot_dimension_numbers<[1], [0], [0], [1], [0, 0, 1, 1], [], []>} : vector<16x64xbf16>, vector<64x32xbf16>, vector<16x32xf32> -> vector<16x32xf32>
    %c0_185 = arith.constant 0 : index
    %c3712 = arith.constant 3712 : index
    %503 = vector.load %arg2[%c0_185, %c3712] : memref<1x4224xf32, #tpu.memory_space<vmem>>, vector<1x32xf32>
    %504 = vector.broadcast %503 : vector<1x32xf32> to vector<16x32xf32>
    %505 = arith.addf %502, %504 : vector<16x32xf32>
    %506 = arith.addf %491, %505 : vector<16x32xf32>
    %c0_186 = arith.constant 0 : index
    %c3840 = arith.constant 3840 : index
    %507 = vector.load %arg2[%c0_186, %c3840] : memref<1x4224xf32, #tpu.memory_space<vmem>>, vector<1x32xf32>
    %c0_187 = arith.constant 0 : index
    %c3968 = arith.constant 3968 : index
    %508 = vector.load %arg2[%c0_187, %c3968] : memref<1x4224xf32, #tpu.memory_space<vmem>>, vector<1x32xf32>
    %cst_188 = arith.constant dense<0.000000e+00> : vector<16xf32>
    %509 = vector.multi_reduction <add>, %506, %cst_188 [1] : vector<16x32xf32> to vector<16xf32>
    %510 = vector.shape_cast %509 : vector<16xf32> to vector<16x1xf32>
    %cst_189 = arith.constant 3.200000e+01 : f32
    %511 = vector.broadcast %cst_189 : f32 to vector<16x1xf32>
    %512 = arith.divf %510, %511 : vector<16x1xf32>
    %513 = vector.broadcast %512 : vector<16x1xf32> to vector<16x32xf32>
    %514 = arith.subf %506, %513 : vector<16x32xf32>
    %515 = arith.mulf %514, %514 : vector<16x32xf32>
    %cst_190 = arith.constant dense<0.000000e+00> : vector<16xf32>
    %516 = vector.multi_reduction <add>, %515, %cst_190 [1] : vector<16x32xf32> to vector<16xf32>
    %517 = vector.shape_cast %516 : vector<16xf32> to vector<16x1xf32>
    %cst_191 = arith.constant 3.200000e+01 : f32
    %518 = vector.broadcast %cst_191 : f32 to vector<16x1xf32>
    %519 = arith.divf %517, %518 : vector<16x1xf32>
    %520 = vector.broadcast %512 : vector<16x1xf32> to vector<16x32xf32>
    %521 = arith.subf %506, %520 : vector<16x32xf32>
    %cst_192 = arith.constant 9.99999974E-6 : f32
    %522 = vector.broadcast %cst_192 : f32 to vector<16x1xf32>
    %523 = arith.addf %519, %522 : vector<16x1xf32>
    %524 = math.rsqrt %523 : vector<16x1xf32>
    %525 = vector.broadcast %524 : vector<16x1xf32> to vector<16x32xf32>
    %526 = arith.mulf %521, %525 : vector<16x32xf32>
    %527 = vector.broadcast %507 : vector<1x32xf32> to vector<16x32xf32>
    %528 = arith.mulf %526, %527 : vector<16x32xf32>
    %529 = vector.broadcast %508 : vector<1x32xf32> to vector<16x32xf32>
    %530 = arith.addf %528, %529 : vector<16x32xf32>
    %531 = arith.truncf %530 : vector<16x32xf32> to vector<16x32xbf16>
    %c0_193 = arith.constant 0 : index
    %c0_194 = arith.constant 0 : index
    %532 = vector.load %arg17[%c0_193, %c0_194] : memref<32x128xbf16, #tpu.memory_space<vmem>>, vector<32x128xbf16>
    %cst_195 = arith.constant dense<0.000000e+00> : vector<16x128xf32>
    %533 = tpu.matmul %531, %532, %cst_195 {dimension_numbers = #tpu.dot_dimension_numbers<[1], [0], [0], [1], [0, 0, 1, 1], [], []>} : vector<16x32xbf16>, vector<32x128xbf16>, vector<16x128xf32> -> vector<16x128xf32>
    %c0_196 = arith.constant 0 : index
    %c4096 = arith.constant 4096 : index
    %534 = vector.load %arg2[%c0_196, %c4096] : memref<1x4224xf32, #tpu.memory_space<vmem>>, vector<1x128xf32>
    %535 = vector.broadcast %534 : vector<1x128xf32> to vector<16x128xf32>
    %536 = arith.addf %533, %535 : vector<16x128xf32>
    %c0_197 = arith.constant 0 : index
    %c0_198 = arith.constant 0 : index
    %537 = vector.load %arg18[%c0_197, %c0_198] : memref<16x128xf32, #tpu.memory_space<vmem>>, vector<16x128xf32>
    tpu.vector_store %arg18[%c0_197, %c0_198], %536 {strides = array<i32>} : memref<16x128xf32, #tpu.memory_space<vmem>>, vector<16x128xf32>,
    return
  }
}

</mosaic_0001>

<bundles_post_ra>
// kernel: roberta_forward.1
= control target key start
LH: loop header
LB: loop body
LE: loop exit
PB: predicated region body
PF: predicated region fallthrough
CT: control target
= control target key end

     0   :  { %v4279_v0 = vmov 0.0   ;;  %vm4280_vm0 = vmmov 0   ;;  %vm88_vm1 = vcmask 261120   ;;  %v4281_v14 = vmov 0   ;;  %s4282_s28 = smov 64   ;;  %s4284_s30 = smov 48   ;;  %s5163_s3 = inlined_call_operand.vmem [shape: bf16[32,64], index: 3, kind: input, shape index: {}]   ;;  %s5164_s0 = inlined_call_operand.vmem [shape: f32[16,32], index: 0, kind: input, shape index: {}]   ;;  %s5165_s4 = inlined_call_operand.vmem [shape: bf16[64,192], index: 4, kind: input, shape index: {}]   ;;  %s5166_s2 = inlined_call_operand.vmem [shape: f32[1,4224], index: 2, kind: input, shape index: {}]   ;;  %s5167_s1 = inlined_call_operand.vmem [shape: f32[16,16], index: 1, kind: input, shape index: {}]   ;;  %s5168_s5 = inlined_call_operand.vmem [shape: bf16[64,64], index: 5, kind: input, shape index: {}]   ;;  %s5169_s6 = inlined_call_operand.vmem [shape: bf16[64,256], index: 6, kind: input, shape index: {}]   ;;  %s5170_s7 = inlined_call_operand.vmem [shape: bf16[256,64], index: 7, kind: input, shape index: {}]   ;;  %s5171_s8 = inlined_call_operand.vmem [shape: bf16[64,192], index: 8, kind: input, shape index: {}]   ;;  %s5172_s9 = inlined_call_operand.vmem [shape: bf16[64,64], index: 9, kind: input, shape index: {}]   ;;  %s5173_s10 = inlined_call_operand.vmem [shape: bf16[64,256], index: 10, kind: input, shape index: {}]   ;;  %s5174_s11 = inlined_call_operand.vmem [shape: bf16[256,64], index: 11, kind: input, shape index: {}]   ;;  %s5175_s12 = inlined_call_operand.vmem [shape: bf16[64,32], index: 12, kind: input, shape index: {}]   ;;  %s5176_s13 = inlined_call_operand.vmem [shape: bf16[32,96], index: 13, kind: input, shape index: {}]   ;;  %s5177_s14 = inlined_call_operand.vmem [shape: bf16[32,32], index: 14, kind: input, shape index: {}]   ;;  %s5178_s15 = inlined_call_operand.vmem [shape: bf16[32,64], index: 15, kind: input, shape index: {}]   ;;  %s5179_s16 = inlined_call_operand.vmem [shape: bf16[64,32], index: 16, kind: input, shape index: {}]   ;;  %s5180_s17 = inlined_call_operand.vmem [shape: bf16[32,128], index: 17, kind: input, shape index: {}]   ;;  %s5181_s18 = inlined_call_operand.vmem [shape: f32[16,128], index: 18, kind: output, shape index: {}]  }
   0x1   :  { %5187 = sst [smem:[#allocation3_spill]] %s5163_s3  ;;  %3779 = vmatprep.subr.bf16.mxu0 %v4279_v0  ;;  %3783 = vmatprep.mubr.msk.bf16.mxu0 %vm4280_vm0, %v4279_v0  ;;  %v3500_v16 = vld [vmem:[%s5166_s2] ss:$0 sm:$0xff]  ;;  %vm194_vm2 = vcmask 523264   ;;  %v144_v23 = vlaneseq  ;;  %v142_v26 = vld [vmem:[%s5166_s2 + $0x1] sm:$0x3] }
   0x2   :  { %5188 = sst [smem:[#allocation4_spill]] %s5164_s0  ;;  %230 = vmatprep.mubr.bf16.mxu1 %v4281_v14  ;;  %s4285_s3 = smov 32   ;;  %vm249_vm3 = vcmask 130048   ;;  %v60_v54 = vld [vmem:[%s5167_s1] sm:$0xff]  ;;  %v61_v58 = vld [vmem:[%s5167_s1 + $0x8] sm:$0xff]  ;;  %vm497_vm4 = vcmask 261248  }
   0x3   :  { %5189 = sst [smem:[#allocation5_spill]] %s5165_s4  ;;  %v145_v24 = vshrl.u32 %v144_v23, 7  ;;  %s4286_s19 = smov 96   ;;  %vm629_vm5 = vcmask 392448   ;;  %vm761_vm6 = vcmask 523648   ;;  %vm2593_vm7 = vcmask 64512  }
   0x4   :  { %s5190_s29 = sld [smem:[#allocation3_spill]]  ;;  %s5185_s0 = smov 16   ;;  %vm2843_vm8 = vcmask 130112   ;;  %vm2975_vm9 = vcmask 195712   ;;  %vm3107_vm10 = vcmask 261312  }
   0x5   :  { %s5191_s20 = sld [smem:[#allocation4_spill]]  ;;  %v4450_v25 = vsub.s32 0, %v145_v24  ;;  %v4463_v37 = vsub.s32 1, %v145_v24  ;;  %s5193_s25 = smov 16  }
   0x6   :  { %s5192_s24 = sld [smem:[#allocation5_spill]]  ;;  %s4290_s27 = smov 120  }
   0x7   :  { %v147_v27 = vrot.slane %v142_v26, %v4450_v25  ;;  %v151_v41 = vrot.slane %v142_v26, %v4463_v37  ;;  %s4292_s21 = smov 72  }
   0xa   :  { %v4029_v1 = vld [vmem:[%s5190_s29 + $0x8] sm:$0xff]   ;;  %v4030_v2 = vld [vmem:[%s5190_s29] sm:$0xff]   ;;  %s4283_s29 = smov 112  }
   0xb   :  { %3780 = vmatpush3.bf16.msra.mxu0 %v4029_v1  ;;  %v62_v3 = vld [vmem:[%s5191_s20] sm:$0xff]  ;;  %v63_v4 = vld [vmem:[%s5191_s20 + $0x8] sm:$0xff]  ;;  %s4288_s20 = smov 80  }
   0xc   :  { %3781 = vmatprep.subr.bf16.mxu0 %v4279_v0  ;;  %v4031_v5 = vld [vmem:[%s5192_s24 + $0x34] ss:$8 sps:$4 sm:$0xff]   ;;  %v4033_v6 = vld [vmem:[%s5192_s24 + $0x30] ss:$8 sps:$4 sm:$0xff]   ;;  %v4034_v7 = vld [vmem:[%s5192_s24 + $0x24] ss:$8 sps:$4 sm:$0xff]   ;;  %v64_v8 = vpack.c.bf16 %v63_v4, %v62_v3 }
   0xd   :  { %206 = vmatprep.subr.bf16.mxu1 %v4031_v5  ;;  %v4036_v9 = vld [vmem:[%s5192_s24 + $0x20] ss:$8 sps:$4 sm:$0xff]   ;;  %v4037_v10 = vld [vmem:[%s5192_s24 + $0x14] ss:$8 sps:$4 sm:$0xff]   ;;  %v4039_v11 = vld [vmem:[%s5192_s24 + $0x10] ss:$8 sps:$4 sm:$0xff]  }
   0xe   :  { %207 = vmatpush1.bf16.msra.mxu1 %v4033_v6  ;;  %v4040_v12 = vld [vmem:[%s5192_s24 + $0x4] ss:$8 sps:$4 sm:$0xff]   ;;  %v4042_v13 = vld [vmem:[%s5192_s24] ss:$8 sps:$4 sm:$0xff]   ;;  %s4289_s24 = smov 88  }
   0xf   :  { %3782 = vmatpush3.bf16.msra.mxu0 %v4030_v2  ;;  %208 = vmatprep.subr.bf16.mxu1 %v4034_v7 }
  0x10   :  { %3787 = vmatprep.subr.bf16.mxu0 %v4279_v0 }
  0x12   :  { %3784 = vmatmul.mubr.msk.bf16.vlgmr.msra.gmra.mxu0 %vm88_vm1, %v64_v8  ;;  %209 = vmatpush1.bf16.msra.mxu1 %v4036_v9 }
  0x13   :  { %3789 = vmatprep.mubr.msk.bf16.mxu0 %vm4280_vm0, %v4279_v0  ;;  %210 = vmatprep.subr.bf16.mxu1 %v4037_v10 }
  0x16   :  { %211 = vmatpush1.bf16.msra.mxu1 %v4039_v11 }
  0x17   :  { %212 = vmatprep.subr.bf16.mxu1 %v4040_v12 }
  0x1a   :  { %213 = vmatpush1.bf16.msra.mxu1 %v4042_v13 }
  0x1b   :  { %3799 = vmatprep.subr.bf16.mxu1 %v4279_v0 }
  0xd2   :  { %v126_v15 = vpop.f32.mrf.mxu0 }
  0xd3   :  { %v4441_v19 = vadd.f32 %v3500_v16, %v126_v15 }
  0xd4   :  { %v3785_v17 = vpop.f32.mrf.mxu0 }
  0xd6   :  { %v129_v18 = vpop.f32.mrf.mxu0 }
  0xd7   :  { %v4443_v20 = vadd.f32 %v3500_v16, %v129_v18 }
  0xd8   :  { %v3786_v21 = vpop.f32.mrf.mxu0 }
  0xd9   :  { %v133_v22 = vpack.c.bf16 %v4443_v20, %v4441_v19 }
  0xdb   :  { %3512 = vmatmul.mubr.msk.bf16.vlgmr.msra.gmra.mxu1 %vm194_vm2, %v133_v22 }
  0xdc   :  { %3801 = vmatprep.mubr.msk.bf16.mxu1 %vm4280_vm0, %v4279_v0 }
 0x19b   :  { %v232_v28 = vpop.f32.mrf.mxu1 }
 0x19c   :  { %v233_v30 = vadd.f32 %v232_v28, %v147_v27 }
 0x19d   :  { %v234_v29 = vpop.f32.mrf.mxu1 }
 0x19e   :  { %v241_v33 = vmul.f32 0.25, %v233_v30  ;;  %v235_v46 = vadd.f32 %v234_v29, %v151_v41 }
 0x19f   :  { %v236_v31 = vpop.f32.mrf.mxu1 }
 0x1a0   :  { %v237_v32 = vadd.f32 %v236_v31, %v147_v27 }
 0x1a1   :  { %v238_v39 = vpop.f32.mrf.mxu1 }
 0x1a2   :  { %v242_v34 = vmul.f32 0.25, %v237_v32  ;;  %v244_v35 = vpack.c.bf16 %v237_v32, %v233_v30  ;;  %v239_v42 = vadd.f32 %v238_v39, %v151_v41 }
 0x1a4   :  { %v243_v36 = vpack.c.bf16 %v242_v34, %v241_v33  ;;  %247 = vrot.lane.b32.xlu0 %v244_v35, %s4282_s28  ;;  %v4470_v47 = vpack.c.bf16 %v239_v42, %v235_v46 }
 0x1a6   :  { %367 = vrot.lane.b32.xlu1 %v243_v36, %s4283_s29 }
 0x1a8   :  { %369 = vrot.lane.b32.xlu0 %v244_v35, %s4284_s30 }
 0x1aa   :  { %502 = vrot.lane.b32.xlu1 %v244_v35, %s4285_s3 }
 0x1ac   :  { %500 = vrot.lane.b32.xlu0 %v243_v36, %s4286_s19 }
 0x1ae   :  { %634 = vrot.lane.b32.xlu1 %v244_v35, %s5185_s0 }
 0x1b0   :  { %632 = vrot.lane.b32.xlu0 %v243_v36, %s4288_s20 }
 0x216   :  { %v248_v38 = vpop.permute.xlu0 %247 }
 0x217   :  { %v254_v40 = vsel %vm249_vm3, %v248_v38, 0 }
 0x218   :  { %3788 = vmatpush3.bf16.xpose.msra.mxu0 %v254_v40  ;;  %v368_v43 = vpop.permute.xlu1 %367 }
 0x219   :  { %3793 = vmatprep.subr.bf16.mxu0 %v4279_v0 }
 0x21a   :  { %v370_v44 = vpop.permute.xlu0 %369 }
 0x21b   :  { %v375_v45 = vsel %vm249_vm3, %v370_v44, 0 }
 0x21c   :  { %3800 = vmatpush3.bf16.xpose.msra.mxu1 %v375_v45  ;;  %v503_v48 = vpop.permute.xlu1 %502 }
 0x21d   :  { %3811 = vmatprep.subr.bf16.mxu1 %v4279_v0  ;;  %v508_v49 = vsel %vm249_vm3, %v503_v48, 0 }
 0x21e   :  { %v501_v51 = vpop.permute.xlu0 %500 }
 0x21f   :  { %3790 = vmatmul.mubr.msk.bf16.vlgmr.msra.gmra.mxu0 %vm249_vm3, %v243_v36 }
 0x220   :  { %3794 = vmatpush3.bf16.msra.mxu0 %v4470_v47  ;;  %3795 = vmatprep.mubr.msk.bf16.mxu0 %vm4280_vm0, %v4279_v0  ;;  %v635_v50 = vpop.permute.xlu1 %634 }
 0x221   :  { %3805 = vmatprep.subr.bf16.mxu0 %v4279_v0  ;;  %v640_v52 = vsel %vm249_vm3, %v635_v50, 0 }
 0x222   :  { %v633_v53 = vpop.permute.xlu0 %632 }
 0x223   :  { %3802 = vmatmul.mubr.msk.bf16.vlgmr.msra.gmra.mxu1 %vm249_vm3, %v368_v43 }
 0x224   :  { %3812 = vmatpush3.bf16.xpose.msra.mxu1 %v508_v49  ;;  %3813 = vmatprep.mubr.msk.bf16.mxu1 %vm4280_vm0, %v4279_v0 }
 0x225   :  { %3823 = vmatprep.subr.bf16.mxu1 %v4279_v0 }
 0x22b   :  { %3814 = vmatmul.mubr.msk.bf16.vlgmr.msra.gmra.mxu1 %vm249_vm3, %v501_v51 }
 0x22c   :  { %3824 = vmatpush3.bf16.xpose.msra.mxu1 %v640_v52  ;;  %3825 = vmatprep.mubr.msk.bf16.mxu1 %vm4280_vm0, %v4279_v0 }
 0x22d   :  { %3835 = vmatprep.subr.bf16.mxu1 %v4279_v0 }
 0x233   :  { %3826 = vmatmul.mubr.msk.bf16.vlgmr.msra.gmra.mxu1 %vm249_vm3, %v633_v53 }
 0x234   :  { %3843 = vmatprep.mubr.msk.bf16.mxu1 %vm4280_vm0, %v4279_v0 }
 0x2df   :  { %v290_v55 = vpop.f32.mrf.mxu0 }
 0x2e0   :  { %v291_v56 = vadd.f32 %v290_v55, %v60_v54 }
 0x2e1   :  { %v3791_v57 = vpop.f32.mrf.mxu0 }
 0x2e2   :  { %v297_v59 = vsel %vm249_vm3, %v291_v56, -inf }
 0x2e3   :  { %v411_v60 = vpop.f32.mrf.mxu1  ;;  %298 = vmax.xlane.f32.xlu1 %v297_v59  ;;  %v293_v61 = vpop.f32.mrf.mxu0 }
 0x2e4   :  { %v294_v62 = vadd.f32 %v293_v61, %v61_v58  ;;  %v412_v2 = vadd.f32 %v411_v60, %v60_v54 }
 0x2e5   :  { %v3792_v63 = vpop.f32.mrf.mxu0  ;;  %v3803_v1 = vpop.f32.mrf.mxu1 }
 0x2e6   :  { %v300_v3 = vsel %vm249_vm3, %v294_v62, -inf  ;;  %v418_v8 = vsel %vm249_vm3, %v412_v2, -inf }
 0x2e7   :  { %v414_v4 = vpop.f32.mrf.mxu1  ;;  %301 = vmax.xlane.f32.xlu0 %v300_v3 }
 0x2e8   :  { %v415_v5 = vadd.f32 %v414_v4, %v61_v58 }
 0x2e9   :  { %v3804_v6 = vpop.f32.mrf.mxu1 }
 0x2ea   :  { %v421_v7 = vsel %vm249_vm3, %v415_v5, -inf }
 0x2eb   :  { %v544_v9 = vpop.f32.mrf.mxu1  ;;  %422 = vmax.xlane.f32.xlu1 %v421_v7  ;;  %419 = vmax.xlane.f32.xlu0 %v418_v8 }
 0x2ec   :  { %v545_v10 = vadd.f32 %v544_v9, %v60_v54 }
 0x2ed   :  { %v3815_v11 = vpop.f32.mrf.mxu1 }
 0x2ee   :  { %v551_v12 = vsel %vm249_vm3, %v545_v10, -inf }
 0x2ef   :  { %v547_v13 = vpop.f32.mrf.mxu1  ;;  %552 = vmax.xlane.f32.xlu0 %v551_v12 }
 0x2f0   :  { %v548_v15 = vadd.f32 %v547_v13, %v61_v58 }
 0x2f1   :  { %v3816_v16 = vpop.f32.mrf.mxu1 }
 0x2f2   :  { %v554_v17 = vsel %vm249_vm3, %v548_v15, -inf }
 0x2f3   :  { %v676_v18 = vpop.f32.mrf.mxu1  ;;  %555 = vmax.xlane.f32.xlu1 %v554_v17 }
 0x2f4   :  { %v677_v21 = vadd.f32 %v676_v18, %v60_v54 }
 0x2f5   :  { %v3827_v22 = vpop.f32.mrf.mxu1 }
 0x2f6   :  { %v683_v23 = vsel %vm249_vm3, %v677_v21, -inf }
 0x2f7   :  { %v679_v24 = vpop.f32.mrf.mxu1  ;;  %684 = vmax.xlane.f32.xlu0 %v683_v23 }
 0x2f8   :  { %v680_v26 = vadd.f32 %v679_v24, %v61_v58 }
 0x2f9   :  { %v3828_v27 = vpop.f32.mrf.mxu1 }
 0x2fa   :  { %v686_v28 = vsel %vm249_vm3, %v680_v26, -inf }
 0x2fb   :  { %687 = vmax.xlane.f32.xlu1 %v686_v28 }
 0x36c   :  { %v299_v29 = vpop.xlane.xlu1 %298 }
 0x36d   :  { %v303_v30 = vsub.f32 %v291_v56, %v299_v29 }
 0x36f   :  { %v305_v31 = vmul.f32 1.442695, %v303_v30 }
 0x370   :  { %v302_v32 = vpop.xlane.xlu0 %301 }
 0x371   :  { %4135 = vpow2.f32 %v305_v31  ;;  %v304_v33 = vsub.f32 %v294_v62, %v302_v32 }
 0x373   :  { %v307_v34 = vmul.f32 1.442695, %v304_v33 }
 0x374   :  { %v423_v35 = vpop.xlane.xlu1 %422  ;;  %v420_v36 = vpop.xlane.xlu0 %419 }
 0x375   :  { %4137 = vpow2.f32 %v307_v34  ;;  %v425_v38 = vsub.f32 %v415_v5, %v423_v35  ;;  %v424_v39 = vsub.f32 %v412_v2, %v420_v36 }
 0x377   :  { %v428_v40 = vmul.f32 1.442695, %v425_v38  ;;  %v426_v41 = vmul.f32 1.442695, %v424_v39 }
 0x378   :  { %v553_v42 = vpop.xlane.xlu0 %552 }
 0x379   :  { %4139 = vpow2.f32 %v428_v40  ;;  %v557_v43 = vsub.f32 %v545_v10, %v553_v42 }
 0x37a   :  { %4141 = vpow2.f32 %v426_v41 }
 0x37b   :  { %v559_v44 = vmul.f32 1.442695, %v557_v43 }
 0x37c   :  { %v556_v45 = vpop.xlane.xlu1 %555 }
 0x37d   :  { %4143 = vpow2.f32 %v559_v44  ;;  %v558_v46 = vsub.f32 %v548_v15, %v556_v45 }
 0x37e   :  { %v4136_v48 = vpop.eup %4135 }
 0x37f   :  { %v561_v49 = vmul.f32 1.442695, %v558_v46  ;;  %v309_v50 = vsel %vm249_vm3, %v4136_v48, 0.0 }
 0x380   :  { %310 = vadd.xlane.f32.xlu0 %v309_v50  ;;  %v685_v51 = vpop.xlane.xlu0 %684 }
 0x381   :  { %4145 = vpow2.f32 %v561_v49  ;;  %v689_v52 = vsub.f32 %v677_v21, %v685_v51  ;;  %v4043_v49 = vld [vmem:[%s5168_s5 + $0x18] sm:$0xff]  }
 0x382   :  { %v4138_v53 = vpop.eup %4137  ;;  %3836 = vmatpush3.bf16.msra.mxu1 %v4043_v49 }
 0x383   :  { %v691_v54 = vmul.f32 1.442695, %v689_v52  ;;  %v312_v55 = vsel %vm249_vm3, %v4138_v53, 0.0  ;;  %3837 = vmatprep.subr.bf16.mxu1 %v4279_v0 }
 0x384   :  { %313 = vadd.xlane.f32.xlu1 %v312_v55  ;;  %v688_v3 = vpop.xlane.xlu1 %687 }
 0x385   :  { %4147 = vpow2.f32 %v691_v54  ;;  %v690_v4 = vsub.f32 %v680_v26, %v688_v3 }
 0x386   :  { %v4140_v56 = vpop.eup %4139 }
 0x387   :  { %v4142_v57 = vpop.eup %4141  ;;  %v433_v58 = vsel %vm249_vm3, %v4140_v56, 0.0  ;;  %v693_v5 = vmul.f32 1.442695, %v690_v4 }
 0x388   :  { %434 = vadd.xlane.f32.xlu1 %v433_v58  ;;  %v430_v59 = vsel %vm249_vm3, %v4142_v57, 0.0  ;;  %v4045_v58 = vld [vmem:[%s5168_s5 + $0x8] sm:$0xff]  }
 0x389   :  { %431 = vadd.xlane.f32.xlu0 %v430_v59  ;;  %4149 = vpow2.f32 %v693_v5  ;;  %v4046_v59 = vld [vmem:[%s5168_s5] sm:$0xff]  }
 0x38a   :  { %v4144_v60 = vpop.eup %4143 }
 0x38b   :  { %v563_v61 = vsel %vm249_vm3, %v4144_v60, 0.0 }
 0x38d   :  { %564 = vadd.xlane.f32.xlu0 %v563_v61 }
 0x38e   :  { %v4146_v62 = vpop.eup %4145 }
 0x38f   :  { %v566_v63 = vsel %vm249_vm3, %v4146_v62, 0.0 }
 0x390   :  { %567 = vadd.xlane.f32.xlu1 %v566_v63 }
 0x392   :  { %v4148_v1 = vpop.eup %4147 }
 0x393   :  { %v695_v2 = vsel %vm249_vm3, %v4148_v1, 0.0 }
 0x394   :  { %696 = vadd.xlane.f32.xlu0 %v695_v2 }
 0x396   :  { %v4150_v6 = vpop.eup %4149 }
 0x397   :  { %v698_v7 = vsel %vm249_vm3, %v4150_v6, 0.0 }
 0x3a1   :  { %574 = vrot.lane.b32.xlu1 %v4470_v47, %s4286_s19 }
 0x3aa   :  { %442 = vrot.lane.b32.xlu0 %v4470_v47, %s4283_s29 }
 0x3c5   :  { %699 = vadd.xlane.f32.xlu1 %v698_v7 }
 0x3d6   :  { %706 = vrot.lane.b32.xlu1 %v4470_v47, %s4288_s20 }
 0x409   :  { %v311_v8 = vpop.xlane.xlu0 %310 }
 0x40a   :  { %4151 = vrcp.f32 %v311_v8 }
 0x40d   :  { %v314_v9 = vpop.xlane.xlu1 %313 }
 0x40e   :  { %4153 = vrcp.f32 %v314_v9 }
 0x411   :  { %v435_v10 = vpop.xlane.xlu1 %434 }
 0x412   :  { %4155 = vrcp.f32 %v435_v10  ;;  %v432_v11 = vpop.xlane.xlu0 %431  ;;  %v3521_v10 = vld [vmem:[%s5166_s2 + $0x3] ss:$0 sm:$0xff] }
 0x413   :  { %4157 = vrcp.f32 %v432_v11 }
 0x416   :  { %v565_v13 = vpop.xlane.xlu0 %564 }
 0x417   :  { %v4152_v12 = vpop.eup %4151 }
 0x418   :  { %v317_v17 = vmul.f32 %v4152_v12, %v4136_v48 }
 0x419   :  { %v568_v15 = vpop.xlane.xlu1 %567 }
 0x41a   :  { %4159 = vrcp.f32 %v568_v15 }
 0x41b   :  { %v4154_v16 = vpop.eup %4153  ;;  %4161 = vrcp.f32 %v565_v13 }
 0x41c   :  { %v318_v18 = vmul.f32 %v4154_v16, %v4138_v53 }
 0x41d   :  { %v697_v21 = vpop.xlane.xlu0 %696  ;;  %v575_v30 = vpop.permute.xlu1 %574 }
 0x41e   :  { %v319_v22 = vpack.c.bf16 %v318_v18, %v317_v17  ;;  %4163 = vrcp.f32 %v697_v21 }
 0x41f   :  { %v4156_v23 = vpop.eup %4155 }
 0x420   :  { %v4158_v47 = vpop.eup %4157  ;;  %3796 = vmatmul.mubr.msk.bf16.vlgmr.msra.gmra.mxu0 %vm249_vm3, %v319_v22  ;;  %v439_v27 = vmul.f32 %v4156_v23, %v4140_v56 }
 0x421   :  { %v443_v24 = vpop.permute.xlu0 %442  ;;  %3807 = vmatprep.mubr.msk.bf16.mxu0 %vm4280_vm0, %v4279_v0  ;;  %v438_v26 = vmul.f32 %v4158_v47, %v4142_v57  ;;  %v4044_v57 = vld [vmem:[%s5168_s5 + $0x10] sm:$0xff]  }
 0x422   :  { %3806 = vmatpush3.bf16.msra.mxu0 %v443_v24  ;;  %3838 = vmatpush3.bf16.msra.mxu1 %v4044_v57 }
 0x423   :  { %3817 = vmatprep.subr.bf16.mxu0 %v4279_v0  ;;  %v440_v28 = vpack.c.bf16 %v439_v27, %v438_v26  ;;  %3839 = vmatprep.subr.bf16.mxu1 %v4279_v0 }
 0x426   :  { %3840 = vmatpush3.bf16.msra.mxu1 %v4045_v58 }
 0x427   :  { %v4160_v29 = vpop.eup %4159  ;;  %3841 = vmatprep.subr.bf16.mxu1 %v4279_v0 }
 0x428   :  { %3808 = vmatmul.mubr.msk.bf16.vlgmr.msra.gmra.mxu0 %vm249_vm3, %v440_v28  ;;  %v4162_v31 = vpop.eup %4161  ;;  %v572_v32 = vmul.f32 %v4160_v29, %v4146_v62 }
 0x429   :  { %3818 = vmatpush3.bf16.msra.mxu0 %v575_v30  ;;  %3819 = vmatprep.mubr.msk.bf16.mxu0 %vm4280_vm0, %v4279_v0  ;;  %v571_v33 = vmul.f32 %v4162_v31, %v4144_v60 }
 0x42a   :  { %3829 = vmatprep.subr.bf16.mxu0 %v4279_v0  ;;  %3842 = vmatpush3.bf16.msra.mxu1 %v4046_v59  ;;  %v4059_v59 = vld [vmem:[%s5170_s7 + $0x78] sm:$0xff]  }
 0x42b   :  { %v573_v34 = vpack.c.bf16 %v572_v32, %v571_v33  ;;  %v4164_v38 = vpop.eup %4163  ;;  %v4047_v33 = vld [vmem:[%s5169_s6 + $0x30] ss:$8 sps:$4 sm:$0xff]   ;;  %3676 = vmatprep.subr.bf16.mxu1 %v4059_v59 }
 0x42c   :  { %v703_v40 = vmul.f32 %v4164_v38, %v4148_v1  ;;  %v4053_v38 = vld [vmem:[%s5169_s6 + $0x10] ss:$8 sps:$4 sm:$0xff]  }
 0x430   :  { %3820 = vmatmul.mubr.msk.bf16.vlgmr.msra.gmra.mxu0 %vm249_vm3, %v573_v34  ;;  %v4052_v34 = vld [vmem:[%s5169_s6 + $0x24] ss:$8 sps:$4 sm:$0xff]  }
 0x431   :  { %3831 = vmatprep.mubr.msk.bf16.mxu0 %vm4280_vm0, %v4279_v0 }
 0x44e   :  { %v700_v35 = vpop.xlane.xlu1 %699 }
 0x44f   :  { %4165 = vrcp.f32 %v700_v35  ;;  %v4050_v35 = vld [vmem:[%s5169_s6 + $0x20] ss:$8 sps:$4 sm:$0xff]  }
 0x452   :  { %v707_v36 = vpop.permute.xlu1 %706 }
 0x453   :  { %3830 = vmatpush3.bf16.msra.mxu0 %v707_v36  ;;  %v4055_v36 = vld [vmem:[%s5169_s6 + $0x14] ss:$8 sps:$4 sm:$0xff]  }
 0x45c   :  { %v4166_v39 = vpop.eup %4165 }
 0x45d   :  { %v704_v41 = vmul.f32 %v4166_v39, %v4150_v6  ;;  %v4058_v39 = vld [vmem:[%s5169_s6 + $0x4] ss:$8 sps:$4 sm:$0xff]  }
 0x45f   :  { %v705_v42 = vpack.c.bf16 %v704_v41, %v703_v40  ;;  %v4056_v40 = vld [vmem:[%s5169_s6] ss:$8 sps:$4 sm:$0xff]  }
 0x461   :  { %3832 = vmatmul.mubr.msk.bf16.vlgmr.msra.gmra.mxu0 %vm249_vm3, %v705_v42 }
 0x462   :  { %993 = vmatprep.mubr.bf16.mxu0 %v4281_v14 }
 0x4e0   :  { %v357_v43 = vpop.f32.mrf.mxu0 }
 0x4e1   :  { %364 = vst.msk [vmem:[#allocation2] sm:$0xff] %vm249_vm3, %v357_v43 }
 0x4e2   :  { %v3797_v44 = vpop.f32.mrf.mxu0 }
 0x4e4   :  { %v360_v45 = vpop.f32.mrf.mxu0 }
 0x4e5   :  { %365 = vst.msk [vmem:[#allocation2 + $0x8] sm:$0xff] %vm249_vm3, %v360_v45 }
 0x4e6   :  { %v3798_v46 = vpop.f32.mrf.mxu0 }
 0x4e8   :  { %v482_v48 = vpop.f32.mrf.mxu0 }
 0x4e9   :  { %491 = vrot.lane.b32.xlu0 %v482_v48, %s5185_s0 }
 0x4ea   :  { %v3809_v50 = vpop.f32.mrf.mxu0 }
 0x4eb   :  { %v3527_v50 = vld [vmem:[%s5166_s2 + $0x4] ss:$0 sm:$0xff] }
 0x4ec   :  { %v485_v51 = vpop.f32.mrf.mxu0 }
 0x4ed   :  { %493 = vrot.lane.b32.xlu1 %v485_v51, %s5185_s0 }
 0x4ee   :  { %v3810_v52 = vpop.f32.mrf.mxu0 }
 0x4f0   :  { %v614_v53 = vpop.f32.mrf.mxu0 }
 0x4f1   :  { %623 = vrot.lane.b32.xlu0 %v614_v53, %s4285_s3 }
 0x4f2   :  { %v3821_v54 = vpop.f32.mrf.mxu0 }
 0x4f3   :  { %v3528_v54 = vld [vmem:[%s5166_s2 + $0x5] ss:$0 sm:$0xff] }
 0x4f4   :  { %v617_v55 = vpop.f32.mrf.mxu0 }
 0x4f5   :  { %625 = vrot.lane.b32.xlu1 %v617_v55, %s4285_s3 }
 0x4f6   :  { %v3822_v56 = vpop.f32.mrf.mxu0 }
 0x521   :  { %v746_v60 = vpop.f32.mrf.mxu0 }
 0x522   :  { %755 = vrot.lane.b32.xlu0 %v746_v60, %s4284_s30  ;;  %v4060_v60 = vld [vmem:[%s5170_s7 + $0x38] sm:$0xff]  }
 0x523   :  { %v3833_v61 = vpop.f32.mrf.mxu0 }
 0x524   :  { %v4061_v61 = vld [vmem:[%s5170_s7 + $0x70] sm:$0xff]  }
 0x525   :  { %v749_v62 = vpop.f32.mrf.mxu0 }
 0x526   :  { %757 = vrot.lane.b32.xlu1 %v749_v62, %s4284_s30  ;;  %v4062_v62 = vld [vmem:[%s5170_s7 + $0x30] sm:$0xff]  }
 0x527   :  { %v3834_v63 = vpop.f32.mrf.mxu0 }
 0x528   :  { %v4063_v63 = vld [vmem:[%s5170_s7 + $0x68] sm:$0xff]  }
 0x55b   :  { %v492_v1 = vpop.permute.xlu0 %491 }
 0x55c   :  { %498 = vst.msk [vmem:[#allocation2] sm:$0xff] %vm497_vm4, %v492_v1  ;;  %v4064_v1 = vld [vmem:[%s5170_s7 + $0x28] sm:$0xff]  }
 0x55f   :  { %v494_v2 = vpop.permute.xlu1 %493 }
 0x560   :  { %499 = vst.msk [vmem:[#allocation2 + $0x8] sm:$0xff] %vm497_vm4, %v494_v2  ;;  %v4065_v2 = vld [vmem:[%s5170_s7 + $0x60] sm:$0xff]  }
 0x563   :  { %v624_v3 = vpop.permute.xlu0 %623 }
 0x564   :  { %630 = vst.msk [vmem:[#allocation2] sm:$0xff] %vm629_vm5, %v624_v3  ;;  %v4066_v3 = vld [vmem:[%s5170_s7 + $0x20] sm:$0xff]  }
 0x567   :  { %v626_v4 = vpop.permute.xlu1 %625 }
 0x568   :  { %631 = vst.msk [vmem:[#allocation2 + $0x8] sm:$0xff] %vm629_vm5, %v626_v4  ;;  %v4067_v4 = vld [vmem:[%s5170_s7 + $0x58] sm:$0xff]  }
 0x594   :  { %v756_v5 = vpop.permute.xlu0 %755 }
 0x595   :  { %762 = vst.msk [vmem:[#allocation2] sm:$0xff] %vm761_vm6, %v756_v5  ;;  %v4068_v5 = vld [vmem:[%s5170_s7 + $0x18] sm:$0xff]  }
 0x598   :  { %v758_v6 = vpop.permute.xlu1 %757 }
 0x599   :  { %763 = vst.msk [vmem:[#allocation2 + $0x8] sm:$0xff] %vm761_vm6, %v758_v6  ;;  %v4069_v6 = vld [vmem:[%s5170_s7 + $0x50] sm:$0xff]  }
 0x59c   :  { %v764_v7 = vld [vmem:[#allocation2] sm:$0xff] }
 0x5a0   :  { %v765_v8 = vld [vmem:[#allocation2 + $0x8] sm:$0xff] }
 0x5a1   :  { %v766_v9 = vpack.c.bf16 %v765_v8, %v764_v7  ;;  %v4070_v7 = vld [vmem:[%s5170_s7 + $0x10] sm:$0xff]   ;;  %v4071_v8 = vld [vmem:[%s5170_s7 + $0x48] sm:$0xff]  }
 0x5a3   :  { %3844 = vmatmul.mubr.msk.bf16.vlgmr.msra.gmra.mxu1 %vm194_vm2, %v766_v9  ;;  %v4072_v9 = vld [vmem:[%s5170_s7 + $0x8] sm:$0xff]  }
 0x5a4   :  { %3677 = vmatpush3.bf16.msra.mxu1 %v4060_v60 }
 0x5a5   :  { %3678 = vmatprep.subr.bf16.mxu1 %v4061_v61 }
 0x5a8   :  { %3679 = vmatpush3.bf16.msra.mxu1 %v4062_v62 }
 0x5a9   :  { %3680 = vmatprep.subr.bf16.mxu1 %v4063_v63 }
 0x5ac   :  { %3681 = vmatpush3.bf16.msra.mxu1 %v4064_v1 }
 0x5ad   :  { %3682 = vmatprep.subr.bf16.mxu1 %v4065_v2 }
 0x5b0   :  { %3683 = vmatpush3.bf16.msra.mxu1 %v4066_v3 }
 0x5b1   :  { %3684 = vmatprep.subr.bf16.mxu1 %v4067_v4  ;;  %v3538_v4 = vld [vmem:[%s5166_s2 + $0x8] ss:$0 sm:$0xff] }
 0x5b4   :  { %3685 = vmatpush3.bf16.msra.mxu1 %v4068_v5 }
 0x5b5   :  { %3686 = vmatprep.subr.bf16.mxu1 %v4069_v6 }
 0x5b8   :  { %3687 = vmatpush3.bf16.msra.mxu1 %v4070_v7 }
 0x5b9   :  { %3688 = vmatprep.subr.bf16.mxu1 %v4071_v8 }
 0x5bc   :  { %3689 = vmatpush3.bf16.msra.mxu1 %v4072_v9 }
 0x663   :  { %v843_v11 = vpop.f32.mrf.mxu1 }
 0x664   :  { %v844_v12 = vadd.f32 %v3521_v10, %v843_v11  ;;  %v4074_v11 = vld [vmem:[%s5170_s7] sm:$0xff]  }
 0x665   :  { %v3845_v13 = vpop.f32.mrf.mxu1 }
 0x666   :  { %v850_v15 = vadd.f32 %v844_v12, %v4441_v19  ;;  %v906_v12 = vld [vmem:[%s5166_s2 + $0x6] sm:$0x3] }
 0x667   :  { %v846_v16 = vpop.f32.mrf.mxu1  ;;  %v911_v13 = vrot.slane %v906_v12, %v4450_v25 }
 0x668   :  { %v847_v17 = vadd.f32 %v3521_v10, %v846_v16  ;;  %v854_v18 = vsel %vm194_vm2, %v850_v15, 0.0  ;;  %v4073_v10 = vld [vmem:[%s5170_s7 + $0x40] sm:$0xff]  }
 0x669   :  { %855 = vadd.xlane.f32.xlu0 %v854_v18  ;;  %v3846_v21 = vpop.f32.mrf.mxu1  ;;  %3690 = vmatprep.subr.bf16.mxu1 %v4073_v10 }
 0x66a   :  { %v851_v22 = vadd.f32 %v847_v17, %v4443_v20  ;;  %v4049_v20 = vld [vmem:[%s5169_s6 + $0x34] ss:$8 sps:$4 sm:$0xff]   ;;  %3691 = vmatpush3.bf16.msra.mxu1 %v4074_v11 }
 0x66b   :  { %969 = vmatprep.subr.bf16.mxu0 %v4049_v20  ;;  %3859 = vmatprep.subr.bf16.mxu1 %v4279_v0 }
 0x66c   :  { %v857_v23 = vsel %vm194_vm2, %v851_v22, 0.0  ;;  %970 = vmatpush1.bf16.msra.mxu0 %v4047_v33 }
 0x66d   :  { %858 = vadd.xlane.f32.xlu1 %v857_v23  ;;  %971 = vmatprep.subr.bf16.mxu0 %v4052_v34 }
 0x670   :  { %972 = vmatpush1.bf16.msra.mxu0 %v4050_v35 }
 0x671   :  { %973 = vmatprep.subr.bf16.mxu0 %v4055_v36 }
 0x674   :  { %974 = vmatpush1.bf16.msra.mxu0 %v4053_v38 }
 0x675   :  { %975 = vmatprep.subr.bf16.mxu0 %v4058_v39 }
 0x678   :  { %976 = vmatpush1.bf16.msra.mxu0 %v4056_v40 }
 0x6f2   :  { %v856_v47 = vpop.xlane.xlu0 %855 }
 0x6f3   :  { %v861_v24 = vmul.f32 0.015625, %v856_v47 }
 0x6f5   :  { %v863_v26 = vsub.f32 %v850_v15, %v861_v24  ;;  %v915_v15 = vrot.slane %v906_v12, %v4463_v37 }
 0x6f6   :  { %v859_v27 = vpop.xlane.xlu1 %858 }
 0x6f7   :  { %v862_v28 = vmul.f32 0.015625, %v859_v27  ;;  %v865_v29 = vmul.f32 %v863_v26, %v863_v26 }
 0x6f9   :  { %v864_v30 = vsub.f32 %v851_v22, %v862_v28  ;;  %v867_v19 = vsel %vm194_vm2, %v865_v29, 0.0 }
 0x6fa   :  { %868 = vadd.xlane.f32.xlu0 %v867_v19 }
 0x6fb   :  { %v866_v31 = vmul.f32 %v864_v30, %v864_v30 }
 0x6fd   :  { %v870_v32 = vsel %vm194_vm2, %v866_v31, 0.0 }
 0x6fe   :  { %871 = vadd.xlane.f32.xlu0 %v870_v32 }
 0x783   :  { %v869_v41 = vpop.xlane.xlu0 %868 }
 0x784   :  { %v873_v42 = vmul.f32 0.015625, %v869_v41 }
 0x786   :  { %v875_v43 = vadd.f32 1e-05, %v873_v42 }
 0x787   :  { %v872_v44 = vpop.xlane.xlu0 %871 }
 0x788   :  { %4167 = vrsqrt.f32 %v875_v43  ;;  %v874_v45 = vmul.f32 0.015625, %v872_v44 }
 0x78a   :  { %v876_v46 = vadd.f32 1e-05, %v874_v45 }
 0x78c   :  { %4169 = vrsqrt.f32 %v876_v46 }
 0x795   :  { %v4168_v48 = vpop.eup %4167 }
 0x796   :  { %v879_v49 = vmul.f32 %v4168_v48, %v863_v26 }
 0x798   :  { %v887_v53 = vmul.f32 %v3527_v50, %v879_v49 }
 0x799   :  { %v4170_v51 = vpop.eup %4169 }
 0x79a   :  { %v880_v52 = vmul.f32 %v4170_v51, %v864_v30  ;;  %v4600_v56 = vadd.f32 %v3528_v54, %v887_v53 }
 0x79c   :  { %v888_v55 = vmul.f32 %v3527_v50, %v880_v52 }
 0x79e   :  { %v4602_v57 = vadd.f32 %v3528_v54, %v888_v55 }
 0x7a0   :  { %v897_v58 = vpack.c.bf16 %v4602_v57, %v4600_v56 }
 0x7a2   :  { %3537 = vmatmul.mubr.msk.bf16.vlgmr.msra.gmra.mxu0 %vm194_vm2, %v897_v58 }
 0x7a3   :  { %1360 = vmatprep.mubr.bf16.mxu0 %v4281_v14 }
 0x862   :  { %v995_v16 = vpop.f32.mrf.mxu0 }
 0x863   :  { %v996_v17 = vadd.f32 %v995_v16, %v911_v13 }
 0x864   :  { %v997_v18 = vpop.f32.mrf.mxu0 }
 0x865   :  { %v1004_v21 = vmul.f32 %v996_v17, %v996_v17  ;;  %v998_v22 = vadd.f32 %v997_v18, %v915_v15 }
 0x866   :  { %v999_v23 = vpop.f32.mrf.mxu0 }
 0x867   :  { %v1008_v47 = vmul.f32 %v1004_v21, %v996_v17  ;;  %v1005_v24 = vmul.f32 %v998_v22, %v998_v22  ;;  %v1000_v26 = vadd.f32 %v999_v23, %v911_v13 }
 0x868   :  { %v1001_v27 = vpop.f32.mrf.mxu0 }
 0x869   :  { %v1012_v28 = vmul.f32 0.044715, %v1008_v47  ;;  %v1009_v29 = vmul.f32 %v1005_v24, %v998_v22  ;;  %v1006_v30 = vmul.f32 %v1000_v26, %v1000_v26  ;;  %v1002_v19 = vadd.f32 %v1001_v27, %v915_v15 }
 0x86b   :  { %v1016_v31 = vadd.f32 %v1012_v28, %v996_v17  ;;  %v1013_v32 = vmul.f32 0.044715, %v1009_v29  ;;  %v1010_v20 = vmul.f32 %v1006_v30, %v1000_v26  ;;  %v1007_v33 = vmul.f32 %v1002_v19, %v1002_v19  ;;  %v4075_v28 = vld [vmem:[%s5171_s8 + $0x30] ss:$8 sps:$4 sm:$0xff]   ;;  %v4080_v29 = vld [vmem:[%s5171_s8 + $0x24] ss:$8 sps:$4 sm:$0xff]  }
 0x86c   :  { %v4078_v30 = vld [vmem:[%s5171_s8 + $0x20] ss:$8 sps:$4 sm:$0xff]  }
 0x86d   :  { %v1020_v34 = vmul.f32 0.7978846, %v1016_v31  ;;  %v1017_v35 = vadd.f32 %v1013_v32, %v998_v22  ;;  %v1014_v36 = vmul.f32 0.044715, %v1010_v20  ;;  %v1011_v38 = vmul.f32 %v1007_v33, %v1002_v19  ;;  %v4081_v31 = vld [vmem:[%s5171_s8 + $0x10] ss:$8 sps:$4 sm:$0xff]  }
 0x86e   :  { %v4086_v32 = vld [vmem:[%s5171_s8 + $0x4] ss:$8 sps:$4 sm:$0xff]   ;;  %v4084_v20 = vld [vmem:[%s5171_s8] ss:$8 sps:$4 sm:$0xff]  }
 0x86f   :  { %v1021_v39 = vmul.f32 0.7978846, %v1017_v35  ;;  %v1018_v40 = vadd.f32 %v1014_v36, %v1000_v26  ;;  %v1015_v41 = vmul.f32 0.044715, %v1011_v38  ;;  %4171 = vtanh.f32 %v1020_v34 }
 0x871   :  { %4173 = vtanh.f32 %v1021_v39  ;;  %v1022_v42 = vmul.f32 0.7978846, %v1018_v40  ;;  %v1019_v43 = vadd.f32 %v1015_v41, %v1002_v19 }
 0x873   :  { %4175 = vtanh.f32 %v1022_v42  ;;  %v1023_v44 = vmul.f32 0.7978846, %v1019_v43  ;;  %v3555_v42 = vld [vmem:[%s5166_s2 + $0x9] ss:$0 sm:$0xff] }
 0x875   :  { %4177 = vtanh.f32 %v1023_v44 }
 0x87c   :  { %v4172_v45 = vpop.eup %4171 }
 0x87d   :  { %v1028_v50 = vadd.f32 1.0, %v4172_v45 }
 0x87e   :  { %v4174_v46 = vpop.eup %4173 }
 0x87f   :  { %v1029_v48 = vadd.f32 1.0, %v4174_v46  ;;  %v1032_v58 = vmul.f32 0.5, %v1028_v50  ;;  %v3556_v46 = vld [vmem:[%s5166_s2 + $0xa] ss:$0 sm:$0xff] }
 0x880   :  { %v4176_v49 = vpop.eup %4175 }
 0x881   :  { %v1030_v51 = vadd.f32 1.0, %v4176_v49  ;;  %v1033_v55 = vmul.f32 0.5, %v1029_v48  ;;  %v1036_v63 = vmul.f32 %v1032_v58, %v996_v17 }
 0x882   :  { %v4178_v52 = vpop.eup %4177 }
 0x883   :  { %v1034_v53 = vmul.f32 0.5, %v1030_v51  ;;  %v1031_v54 = vadd.f32 1.0, %v4178_v52  ;;  %v1037_v61 = vmul.f32 %v1033_v55, %v998_v22  ;;  %v1273_v52 = vld [vmem:[%s5166_s2 + $0xb] sm:$0x3] }
 0x885   :  { %v1035_v59 = vmul.f32 0.5, %v1031_v54  ;;  %v1038_v60 = vmul.f32 %v1034_v53, %v1000_v26  ;;  %v1278_v54 = vrot.slane %v1273_v52, %v4450_v25 }
 0x887   :  { %v1039_v62 = vmul.f32 %v1035_v59, %v1002_v19  ;;  %v1040_v2 = vpack.c.bf16 %v1038_v60, %v1036_v63  ;;  %v4083_v19 = vld [vmem:[%s5171_s8 + $0x14] ss:$8 sps:$4 sm:$0xff]  }
 0x889   :  { %v1041_v1 = vpack.c.bf16 %v1039_v62, %v1037_v61 }
 0x88b   :  { %1209 = vmatprep.mubr.bf16.mxu1 %v1041_v1 }
 0x88c   :  { %1210 = vmatmul.mubr.bf16.vlgmr.msra.gmra.mxu1 %v1040_v2 }
 0x88d   :  { %3861 = vmatprep.mubr.msk.bf16.mxu1 %vm4280_vm0, %v4279_v0 }
 0x94c   :  { %v3692_v3 = vpop.f32.mrf.mxu1 }
 0x94e   :  { %v3693_v5 = vpop.f32.mrf.mxu1 }
 0x94f   :  { %v3694_v6 = vadd.f32 %v3693_v5, %v3692_v3 }
 0x950   :  { %v3695_v7 = vpop.f32.mrf.mxu1 }
 0x951   :  { %v1212_v8 = vadd.f32 %v3694_v6, %v3538_v4 }
 0x952   :  { %v3696_v9 = vpop.f32.mrf.mxu1 }
 0x953   :  { %v3697_v10 = vadd.f32 %v3696_v9, %v3695_v7  ;;  %v1218_v11 = vadd.f32 %v1212_v8, %v4600_v56  ;;  %v1282_v7 = vrot.slane %v1273_v52, %v4463_v37 }
 0x955   :  { %v1215_v12 = vadd.f32 %v3697_v10, %v3538_v4  ;;  %v1222_v13 = vsel %vm194_vm2, %v1218_v11, 0.0 }
 0x956   :  { %1223 = vadd.xlane.f32.xlu1 %v1222_v13 }
 0x957   :  { %v1219_v15 = vadd.f32 %v1215_v12, %v4602_v57  ;;  %v4077_v57 = vld [vmem:[%s5171_s8 + $0x34] ss:$8 sps:$4 sm:$0xff]  }
 0x958   :  { %1336 = vmatprep.subr.bf16.mxu0 %v4077_v57 }
 0x959   :  { %v1225_v16 = vsel %vm194_vm2, %v1219_v15, 0.0  ;;  %1337 = vmatpush1.bf16.msra.mxu0 %v4075_v28  ;;  %v4276_v28 = vld [vmem:[%s5167_s1 + $0x8] sm:$0xff] }
 0x95a   :  { %1226 = vadd.xlane.f32.xlu0 %v1225_v16  ;;  %1338 = vmatprep.subr.bf16.mxu0 %v4080_v29 }
 0x95d   :  { %1339 = vmatpush1.bf16.msra.mxu0 %v4078_v30 }
 0x95e   :  { %1340 = vmatprep.subr.bf16.mxu0 %v4083_v19 }
 0x961   :  { %1341 = vmatpush1.bf16.msra.mxu0 %v4081_v31 }
 0x962   :  { %1342 = vmatprep.subr.bf16.mxu0 %v4086_v32 }
 0x965   :  { %1343 = vmatpush1.bf16.msra.mxu0 %v4084_v20 }
 0x966   :  { %3847 = vmatprep.subr.bf16.mxu0 %v4279_v0 }
 0x9df   :  { %v1224_v17 = vpop.xlane.xlu1 %1223 }
 0x9e0   :  { %v1228_v18 = vmul.f32 0.015625, %v1224_v17 }
 0x9e2   :  { %v1230_v21 = vsub.f32 %v1218_v11, %v1228_v18 }
 0x9e3   :  { %v1227_v22 = vpop.xlane.xlu0 %1226 }
 0x9e4   :  { %v1229_v23 = vmul.f32 0.015625, %v1227_v22  ;;  %v1232_v47 = vmul.f32 %v1230_v21, %v1230_v21 }
 0x9e6   :  { %v1231_v24 = vsub.f32 %v1219_v15, %v1229_v23  ;;  %v1234_v26 = vsel %vm194_vm2, %v1232_v47, 0.0  ;;  %v4275_v23 = vld [vmem:[%s5167_s1] sm:$0xff] }
 0x9e7   :  { %1235 = vadd.xlane.f32.xlu1 %v1234_v26 }
 0x9e8   :  { %v1233_v56 = vmul.f32 %v1231_v24, %v1231_v24 }
 0x9ea   :  { %v1237_v27 = vsel %vm194_vm2, %v1233_v56, 0.0 }
 0x9eb   :  { %1238 = vadd.xlane.f32.xlu0 %v1237_v27 }
 0xa70   :  { %v1236_v33 = vpop.xlane.xlu1 %1235 }
 0xa71   :  { %v1240_v34 = vmul.f32 0.015625, %v1236_v33 }
 0xa73   :  { %v1242_v35 = vadd.f32 1e-05, %v1240_v34 }
 0xa74   :  { %v1239_v36 = vpop.xlane.xlu0 %1238 }
 0xa75   :  { %4179 = vrsqrt.f32 %v1242_v35  ;;  %v1241_v38 = vmul.f32 0.015625, %v1239_v36 }
 0xa77   :  { %v1243_v39 = vadd.f32 1e-05, %v1241_v38 }
 0xa79   :  { %4181 = vrsqrt.f32 %v1243_v39 }
 0xa82   :  { %v4180_v40 = vpop.eup %4179 }
 0xa83   :  { %v1246_v41 = vmul.f32 %v4180_v40, %v1230_v21 }
 0xa85   :  { %v1254_v45 = vmul.f32 %v3555_v42, %v1246_v41 }
 0xa86   :  { %v4182_v43 = vpop.eup %4181 }
 0xa87   :  { %v1247_v44 = vmul.f32 %v4182_v43, %v1231_v24  ;;  %v4704_v49 = vadd.f32 %v3556_v46, %v1254_v45 }
 0xa89   :  { %v1255_v48 = vmul.f32 %v3555_v42, %v1247_v44 }
 0xa8b   :  { %v4706_v50 = vadd.f32 %v3556_v46, %v1255_v48 }
 0xa8d   :  { %v1264_v51 = vpack.c.bf16 %v4706_v50, %v4704_v49 }
 0xa8f   :  { %3565 = vmatmul.mubr.msk.bf16.vlgmr.msra.gmra.mxu0 %vm194_vm2, %v1264_v51 }
 0xa90   :  { %3849 = vmatprep.mubr.msk.bf16.mxu0 %vm4280_vm0, %v4279_v0 }
 0xb4f   :  { %v1362_v53 = vpop.f32.mrf.mxu0 }
 0xb50   :  { %v1363_v59 = vadd.f32 %v1362_v53, %v1278_v54 }
 0xb51   :  { %v1364_v55 = vpop.f32.mrf.mxu0 }
 0xb52   :  { %v1371_v63 = vmul.f32 0.25, %v1363_v59  ;;  %v1365_v10 = vadd.f32 %v1364_v55, %v1282_v7 }
 0xb53   :  { %v1366_v58 = vpop.f32.mrf.mxu0 }
 0xb54   :  { %v1367_v60 = vadd.f32 %v1366_v58, %v1278_v54 }
 0xb55   :  { %v1368_v4 = vpop.f32.mrf.mxu0 }
 0xb56   :  { %v1372_v61 = vmul.f32 0.25, %v1367_v60  ;;  %v1374_v62 = vpack.c.bf16 %v1367_v60, %v1363_v59  ;;  %v1369_v8 = vadd.f32 %v1368_v4, %v1282_v7 }
 0xb58   :  { %1498 = vrot.lane.b32.xlu0 %v1374_v62, %s4284_s30  ;;  %1377 = vrot.lane.b32.xlu1 %v1374_v62, %s4282_s28  ;;  %v1373_v1 = vpack.c.bf16 %v1372_v61, %v1371_v63  ;;  %v4729_v11 = vpack.c.bf16 %v1369_v8, %v1365_v10 }
 0xb5c   :  { %1628 = vrot.lane.b32.xlu0 %v1373_v1, %s4286_s19  ;;  %1496 = vrot.lane.b32.xlu1 %v1373_v1, %s4283_s29 }
 0xb60   :  { %1759 = vrot.lane.b32.xlu0 %v1373_v1, %s4288_s20  ;;  %1630 = vrot.lane.b32.xlu1 %v1374_v62, %s4285_s3 }
 0xb64   :  { %1761 = vrot.lane.b32.xlu1 %v1374_v62, %s5193_s25 }
 0xbca   :  { %v1499_v2 = vpop.permute.xlu0 %1498  ;;  %v1378_v3 = vpop.permute.xlu1 %1377 }
 0xbcb   :  { %v1504_v5 = vsel %vm249_vm3, %v1499_v2, 0  ;;  %v1383_v6 = vsel %vm249_vm3, %v1378_v3, 0 }
 0xbcc   :  { %3848 = vmatpush3.bf16.xpose.msra.mxu0 %v1383_v6  ;;  %3860 = vmatpush3.bf16.xpose.msra.mxu1 %v1504_v5 }
 0xbcd   :  { %3853 = vmatprep.subr.bf16.mxu0 %v4279_v0  ;;  %3871 = vmatprep.subr.bf16.mxu1 %v4279_v0 }
 0xbce   :  { %v1497_v9 = vpop.permute.xlu1 %1496  ;;  %v1629_v16 = vpop.permute.xlu0 %1628 }
 0xbd2   :  { %v1631_v12 = vpop.permute.xlu1 %1630  ;;  %v1760_v18 = vpop.permute.xlu0 %1759 }
 0xbd3   :  { %v1636_v13 = vsel %vm249_vm3, %v1631_v12, 0  ;;  %3850 = vmatmul.mubr.msk.bf16.vlgmr.msra.gmra.mxu0 %vm249_vm3, %v1373_v1  ;;  %3862 = vmatmul.mubr.msk.bf16.vlgmr.msra.gmra.mxu1 %vm249_vm3, %v1497_v9 }
 0xbd4   :  { %3854 = vmatpush3.bf16.msra.mxu0 %v4729_v11  ;;  %3872 = vmatpush3.bf16.xpose.msra.mxu1 %v1636_v13 }
 0xbd5   :  { %3873 = vmatprep.mubr.msk.bf16.mxu1 %vm4280_vm0, %v4279_v0  ;;  %3883 = vmatprep.subr.bf16.mxu1 %v4279_v0 }
 0xbd6   :  { %3855 = vmatprep.mubr.msk.bf16.mxu0 %vm4280_vm0, %v4279_v0  ;;  %3865 = vmatprep.subr.bf16.mxu0 %v4279_v0  ;;  %v1762_v15 = vpop.permute.xlu1 %1761 }
 0xbd7   :  { %v1767_v17 = vsel %vm249_vm3, %v1762_v15, 0 }
 0xbdb   :  { %3874 = vmatmul.mubr.msk.bf16.vlgmr.msra.gmra.mxu1 %vm249_vm3, %v1629_v16 }
 0xbdc   :  { %3884 = vmatpush3.bf16.xpose.msra.mxu1 %v1767_v17  ;;  %3885 = vmatprep.mubr.msk.bf16.mxu1 %vm4280_vm0, %v4279_v0 }
 0xbdd   :  { %3895 = vmatprep.subr.bf16.mxu1 %v4279_v0 }
 0xbe3   :  { %3886 = vmatmul.mubr.msk.bf16.vlgmr.msra.gmra.mxu1 %vm249_vm3, %v1760_v18 }
 0xbe4   :  { %3903 = vmatprep.mubr.msk.bf16.mxu1 %vm4280_vm0, %v4279_v0 }
 0xc93   :  { %v1419_v21 = vpop.f32.mrf.mxu0  ;;  %v1540_v22 = vpop.f32.mrf.mxu1 }
 0xc94   :  { %v1420_v47 = vadd.f32 %v4275_v23, %v1419_v21  ;;  %v1541_v32 = vadd.f32 %v4275_v23, %v1540_v22 }
 0xc95   :  { %v3851_v24 = vpop.f32.mrf.mxu0  ;;  %v3863_v26 = vpop.f32.mrf.mxu1 }
 0xc96   :  { %v1426_v56 = vsel %vm249_vm3, %v1420_v47, -inf  ;;  %v1547_v38 = vsel %vm249_vm3, %v1541_v32, -inf }
 0xc97   :  { %v1543_v27 = vpop.f32.mrf.mxu1  ;;  %1427 = vmax.xlane.f32.xlu1 %v1426_v56  ;;  %v1422_v57 = vpop.f32.mrf.mxu0 }
 0xc98   :  { %v1544_v29 = vadd.f32 %v4276_v28, %v1543_v27  ;;  %v1423_v30 = vadd.f32 %v4276_v28, %v1422_v57 }
 0xc99   :  { %v3852_v19 = vpop.f32.mrf.mxu0  ;;  %v3864_v31 = vpop.f32.mrf.mxu1 }
 0xc9a   :  { %v1550_v20 = vsel %vm249_vm3, %v1544_v29, -inf  ;;  %v1429_v33 = vsel %vm249_vm3, %v1423_v30, -inf }
 0xc9b   :  { %v1672_v34 = vpop.f32.mrf.mxu1  ;;  %1551 = vmax.xlane.f32.xlu1 %v1550_v20  ;;  %1430 = vmax.xlane.f32.xlu0 %v1429_v33 }
 0xc9c   :  { %v1673_v36 = vadd.f32 %v4275_v23, %v1672_v34 }
 0xc9d   :  { %v3875_v35 = vpop.f32.mrf.mxu1 }
 0xc9e   :  { %v1679_v43 = vsel %vm249_vm3, %v1673_v36, -inf }
 0xc9f   :  { %v1675_v39 = vpop.f32.mrf.mxu1  ;;  %1548 = vmax.xlane.f32.xlu0 %v1547_v38 }
 0xca0   :  { %v1676_v40 = vadd.f32 %v4276_v28, %v1675_v39 }
 0xca1   :  { %v3876_v41 = vpop.f32.mrf.mxu1 }
 0xca2   :  { %v1682_v42 = vsel %vm249_vm3, %v1676_v40, -inf }
 0xca3   :  { %v1803_v44 = vpop.f32.mrf.mxu1  ;;  %1683 = vmax.xlane.f32.xlu1 %v1682_v42  ;;  %1680 = vmax.xlane.f32.xlu0 %v1679_v43 }
 0xca4   :  { %v1804_v45 = vadd.f32 %v4275_v23, %v1803_v44 }
 0xca5   :  { %v3887_v46 = vpop.f32.mrf.mxu1 }
 0xca6   :  { %v1810_v48 = vsel %vm249_vm3, %v1804_v45, -inf }
 0xca7   :  { %v1806_v51 = vpop.f32.mrf.mxu1  ;;  %1811 = vmax.xlane.f32.xlu0 %v1810_v48 }
 0xca8   :  { %v1807_v52 = vadd.f32 %v4276_v28, %v1806_v51 }
 0xca9   :  { %v3888_v53 = vpop.f32.mrf.mxu1 }
 0xcaa   :  { %v1813_v54 = vsel %vm249_vm3, %v1807_v52, -inf }
 0xcab   :  { %1814 = vmax.xlane.f32.xlu1 %v1813_v54 }
 0xd20   :  { %v1428_v55 = vpop.xlane.xlu1 %1427 }
 0xd21   :  { %v1432_v58 = vsub.f32 %v1420_v47, %v1428_v55 }
 0xd23   :  { %v1434_v59 = vmul.f32 1.442695, %v1432_v58 }
 0xd24   :  { %v1552_v60 = vpop.xlane.xlu1 %1551  ;;  %v1431_v61 = vpop.xlane.xlu0 %1430 }
 0xd25   :  { %4183 = vpow2.f32 %v1434_v59  ;;  %v1554_v62 = vsub.f32 %v1544_v29, %v1552_v60  ;;  %v1433_v63 = vsub.f32 %v1423_v30, %v1431_v61 }
 0xd27   :  { %v1436_v1 = vmul.f32 1.442695, %v1433_v63  ;;  %v1557_v2 = vmul.f32 1.442695, %v1554_v62 }
 0xd28   :  { %v1549_v3 = vpop.xlane.xlu0 %1548 }
 0xd29   :  { %v1553_v4 = vsub.f32 %v1541_v32, %v1549_v3  ;;  %4185 = vpow2.f32 %v1436_v1 }
 0xd2a   :  { %4187 = vpow2.f32 %v1557_v2 }
 0xd2b   :  { %v1555_v5 = vmul.f32 1.442695, %v1553_v4 }
 0xd2c   :  { %v1684_v6 = vpop.xlane.xlu1 %1683  ;;  %v1681_v7 = vpop.xlane.xlu0 %1680 }
 0xd2d   :  { %4189 = vpow2.f32 %v1555_v5  ;;  %v1686_v8 = vsub.f32 %v1676_v40, %v1684_v6  ;;  %v1685_v9 = vsub.f32 %v1673_v36, %v1681_v7 }
 0xd2f   :  { %v1689_v10 = vmul.f32 1.442695, %v1686_v8  ;;  %v1687_v12 = vmul.f32 1.442695, %v1685_v9 }
 0xd30   :  { %v1812_v13 = vpop.xlane.xlu0 %1811 }
 0xd31   :  { %4191 = vpow2.f32 %v1689_v10  ;;  %v1816_v15 = vsub.f32 %v1804_v45, %v1812_v13  ;;  %v4087_v13 = vld [vmem:[%s5172_s9 + $0x18] sm:$0xff]  }
 0xd32   :  { %v4184_v16 = vpop.eup %4183  ;;  %4193 = vpow2.f32 %v1687_v12  ;;  %3896 = vmatpush3.bf16.msra.mxu1 %v4087_v13  ;;  %v3580_v13 = vld [vmem:[%s5166_s2 + $0xe] ss:$0 sm:$0xff] }
 0xd33   :  { %v1818_v17 = vmul.f32 1.442695, %v1816_v15  ;;  %v1438_v18 = vsel %vm249_vm3, %v4184_v16, 0.0  ;;  %3897 = vmatprep.subr.bf16.mxu1 %v4279_v0 }
 0xd34   :  { %1439 = vadd.xlane.f32.xlu0 %v1438_v18  ;;  %v1815_v19 = vpop.xlane.xlu1 %1814 }
 0xd35   :  { %4195 = vpow2.f32 %v1818_v17  ;;  %v1817_v31 = vsub.f32 %v1807_v52, %v1815_v19 }
 0xd36   :  { %v4186_v21 = vpop.eup %4185 }
 0xd37   :  { %v1441_v22 = vsel %vm249_vm3, %v4186_v21, 0.0  ;;  %v4188_v23 = vpop.eup %4187  ;;  %v1820_v32 = vmul.f32 1.442695, %v1817_v31 }
 0xd38   :  { %1442 = vadd.xlane.f32.xlu1 %v1441_v22  ;;  %v1562_v26 = vsel %vm249_vm3, %v4188_v23, 0.0 }
 0xd39   :  { %4197 = vpow2.f32 %v1820_v32 }
 0xd3a   :  { %v4190_v47 = vpop.eup %4189 }
 0xd3b   :  { %v1559_v24 = vsel %vm249_vm3, %v4190_v47, 0.0 }
 0xd3c   :  { %1560 = vadd.xlane.f32.xlu0 %v1559_v24  ;;  %1563 = vadd.xlane.f32.xlu1 %v1562_v26  ;;  %v4090_v24 = vld [vmem:[%s5172_s9] sm:$0xff]  }
 0xd3e   :  { %v4192_v56 = vpop.eup %4191 }
 0xd3f   :  { %v4194_v27 = vpop.eup %4193  ;;  %v1694_v57 = vsel %vm249_vm3, %v4192_v56, 0.0 }
 0xd40   :  { %v1691_v28 = vsel %vm249_vm3, %v4194_v27, 0.0  ;;  %1695 = vadd.xlane.f32.xlu1 %v1694_v57 }
 0xd41   :  { %1692 = vadd.xlane.f32.xlu0 %v1691_v28 }
 0xd42   :  { %v4196_v29 = vpop.eup %4195 }
 0xd43   :  { %v1822_v30 = vsel %vm249_vm3, %v4196_v29, 0.0 }
 0xd45   :  { %1823 = vadd.xlane.f32.xlu0 %v1822_v30 }
 0xd46   :  { %v4198_v20 = vpop.eup %4197 }
 0xd47   :  { %v1825_v33 = vsel %vm249_vm3, %v4198_v20, 0.0 }
 0xd51   :  { %1702 = vrot.lane.b32.xlu1 %v4729_v11, %s4286_s19 }
 0xd5b   :  { %1571 = vrot.lane.b32.xlu0 %v4729_v11, %s4283_s29 }
 0xd75   :  { %1826 = vadd.xlane.f32.xlu1 %v1825_v33 }
 0xd86   :  { %1833 = vrot.lane.b32.xlu1 %v4729_v11, %s4288_s20 }
 0xdbd   :  { %v1440_v34 = vpop.xlane.xlu0 %1439 }
 0xdbe   :  { %4199 = vrcp.f32 %v1440_v34 }
 0xdc1   :  { %v1443_v35 = vpop.xlane.xlu1 %1442 }
 0xdc2   :  { %4201 = vrcp.f32 %v1443_v35  ;;  %v3574_v35 = vld [vmem:[%s5166_s2 + $0xd] ss:$0 sm:$0xff] }
 0xdc5   :  { %v1561_v36 = vpop.xlane.xlu0 %1560  ;;  %v1564_v38 = vpop.xlane.xlu1 %1563 }
 0xdc6   :  { %4203 = vrcp.f32 %v1561_v36 }
 0xdc7   :  { %4205 = vrcp.f32 %v1564_v38 }
 0xdc9   :  { %v1696_v40 = vpop.xlane.xlu1 %1695 }
 0xdca   :  { %v1693_v39 = vpop.xlane.xlu0 %1692  ;;  %4207 = vrcp.f32 %v1696_v40 }
 0xdcb   :  { %v4200_v41 = vpop.eup %4199  ;;  %4209 = vrcp.f32 %v1693_v39 }
 0xdcc   :  { %v1446_v44 = vmul.f32 %v4200_v41, %v4184_v16 }
 0xdcd   :  { %v1703_v59 = vpop.permute.xlu1 %1702 }
 0xdce   :  { %v1824_v42 = vpop.xlane.xlu0 %1823 }
 0xdcf   :  { %v4202_v43 = vpop.eup %4201  ;;  %4211 = vrcp.f32 %v1824_v42 }
 0xdd0   :  { %v1447_v45 = vmul.f32 %v4202_v43, %v4186_v21 }
 0xdd2   :  { %v1448_v48 = vpack.c.bf16 %v1447_v45, %v1446_v44  ;;  %v1572_v51 = vpop.permute.xlu0 %1571 }
 0xdd3   :  { %v4204_v46 = vpop.eup %4203 }
 0xdd4   :  { %v4206_v11 = vpop.eup %4205  ;;  %3856 = vmatmul.mubr.msk.bf16.vlgmr.msra.gmra.mxu0 %vm249_vm3, %v1448_v48  ;;  %v1567_v52 = vmul.f32 %v4204_v46, %v4190_v47  ;;  %v4089_v47 = vld [vmem:[%s5172_s9 + $0x8] sm:$0xff]  }
 0xdd5   :  { %3866 = vmatpush3.bf16.msra.mxu0 %v1572_v51  ;;  %3867 = vmatprep.mubr.msk.bf16.mxu0 %vm4280_vm0, %v4279_v0  ;;  %v1568_v53 = vmul.f32 %v4206_v11, %v4188_v23  ;;  %v4088_v23 = vld [vmem:[%s5172_s9 + $0x10] sm:$0xff]  }
 0xdd6   :  { %3877 = vmatprep.subr.bf16.mxu0 %v4279_v0  ;;  %3898 = vmatpush3.bf16.msra.mxu1 %v4088_v23 }
 0xdd7   :  { %v4208_v54 = vpop.eup %4207  ;;  %v1569_v55 = vpack.c.bf16 %v1568_v53, %v1567_v52  ;;  %3899 = vmatprep.subr.bf16.mxu1 %v4279_v0 }
 0xdd8   :  { %v4210_v58 = vpop.eup %4209  ;;  %v1700_v61 = vmul.f32 %v4208_v54, %v4192_v56 }
 0xdd9   :  { %v1699_v60 = vmul.f32 %v4210_v58, %v4194_v27 }
 0xdda   :  { %3900 = vmatpush3.bf16.msra.mxu1 %v4089_v47  ;;  %v4103_v47 = vld [vmem:[%s5174_s11 + $0x78] sm:$0xff]  }
 0xddb   :  { %v1701_v62 = vpack.c.bf16 %v1700_v61, %v1699_v60  ;;  %3901 = vmatprep.subr.bf16.mxu1 %v4279_v0  ;;  %v4091_v60 = vld [vmem:[%s5173_s10 + $0x30] ss:$8 sps:$4 sm:$0xff]   ;;  %v4096_v61 = vld [vmem:[%s5173_s10 + $0x24] ss:$8 sps:$4 sm:$0xff]  }
 0xddc   :  { %3868 = vmatmul.mubr.msk.bf16.vlgmr.msra.gmra.mxu0 %vm249_vm3, %v1569_v55  ;;  %v4212_v2 = vpop.eup %4211 }
 0xddd   :  { %3878 = vmatpush3.bf16.msra.mxu0 %v1703_v59  ;;  %3879 = vmatprep.mubr.msk.bf16.mxu0 %vm4280_vm0, %v4279_v0  ;;  %v1830_v4 = vmul.f32 %v4212_v2, %v4196_v29  ;;  %v4102_v2 = vld [vmem:[%s5173_s10 + $0x4] ss:$8 sps:$4 sm:$0xff]  }
 0xdde   :  { %3889 = vmatprep.subr.bf16.mxu0 %v4279_v0  ;;  %3902 = vmatpush3.bf16.msra.mxu1 %v4090_v24  ;;  %v4104_v24 = vld [vmem:[%s5174_s11 + $0x38] sm:$0xff]  }
 0xddf   :  { %3719 = vmatprep.subr.bf16.mxu1 %v4103_v47 }
 0xde4   :  { %3880 = vmatmul.mubr.msk.bf16.vlgmr.msra.gmra.mxu0 %vm249_vm3, %v1701_v62  ;;  %v4094_v62 = vld [vmem:[%s5173_s10 + $0x20] ss:$8 sps:$4 sm:$0xff]  }
 0xde5   :  { %3891 = vmatprep.mubr.msk.bf16.mxu0 %vm4280_vm0, %v4279_v0 }
 0xdfe   :  { %v1827_v63 = vpop.xlane.xlu1 %1826 }
 0xdff   :  { %4213 = vrcp.f32 %v1827_v63  ;;  %v4099_v63 = vld [vmem:[%s5173_s10 + $0x14] ss:$8 sps:$4 sm:$0xff]  }
 0xe02   :  { %v1834_v1 = vpop.permute.xlu1 %1833 }
 0xe03   :  { %3890 = vmatpush3.bf16.msra.mxu0 %v1834_v1  ;;  %v4097_v1 = vld [vmem:[%s5173_s10 + $0x10] ss:$8 sps:$4 sm:$0xff]  }
 0xe0c   :  { %v4214_v3 = vpop.eup %4213 }
 0xe0d   :  { %v1831_v5 = vmul.f32 %v4214_v3, %v4198_v20  ;;  %v4100_v3 = vld [vmem:[%s5173_s10] ss:$8 sps:$4 sm:$0xff]  }
 0xe0f   :  { %v1832_v6 = vpack.c.bf16 %v1831_v5, %v1830_v4 }
 0xe11   :  { %3892 = vmatmul.mubr.msk.bf16.vlgmr.msra.gmra.mxu0 %vm249_vm3, %v1832_v6 }
 0xe12   :  { %2118 = vmatprep.mubr.bf16.mxu0 %v4281_v14 }
 0xe94   :  { %v1486_v7 = vpop.f32.mrf.mxu0 }
 0xe95   :  { %1493 = vst.msk [vmem:[#allocation2] sm:$0xff] %vm249_vm3, %v1486_v7 }
 0xe96   :  { %v3857_v8 = vpop.f32.mrf.mxu0 }
 0xe98   :  { %v1489_v9 = vpop.f32.mrf.mxu0 }
 0xe99   :  { %1494 = vst.msk [vmem:[#allocation2 + $0x8] sm:$0xff] %vm249_vm3, %v1489_v9 }
 0xe9a   :  { %v3858_v10 = vpop.f32.mrf.mxu0 }
 0xe9c   :  { %v1611_v12 = vpop.f32.mrf.mxu0 }
 0xe9d   :  { %1620 = vrot.lane.b32.xlu0 %v1611_v12, %s5193_s25 }
 0xe9e   :  { %v3869_v15 = vpop.f32.mrf.mxu0 }
 0xea0   :  { %v1614_v16 = vpop.f32.mrf.mxu0 }
 0xea1   :  { %1622 = vrot.lane.b32.xlu1 %v1614_v16, %s5193_s25 }
 0xea2   :  { %v3870_v14 = vpop.f32.mrf.mxu0 }
 0xea4   :  { %v1742_v17 = vpop.f32.mrf.mxu0 }
 0xea5   :  { %1751 = vrot.lane.b32.xlu0 %v1742_v17, %s4285_s3  ;;  %v3581_v17 = vld [vmem:[%s5166_s2 + $0xf] ss:$0 sm:$0xff] }
 0xea6   :  { %v3881_v18 = vpop.f32.mrf.mxu0 }
 0xea8   :  { %v1745_v21 = vpop.f32.mrf.mxu0 }
 0xea9   :  { %1753 = vrot.lane.b32.xlu1 %v1745_v21, %s4285_s3 }
 0xeaa   :  { %v3882_v22 = vpop.f32.mrf.mxu0 }
 0xed1   :  { %v1873_v26 = vpop.f32.mrf.mxu0 }
 0xed2   :  { %1882 = vrot.lane.b32.xlu0 %v1873_v26, %s4284_s30  ;;  %v4105_v26 = vld [vmem:[%s5174_s11 + $0x70] sm:$0xff]  }
 0xed3   :  { %v3893_v56 = vpop.f32.mrf.mxu0 }
 0xed4   :  { %v4106_v56 = vld [vmem:[%s5174_s11 + $0x30] sm:$0xff]  }
 0xed5   :  { %v1876_v27 = vpop.f32.mrf.mxu0 }
 0xed6   :  { %1884 = vrot.lane.b32.xlu1 %v1876_v27, %s4284_s30  ;;  %v4107_v27 = vld [vmem:[%s5174_s11 + $0x68] sm:$0xff]  }
 0xed7   :  { %v3894_v57 = vpop.f32.mrf.mxu0 }
 0xed8   :  { %v4108_v57 = vld [vmem:[%s5174_s11 + $0x28] sm:$0xff]  }
 0xf0f   :  { %v1621_v28 = vpop.permute.xlu0 %1620 }
 0xf10   :  { %1626 = vst.msk [vmem:[#allocation2] sm:$0xff] %vm497_vm4, %v1621_v28  ;;  %v4109_v28 = vld [vmem:[%s5174_s11 + $0x60] sm:$0xff]  }
 0xf13   :  { %v1623_v29 = vpop.permute.xlu1 %1622 }
 0xf14   :  { %1627 = vst.msk [vmem:[#allocation2 + $0x8] sm:$0xff] %vm497_vm4, %v1623_v29  ;;  %v4110_v29 = vld [vmem:[%s5174_s11 + $0x20] sm:$0xff]  }
 0xf17   :  { %v1752_v30 = vpop.permute.xlu0 %1751 }
 0xf18   :  { %1757 = vst.msk [vmem:[#allocation2] sm:$0xff] %vm629_vm5, %v1752_v30  ;;  %v4111_v30 = vld [vmem:[%s5174_s11 + $0x58] sm:$0xff]  }
 0xf1b   :  { %v1754_v19 = vpop.permute.xlu1 %1753 }
 0xf1c   :  { %1758 = vst.msk [vmem:[#allocation2 + $0x8] sm:$0xff] %vm629_vm5, %v1754_v19  ;;  %v4112_v19 = vld [vmem:[%s5174_s11 + $0x18] sm:$0xff]  }
 0xf44   :  { %v1883_v31 = vpop.permute.xlu0 %1882 }
 0xf45   :  { %1888 = vst.msk [vmem:[#allocation2] sm:$0xff] %vm761_vm6, %v1883_v31  ;;  %v4113_v31 = vld [vmem:[%s5174_s11 + $0x50] sm:$0xff]  }
 0xf48   :  { %v1885_v32 = vpop.permute.xlu1 %1884 }
 0xf49   :  { %1889 = vst.msk [vmem:[#allocation2 + $0x8] sm:$0xff] %vm761_vm6, %v1885_v32  ;;  %v4114_v32 = vld [vmem:[%s5174_s11 + $0x10] sm:$0xff]  }
 0xf4c   :  { %v1890_v20 = vld [vmem:[#allocation2] sm:$0xff] }
 0xf50   :  { %v1891_v33 = vld [vmem:[#allocation2 + $0x8] sm:$0xff] }
 0xf51   :  { %v1892_v34 = vpack.c.bf16 %v1891_v33, %v1890_v20  ;;  %v4115_v20 = vld [vmem:[%s5174_s11 + $0x48] sm:$0xff]  }
 0xf52   :  { %v4116_v33 = vld [vmem:[%s5174_s11 + $0x8] sm:$0xff]  }
 0xf53   :  { %3904 = vmatmul.mubr.msk.bf16.vlgmr.msra.gmra.mxu1 %vm194_vm2, %v1892_v34  ;;  %v4117_v34 = vld [vmem:[%s5174_s11 + $0x40] sm:$0xff]  }
 0xf54   :  { %3720 = vmatpush3.bf16.msra.mxu1 %v4104_v24 }
 0xf55   :  { %3721 = vmatprep.subr.bf16.mxu1 %v4105_v26 }
 0xf58   :  { %3722 = vmatpush3.bf16.msra.mxu1 %v4106_v56 }
 0xf59   :  { %3723 = vmatprep.subr.bf16.mxu1 %v4107_v27 }
 0xf5c   :  { %3724 = vmatpush3.bf16.msra.mxu1 %v4108_v57  ;;  %v3591_v57 = vld [vmem:[%s5166_s2 + $0x12] ss:$0 sm:$0xff] }
 0xf5d   :  { %3725 = vmatprep.subr.bf16.mxu1 %v4109_v28 }
 0xf60   :  { %3726 = vmatpush3.bf16.msra.mxu1 %v4110_v29 }
 0xf61   :  { %3727 = vmatprep.subr.bf16.mxu1 %v4111_v30 }
 0xf64   :  { %3728 = vmatpush3.bf16.msra.mxu1 %v4112_v19 }
 0xf65   :  { %3729 = vmatprep.subr.bf16.mxu1 %v4113_v31 }
 0xf68   :  { %3730 = vmatpush3.bf16.msra.mxu1 %v4114_v32 }
 0xf69   :  { %3731 = vmatprep.subr.bf16.mxu1 %v4115_v20 }
 0xf6c   :  { %3732 = vmatpush3.bf16.msra.mxu1 %v4116_v33 }
 0xf6d   :  { %3733 = vmatprep.subr.bf16.mxu1 %v4117_v34 }
0x1013   :  { %v1969_v36 = vpop.f32.mrf.mxu1 }
0x1014   :  { %v1970_v38 = vadd.f32 %v3574_v35, %v1969_v36  ;;  %v2031_v36 = vld [vmem:[%s5166_s2 + $0x10] sm:$0x3] }
0x1015   :  { %v3905_v39 = vpop.f32.mrf.mxu1 }
0x1016   :  { %v1976_v40 = vadd.f32 %v1970_v38, %v4704_v49  ;;  %v2036_v38 = vrot.slane %v2031_v36, %v4450_v25  ;;  %v2040_v39 = vrot.slane %v2031_v36, %v4463_v37 }
0x1017   :  { %v1972_v41 = vpop.f32.mrf.mxu1 }
0x1018   :  { %v1973_v42 = vadd.f32 %v3574_v35, %v1972_v41  ;;  %v1980_v43 = vsel %vm194_vm2, %v1976_v40, 0.0  ;;  %v4118_v35 = vld [vmem:[%s5174_s11] sm:$0xff]   ;;  %s4296_s11 = smov 24  }
0x1019   :  { %1981 = vadd.xlane.f32.xlu0 %v1980_v43  ;;  %v3906_v44 = vpop.f32.mrf.mxu1  ;;  %3734 = vmatpush3.bf16.msra.mxu1 %v4118_v35 }
0x101a   :  { %v1977_v45 = vadd.f32 %v1973_v42, %v4706_v50  ;;  %v4093_v50 = vld [vmem:[%s5173_s10 + $0x34] ss:$8 sps:$4 sm:$0xff]   ;;  %3933 = vmatprep.subr.bf16.mxu1 %v4279_v0  ;;  %s4291_s10 = smov 104  }
0x101b   :  { %2094 = vmatprep.subr.bf16.mxu0 %v4093_v50 }
0x101c   :  { %v1983_v46 = vsel %vm194_vm2, %v1977_v45, 0.0  ;;  %2095 = vmatpush1.bf16.msra.mxu0 %v4091_v60 }
0x101d   :  { %1984 = vadd.xlane.f32.xlu1 %v1983_v46  ;;  %2096 = vmatprep.subr.bf16.mxu0 %v4096_v61 }
0x1020   :  { %2097 = vmatpush1.bf16.msra.mxu0 %v4094_v62 }
0x1021   :  { %2098 = vmatprep.subr.bf16.mxu0 %v4099_v63 }
0x1024   :  { %2099 = vmatpush1.bf16.msra.mxu0 %v4097_v1 }
0x1025   :  { %2100 = vmatprep.subr.bf16.mxu0 %v4102_v2 }
0x1028   :  { %2101 = vmatpush1.bf16.msra.mxu0 %v4100_v3 }
0x1029   :  { %3907 = vmatprep.subr.bf16.mxu0 %v4279_v0 }
0x10a2   :  { %v1982_v48 = vpop.xlane.xlu0 %1981 }
0x10a3   :  { %v1986_v11 = vmul.f32 0.015625, %v1982_v48 }
0x10a5   :  { %v1988_v51 = vsub.f32 %v1976_v40, %v1986_v11 }
0x10a6   :  { %v1985_v52 = vpop.xlane.xlu1 %1984 }
0x10a7   :  { %v1987_v53 = vmul.f32 0.015625, %v1985_v52  ;;  %v1990_v54 = vmul.f32 %v1988_v51, %v1988_v51 }
0x10a9   :  { %v1989_v55 = vsub.f32 %v1977_v45, %v1987_v53  ;;  %v1992_v49 = vsel %vm194_vm2, %v1990_v54, 0.0 }
0x10aa   :  { %1993 = vadd.xlane.f32.xlu0 %v1992_v49 }
0x10ab   :  { %v1991_v58 = vmul.f32 %v1989_v55, %v1989_v55 }
0x10ad   :  { %v1995_v59 = vsel %vm194_vm2, %v1991_v58, 0.0 }
0x10ae   :  { %1996 = vadd.xlane.f32.xlu0 %v1995_v59 }
0x1133   :  { %v1994_v4 = vpop.xlane.xlu0 %1993 }
0x1134   :  { %v1998_v5 = vmul.f32 0.015625, %v1994_v4 }
0x1136   :  { %v2000_v6 = vadd.f32 1e-05, %v1998_v5 }
0x1137   :  { %v1997_v7 = vpop.xlane.xlu0 %1996 }
0x1138   :  { %4215 = vrsqrt.f32 %v2000_v6  ;;  %v1999_v8 = vmul.f32 0.015625, %v1997_v7 }
0x113a   :  { %v2001_v9 = vadd.f32 1e-05, %v1999_v8 }
0x113c   :  { %4217 = vrsqrt.f32 %v2001_v9 }
0x1145   :  { %v4216_v10 = vpop.eup %4215 }
0x1146   :  { %v2004_v12 = vmul.f32 %v4216_v10, %v1988_v51 }
0x1148   :  { %v2012_v14 = vmul.f32 %v3580_v13, %v2004_v12 }
0x1149   :  { %v4218_v15 = vpop.eup %4217 }
0x114a   :  { %v2005_v16 = vmul.f32 %v4218_v15, %v1989_v55  ;;  %v4860_v21 = vadd.f32 %v3581_v17, %v2012_v14 }
0x114c   :  { %v2013_v18 = vmul.f32 %v3580_v13, %v2005_v16 }
0x114e   :  { %v4862_v22 = vadd.f32 %v3581_v17, %v2013_v18 }
0x1150   :  { %v2022_v23 = vpack.c.bf16 %v4862_v22, %v4860_v21 }
0x1152   :  { %3590 = vmatmul.mubr.msk.bf16.vlgmr.msra.gmra.mxu0 %vm194_vm2, %v2022_v23 }
0x1153   :  { %3915 = vmatprep.mubr.msk.bf16.mxu0 %vm4280_vm0, %v4279_v0 }
0x1212   :  { %v2120_v40 = vpop.f32.mrf.mxu0 }
0x1213   :  { %v2121_v41 = vadd.f32 %v2120_v40, %v2036_v38 }
0x1214   :  { %v2122_v42 = vpop.f32.mrf.mxu0 }
0x1215   :  { %v2129_v43 = vmul.f32 %v2121_v41, %v2121_v41  ;;  %v2123_v44 = vadd.f32 %v2122_v42, %v2040_v39 }
0x1216   :  { %v2124_v45 = vpop.f32.mrf.mxu0 }
0x1217   :  { %v2133_v46 = vmul.f32 %v2129_v43, %v2121_v41  ;;  %v2130_v48 = vmul.f32 %v2123_v44, %v2123_v44  ;;  %v2125_v11 = vadd.f32 %v2124_v45, %v2036_v38 }
0x1218   :  { %v2126_v51 = vpop.f32.mrf.mxu0 }
0x1219   :  { %v2137_v52 = vmul.f32 0.044715, %v2133_v46  ;;  %v2134_v53 = vmul.f32 %v2130_v48, %v2123_v44  ;;  %v2131_v54 = vmul.f32 %v2125_v11, %v2125_v11  ;;  %v2127_v55 = vadd.f32 %v2126_v51, %v2040_v39  ;;  %v4120_v48 = vld [vmem:[%s5175_s12 + $0x10] sm:$0xff]   ;;  %v4122_v51 = vld [vmem:[%s5175_s12] sm:$0xff]  }
0x121b   :  { %v2141_v49 = vadd.f32 %v2137_v52, %v2121_v41  ;;  %v2138_v58 = vmul.f32 0.044715, %v2134_v53  ;;  %v2135_v59 = vmul.f32 %v2131_v54, %v2125_v11  ;;  %v2132_v25 = vmul.f32 %v2127_v55, %v2127_v55 }
0x121d   :  { %v2145_v50 = vmul.f32 0.7978846, %v2141_v49  ;;  %v2142_v37 = vadd.f32 %v2138_v58, %v2123_v44  ;;  %v2139_v60 = vmul.f32 0.044715, %v2135_v59  ;;  %v2136_v61 = vmul.f32 %v2132_v25, %v2127_v55 }
0x121f   :  { %v2146_v62 = vmul.f32 0.7978846, %v2142_v37  ;;  %v2143_v63 = vadd.f32 %v2139_v60, %v2125_v11  ;;  %v2140_v1 = vmul.f32 0.044715, %v2136_v61  ;;  %4219 = vtanh.f32 %v2145_v50  ;;  %v3608_v50 = vld [vmem:[%s5166_s2 + $0x13] ss:$0 sm:$0xff] }
0x1221   :  { %4221 = vtanh.f32 %v2146_v62  ;;  %v2147_v2 = vmul.f32 0.7978846, %v2143_v63  ;;  %v2144_v3 = vadd.f32 %v2140_v1, %v2127_v55  ;;  %v3609_v62 = vld [vmem:[%s5166_s2 + $0x14] ss:$0 sm:$0xff] }
0x1223   :  { %4223 = vtanh.f32 %v2147_v2  ;;  %v2148_v4 = vmul.f32 0.7978846, %v2144_v3 }
0x1225   :  { %4225 = vtanh.f32 %v2148_v4  ;;  %v3610_v4 = vld [vmem:[%s5166_s2 + $0x15] ss:$0 sm:$0xff] }
0x122c   :  { %v4220_v5 = vpop.eup %4219 }
0x122d   :  { %v2153_v9 = vadd.f32 1.0, %v4220_v5 }
0x122e   :  { %v4222_v6 = vpop.eup %4221 }
0x122f   :  { %v2154_v7 = vadd.f32 1.0, %v4222_v6  ;;  %v2157_v14 = vmul.f32 0.5, %v2153_v9 }
0x1230   :  { %v4224_v8 = vpop.eup %4223 }
0x1231   :  { %v2155_v10 = vadd.f32 1.0, %v4224_v8  ;;  %v2158_v16 = vmul.f32 0.5, %v2154_v7  ;;  %v2161_v24 = vmul.f32 %v2157_v14, %v2121_v41 }
0x1232   :  { %v4226_v12 = vpop.eup %4225 }
0x1233   :  { %v2159_v13 = vmul.f32 0.5, %v2155_v10  ;;  %v2156_v15 = vadd.f32 1.0, %v4226_v12  ;;  %v2162_v23 = vmul.f32 %v2158_v16, %v2123_v44 }
0x1235   :  { %v2160_v17 = vmul.f32 0.5, %v2156_v15  ;;  %v2163_v18 = vmul.f32 %v2159_v13, %v2125_v11  ;;  %v4121_v11 = vld [vmem:[%s5175_s12 + $0x8] sm:$0xff]  }
0x1237   :  { %v2164_v47 = vmul.f32 %v2160_v17, %v2127_v55  ;;  %v2165_v56 = vpack.c.bf16 %v2163_v18, %v2161_v24 }
0x1239   :  { %v2166_v26 = vpack.c.bf16 %v2164_v47, %v2162_v23 }
0x123b   :  { %2334 = vmatprep.mubr.bf16.mxu1 %v2166_v26 }
0x123c   :  { %2335 = vmatmul.mubr.bf16.vlgmr.msra.gmra.mxu1 %v2165_v56 }
0x123d   :  { %3935 = vmatprep.mubr.msk.bf16.mxu1 %vm4280_vm0, %v4279_v0 }
0x12fc   :  { %v3735_v27 = vpop.f32.mrf.mxu1 }
0x12fe   :  { %v3736_v28 = vpop.f32.mrf.mxu1 }
0x12ff   :  { %v3737_v29 = vadd.f32 %v3736_v28, %v3735_v27  ;;  %v4123_v27 = vld [vmem:[%s5176_s13 + $0x8] sm:$0xff]  }
0x1300   :  { %v3738_v30 = vpop.f32.mrf.mxu1 }
0x1301   :  { %v2337_v19 = vadd.f32 %v3737_v29, %v3591_v57 }
0x1302   :  { %v3739_v31 = vpop.f32.mrf.mxu1 }
0x1303   :  { %v3740_v32 = vadd.f32 %v3739_v31, %v3738_v30  ;;  %v2343_v20 = vadd.f32 %v2337_v19, %v4860_v21 }
0x1305   :  { %v2340_v33 = vadd.f32 %v3740_v32, %v3591_v57  ;;  %v2347_v34 = vsel %vm194_vm2, %v2343_v20, 0.0  ;;  %v4124_v57 = vld [vmem:[%s5176_s13] sm:$0xff]  }
0x1306   :  { %2348 = vadd.xlane.f32.xlu1 %v2347_v34  ;;  %v3616_v34 = vld [vmem:[%s5166_s2 + $0x16] ss:$0 sm:$0xff] }
0x1307   :  { %v2344_v35 = vadd.f32 %v2340_v33, %v4862_v22  ;;  %v4119_v22 = vld [vmem:[%s5175_s12 + $0x18] sm:$0xff]  }
0x1308   :  { %3908 = vmatpush3.bf16.msra.mxu0 %v4119_v22 }
0x1309   :  { %v2350_v36 = vsel %vm194_vm2, %v2344_v35, 0.0  ;;  %3909 = vmatprep.subr.bf16.mxu0 %v4279_v0 }
0x130a   :  { %2351 = vadd.xlane.f32.xlu0 %v2350_v36 }
0x130c   :  { %3910 = vmatpush3.bf16.msra.mxu0 %v4120_v48 }
0x130d   :  { %3911 = vmatprep.subr.bf16.mxu0 %v4279_v0 }
0x1310   :  { %3912 = vmatpush3.bf16.msra.mxu0 %v4121_v11 }
0x1311   :  { %3913 = vmatprep.subr.bf16.mxu0 %v4279_v0 }
0x1314   :  { %3914 = vmatpush3.bf16.msra.mxu0 %v4122_v51 }
0x1315   :  { %3919 = vmatprep.subr.bf16.mxu0 %v4279_v0 }
0x138f   :  { %v2349_v38 = vpop.xlane.xlu1 %2348 }
0x1390   :  { %v2353_v39 = vmul.f32 0.015625, %v2349_v38 }
0x1392   :  { %v2355_v40 = vsub.f32 %v2343_v20, %v2353_v39  ;;  %v3617_v39 = vld [vmem:[%s5166_s2 + $0x17] ss:$0 sm:$0xff] }
0x1393   :  { %v2352_v41 = vpop.xlane.xlu0 %2351 }
0x1394   :  { %v2354_v42 = vmul.f32 0.015625, %v2352_v41  ;;  %v2357_v43 = vmul.f32 %v2355_v40, %v2355_v40 }
0x1396   :  { %v2356_v44 = vsub.f32 %v2344_v35, %v2354_v42  ;;  %v2359_v45 = vsel %vm194_vm2, %v2357_v43, 0.0 }
0x1397   :  { %2360 = vadd.xlane.f32.xlu1 %v2359_v45  ;;  %v3618_v45 = vld [vmem:[%s5166_s2 + $0x18] ss:$0 sm:$0xff] }
0x1398   :  { %v2358_v21 = vmul.f32 %v2356_v44, %v2356_v44 }
0x139a   :  { %v2362_v46 = vsel %vm194_vm2, %v2358_v21, 0.0 }
0x139b   :  { %2363 = vadd.xlane.f32.xlu0 %v2362_v46 }
0x1420   :  { %v2361_v52 = vpop.xlane.xlu1 %2360 }
0x1421   :  { %v2365_v53 = vmul.f32 0.015625, %v2361_v52 }
0x1423   :  { %v2367_v54 = vadd.f32 1e-05, %v2365_v53 }
0x1424   :  { %v2364_v55 = vpop.xlane.xlu0 %2363 }
0x1425   :  { %4227 = vrsqrt.f32 %v2367_v54  ;;  %v2366_v49 = vmul.f32 0.015625, %v2364_v55 }
0x1427   :  { %v2368_v58 = vadd.f32 1e-05, %v2366_v49 }
0x1429   :  { %4229 = vrsqrt.f32 %v2368_v58 }
0x1432   :  { %v4228_v59 = vpop.eup %4227 }
0x1433   :  { %v2371_v25 = vmul.f32 %v4228_v59, %v2355_v40 }
0x1435   :  { %v2379_v61 = vmul.f32 %v3608_v50, %v2371_v25 }
0x1436   :  { %v4230_v37 = vpop.eup %4229 }
0x1437   :  { %v2372_v60 = vmul.f32 %v4230_v37, %v2356_v44  ;;  %v2387_v1 = vadd.f32 %v3609_v62, %v2379_v61 }
0x1439   :  { %v2380_v63 = vmul.f32 %v3608_v50, %v2372_v60 }
0x143b   :  { %v2388_v2 = vadd.f32 %v3609_v62, %v2380_v63 }
0x143d   :  { %v2389_v3 = vpack.c.bf16 %v2388_v2, %v2387_v1  ;;  %v4277_v2 = vld [vmem:[%s5167_s1] sm:$0xff] }
0x143f   :  { %3916 = vmatmul.mubr.msk.bf16.vlgmr.msra.gmra.mxu0 %vm194_vm2, %v2389_v3 }
0x1440   :  { %3923 = vmatprep.mubr.msk.bf16.mxu0 %vm4280_vm0, %v4279_v0  ;;  %3920 = vmatpush3.bf16.msra.mxu0 %v4123_v27 }
0x1441   :  { %3921 = vmatprep.subr.bf16.mxu0 %v4279_v0 }
0x1444   :  { %3922 = vmatpush3.bf16.msra.mxu0 %v4124_v57 }
0x1445   :  { %3927 = vmatprep.subr.bf16.mxu0 %v4279_v0 }
0x14ff   :  { %v2466_v5 = vpop.f32.mrf.mxu0 }
0x1500   :  { %v2467_v6 = vadd.f32 %v3610_v4, %v2466_v5 }
0x1501   :  { %v3917_v7 = vpop.f32.mrf.mxu0 }
0x1502   :  { %v2475_v8 = vsel %vm88_vm1, %v2467_v6, 0.0  ;;  %v4278_v7 = vld [vmem:[%s5167_s1 + $0x8] sm:$0xff]  ;;  %s4293_s1 = smov 56  }
0x1503   :  { %2476 = vadd.xlane.f32.xlu1 %v2475_v8  ;;  %v2469_v9 = vpop.f32.mrf.mxu0 }
0x1504   :  { %v2470_v10 = vadd.f32 %v3610_v4, %v2469_v9 }
0x1505   :  { %v3918_v12 = vpop.f32.mrf.mxu0 }
0x1506   :  { %v2478_v13 = vsel %vm88_vm1, %v2470_v10, 0.0 }
0x1507   :  { %2479 = vadd.xlane.f32.xlu0 %v2478_v13 }
0x158c   :  { %v2477_v15 = vpop.xlane.xlu1 %2476 }
0x158d   :  { %v2482_v16 = vmul.f32 0.03125, %v2477_v15 }
0x158f   :  { %v2484_v14 = vsub.f32 %v2467_v6, %v2482_v16 }
0x1590   :  { %v2480_v17 = vpop.xlane.xlu0 %2479 }
0x1591   :  { %v2483_v18 = vmul.f32 0.03125, %v2480_v17  ;;  %v2486_v23 = vmul.f32 %v2484_v14, %v2484_v14 }
0x1593   :  { %v2485_v47 = vsub.f32 %v2470_v10, %v2483_v18  ;;  %v2488_v24 = vsel %vm88_vm1, %v2486_v23, 0.0 }
0x1594   :  { %2489 = vadd.xlane.f32.xlu1 %v2488_v24 }
0x1595   :  { %v2487_v26 = vmul.f32 %v2485_v47, %v2485_v47 }
0x1597   :  { %v2491_v56 = vsel %vm88_vm1, %v2487_v26, 0.0 }
0x1598   :  { %2492 = vadd.xlane.f32.xlu0 %v2491_v56 }
0x161d   :  { %v2490_v28 = vpop.xlane.xlu1 %2489 }
0x161e   :  { %v2494_v29 = vmul.f32 0.03125, %v2490_v28 }
0x1620   :  { %v2496_v30 = vadd.f32 1e-05, %v2494_v29 }
0x1621   :  { %v2493_v19 = vpop.xlane.xlu0 %2492 }
0x1622   :  { %4231 = vrsqrt.f32 %v2496_v30  ;;  %v2495_v31 = vmul.f32 0.03125, %v2493_v19 }
0x1624   :  { %v2497_v32 = vadd.f32 1e-05, %v2495_v31 }
0x1626   :  { %4233 = vrsqrt.f32 %v2497_v32 }
0x162f   :  { %v4232_v20 = vpop.eup %4231 }
0x1630   :  { %v2500_v33 = vmul.f32 %v4232_v20, %v2484_v14 }
0x1632   :  { %v2508_v38 = vmul.f32 %v3616_v34, %v2500_v33 }
0x1633   :  { %v4234_v35 = vpop.eup %4233 }
0x1634   :  { %v2501_v36 = vmul.f32 %v4234_v35, %v2485_v47  ;;  %v4980_v41 = vadd.f32 %v3617_v39, %v2508_v38 }
0x1636   :  { %v2509_v40 = vmul.f32 %v3616_v34, %v2501_v36 }
0x1638   :  { %v4982_v42 = vadd.f32 %v3617_v39, %v2509_v40 }
0x163a   :  { %v2518_v43 = vpack.c.bf16 %v4982_v42, %v4980_v41 }
0x163c   :  { %3924 = vmatmul.mubr.msk.bf16.vlgmr.msra.gmra.mxu0 %vm88_vm1, %v2518_v43 }
0x163d   :  { %3929 = vmatprep.mubr.msk.bf16.mxu0 %vm4280_vm0, %v4279_v0 }
0x16fc   :  { %v2579_v44 = vpop.f32.mrf.mxu0 }
0x16fd   :  { %v2580_v22 = vadd.f32 %v3618_v45, %v2579_v44 }
0x16fe   :  { %v3925_v21 = vpop.f32.mrf.mxu0 }
0x16ff   :  { %v2586_v53 = vmul.f32 0.35355338, %v2580_v22 }
0x1700   :  { %v2582_v46 = vpop.f32.mrf.mxu0 }
0x1701   :  { %v2583_v48 = vadd.f32 %v3618_v45, %v2582_v46 }
0x1702   :  { %v3926_v11 = vpop.f32.mrf.mxu0 }
0x1703   :  { %v2587_v51 = vmul.f32 0.35355338, %v2583_v48  ;;  %v4992_v52 = vpack.c.bf16 %v2583_v48, %v2580_v22 }
0x1705   :  { %2716 = vrot.lane.b32.xlu0 %v4992_v52, %s4289_s24  ;;  %2591 = vrot.lane.b32.xlu1 %v4992_v52, %s4286_s19  ;;  %v2588_v54 = vpack.c.bf16 %v2587_v51, %v2586_v53 }
0x1709   :  { %2846 = vrot.lane.b32.xlu0 %v2588_v54, %s4283_s29  ;;  %2714 = vrot.lane.b32.xlu1 %v2588_v54, %s4290_s27 }
0x170d   :  { %2978 = vrot.lane.b32.xlu0 %v2588_v54, %s4291_s10  ;;  %2848 = vrot.lane.b32.xlu1 %v4992_v52, %s4288_s20 }
0x1711   :  { %2980 = vrot.lane.b32.xlu1 %v4992_v52, %s4292_s21 }
0x1777   :  { %v2592_v55 = vpop.permute.xlu1 %2591  ;;  %v2717_v58 = vpop.permute.xlu0 %2716 }
0x1778   :  { %v2598_v49 = vsel %vm2593_vm7, %v2592_v55, 0  ;;  %v2722_v25 = vsel %vm2593_vm7, %v2717_v58, 0 }
0x1779   :  { %3928 = vmatpush3.bf16.xpose.msra.mxu0 %v2598_v49 }
0x177a   :  { %3939 = vmatprep.subr.bf16.mxu0 %v4279_v0 }
0x177b   :  { %v2715_v59 = vpop.permute.xlu1 %2714  ;;  %v2847_v61 = vpop.permute.xlu0 %2846 }
0x177f   :  { %v2849_v50 = vpop.permute.xlu1 %2848  ;;  %v2979_v63 = vpop.permute.xlu0 %2978 }
0x1780   :  { %3930 = vmatmul.mubr.msk.bf16.vlgmr.msra.gmra.mxu0 %vm2593_vm7, %v2588_v54  ;;  %v2854_v37 = vsel %vm2593_vm7, %v2849_v50, 0 }
0x1781   :  { %3940 = vmatpush3.bf16.xpose.msra.mxu0 %v2722_v25  ;;  %3941 = vmatprep.mubr.msk.bf16.mxu0 %vm4280_vm0, %v4279_v0 }
0x1782   :  { %3951 = vmatprep.subr.bf16.mxu0 %v4279_v0 }
0x1783   :  { %v2981_v60 = vpop.permute.xlu1 %2980 }
0x1784   :  { %v2986_v62 = vsel %vm2593_vm7, %v2981_v60, 0 }
0x1788   :  { %3942 = vmatmul.mubr.msk.bf16.vlgmr.msra.gmra.mxu0 %vm2593_vm7, %v2715_v59 }
0x1789   :  { %3952 = vmatpush3.bf16.xpose.msra.mxu0 %v2854_v37  ;;  %3953 = vmatprep.mubr.msk.bf16.mxu0 %vm4280_vm0, %v4279_v0 }
0x178a   :  { %3963 = vmatprep.subr.bf16.mxu0 %v4279_v0 }
0x1790   :  { %3954 = vmatmul.mubr.msk.bf16.vlgmr.msra.gmra.mxu0 %vm2593_vm7, %v2847_v61 }
0x1791   :  { %3964 = vmatpush3.bf16.xpose.msra.mxu0 %v2986_v62  ;;  %3965 = vmatprep.mubr.msk.bf16.mxu0 %vm4280_vm0, %v4279_v0 }
0x1792   :  { %3975 = vmatprep.subr.bf16.mxu0 %v4279_v0 }
0x1798   :  { %3966 = vmatmul.mubr.msk.bf16.vlgmr.msra.gmra.mxu0 %vm2593_vm7, %v2979_v63 }
0x1799   :  { %3979 = vmatprep.mubr.msk.bf16.mxu0 %vm4280_vm0, %v4279_v0 }
0x1840   :  { %v2634_v1 = vpop.f32.mrf.mxu0 }
0x1841   :  { %v2635_v3 = vadd.f32 %v4277_v2, %v2634_v1 }
0x1842   :  { %v3931_v4 = vpop.f32.mrf.mxu0 }
0x1843   :  { %v2641_v5 = vsel %vm249_vm3, %v2635_v3, -inf }
0x1844   :  { %2642 = vmax.xlane.f32.xlu1 %v2641_v5  ;;  %v2637_v6 = vpop.f32.mrf.mxu0 }
0x1845   :  { %v2638_v8 = vadd.f32 %v4278_v7, %v2637_v6 }
0x1846   :  { %v3932_v9 = vpop.f32.mrf.mxu0 }
0x1847   :  { %v2644_v10 = vsel %vm249_vm3, %v2638_v8, -inf }
0x1848   :  { %2645 = vmax.xlane.f32.xlu0 %v2644_v10  ;;  %v2758_v12 = vpop.f32.mrf.mxu0 }
0x1849   :  { %v2759_v13 = vadd.f32 %v4277_v2, %v2758_v12 }
0x184a   :  { %v3943_v15 = vpop.f32.mrf.mxu0 }
0x184b   :  { %v2765_v16 = vsel %vm249_vm3, %v2759_v13, -inf }
0x184c   :  { %2766 = vmax.xlane.f32.xlu0 %v2765_v16  ;;  %v2761_v14 = vpop.f32.mrf.mxu0 }
0x184d   :  { %v2762_v17 = vadd.f32 %v4278_v7, %v2761_v14 }
0x184e   :  { %v3944_v18 = vpop.f32.mrf.mxu0 }
0x184f   :  { %v2768_v23 = vsel %vm249_vm3, %v2762_v17, -inf }
0x1850   :  { %2769 = vmax.xlane.f32.xlu1 %v2768_v23  ;;  %v2890_v47 = vpop.f32.mrf.mxu0 }
0x1851   :  { %v2891_v24 = vadd.f32 %v4277_v2, %v2890_v47 }
0x1852   :  { %v3955_v26 = vpop.f32.mrf.mxu0 }
0x1853   :  { %v2897_v56 = vsel %vm249_vm3, %v2891_v24, -inf }
0x1854   :  { %2898 = vmax.xlane.f32.xlu0 %v2897_v56  ;;  %v2893_v27 = vpop.f32.mrf.mxu0 }
0x1855   :  { %v2894_v57 = vadd.f32 %v4278_v7, %v2893_v27 }
0x1856   :  { %v3956_v28 = vpop.f32.mrf.mxu0 }
0x1857   :  { %v2900_v29 = vsel %vm249_vm3, %v2894_v57, -inf }
0x1858   :  { %2901 = vmax.xlane.f32.xlu1 %v2900_v29  ;;  %v3022_v30 = vpop.f32.mrf.mxu0 }
0x1859   :  { %v3023_v19 = vadd.f32 %v4277_v2, %v3022_v30 }
0x185a   :  { %v3967_v31 = vpop.f32.mrf.mxu0 }
0x185b   :  { %v3029_v32 = vsel %vm249_vm3, %v3023_v19, -inf }
0x185c   :  { %3030 = vmax.xlane.f32.xlu0 %v3029_v32  ;;  %v3025_v20 = vpop.f32.mrf.mxu0 }
0x185d   :  { %v3026_v33 = vadd.f32 %v4278_v7, %v3025_v20 }
0x185e   :  { %v3968_v34 = vpop.f32.mrf.mxu0 }
0x185f   :  { %v3032_v35 = vsel %vm249_vm3, %v3026_v33, -inf }
0x1860   :  { %3033 = vmax.xlane.f32.xlu1 %v3032_v35 }
0x18cd   :  { %v2643_v36 = vpop.xlane.xlu1 %2642 }
0x18ce   :  { %v2647_v38 = vsub.f32 %v2635_v3, %v2643_v36 }
0x18d0   :  { %v2649_v39 = vmul.f32 1.442695, %v2647_v38 }
0x18d1   :  { %v2646_v40 = vpop.xlane.xlu0 %2645 }
0x18d2   :  { %4235 = vpow2.f32 %v2649_v39  ;;  %v2648_v43 = vsub.f32 %v2638_v8, %v2646_v40 }
0x18d4   :  { %v2651_v44 = vmul.f32 1.442695, %v2648_v43 }
0x18d5   :  { %v2767_v45 = vpop.xlane.xlu0 %2766 }
0x18d6   :  { %4237 = vpow2.f32 %v2651_v44  ;;  %v2771_v21 = vsub.f32 %v2759_v13, %v2767_v45 }
0x18d8   :  { %v2773_v46 = vmul.f32 1.442695, %v2771_v21 }
0x18d9   :  { %v2770_v55 = vpop.xlane.xlu1 %2769 }
0x18da   :  { %4239 = vpow2.f32 %v2773_v46  ;;  %v2772_v49 = vsub.f32 %v2762_v17, %v2770_v55 }
0x18dc   :  { %v2775_v50 = vmul.f32 1.442695, %v2772_v49 }
0x18dd   :  { %v2899_v58 = vpop.xlane.xlu0 %2898 }
0x18de   :  { %v2903_v25 = vsub.f32 %v2891_v24, %v2899_v58  ;;  %4241 = vpow2.f32 %v2775_v50  ;;  %v4125_v50 = vld [vmem:[%s5177_s14 + $0x8] sm:$0xff]  }
0x18df   :  { %v4236_v22 = vpop.eup %4235  ;;  %3976 = vmatpush3.bf16.msra.mxu0 %v4125_v50 }
0x18e0   :  { %v2653_v48 = vsel %vm249_vm3, %v4236_v22, 0.0  ;;  %v2905_v62 = vmul.f32 1.442695, %v2903_v25  ;;  %3977 = vmatprep.subr.bf16.mxu0 %v4279_v0 }
0x18e1   :  { %2654 = vadd.xlane.f32.xlu0 %v2653_v48  ;;  %v2902_v59 = vpop.xlane.xlu1 %2901 }
0x18e2   :  { %v2904_v37 = vsub.f32 %v2894_v57, %v2902_v59  ;;  %4243 = vpow2.f32 %v2905_v62 }
0x18e3   :  { %v4238_v11 = vpop.eup %4237 }
0x18e4   :  { %v2656_v51 = vsel %vm249_vm3, %v4238_v11, 0.0  ;;  %v2907_v1 = vmul.f32 1.442695, %v2904_v37 }
0x18e5   :  { %2657 = vadd.xlane.f32.xlu1 %v2656_v51  ;;  %v3031_v60 = vpop.xlane.xlu0 %3030 }
0x18e6   :  { %v3035_v63 = vsub.f32 %v3023_v19, %v3031_v60  ;;  %4245 = vpow2.f32 %v2907_v1  ;;  %v4126_v60 = vld [vmem:[%s5177_s14] sm:$0xff]  }
0x18e7   :  { %v5037_v53 = vpop.eup %4239  ;;  %3978 = vmatpush3.bf16.msra.mxu0 %v4126_v60 }
0x18e8   :  { %v2777_v54 = vsel %vm249_vm3, %v5037_v53, 0.0  ;;  %v3037_v3 = vmul.f32 1.442695, %v3035_v63  ;;  %3991 = vmatprep.subr.bf16.mxu0 %v4279_v0 }
0x18e9   :  { %2778 = vadd.xlane.f32.xlu0 %v2777_v54  ;;  %v3034_v61 = vpop.xlane.xlu1 %3033 }
0x18ea   :  { %v3036_v2 = vsub.f32 %v3026_v33, %v3034_v61  ;;  %4247 = vpow2.f32 %v3037_v3 }
0x18eb   :  { %v4242_v5 = vpop.eup %4241 }
0x18ec   :  { %v3039_v4 = vmul.f32 1.442695, %v3036_v2  ;;  %v2780_v7 = vsel %vm249_vm3, %v4242_v5, 0.0 }
0x18ee   :  { %4249 = vpow2.f32 %v3039_v4 }
0x18ef   :  { %v4244_v6 = vpop.eup %4243 }
0x18f0   :  { %v2909_v10 = vsel %vm249_vm3, %v4244_v6, 0.0 }
0x18f3   :  { %v4246_v8 = vpop.eup %4245 }
0x18f4   :  { %v2912_v12 = vsel %vm249_vm3, %v4246_v8, 0.0 }
0x18f6   :  { %2788 = vrot.lane.b32.xlu1 %v4992_v52, %s4293_s1 }
0x18f7   :  { %v5045_v9 = vpop.eup %4247 }
0x18f8   :  { %v3041_v15 = vsel %vm249_vm3, %v5045_v9, 0.0 }
0x18fb   :  { %v4250_v13 = vpop.eup %4249 }
0x18fc   :  { %v3044_v16 = vsel %vm249_vm3, %v4250_v13, 0.0 }
0x18ff   :  { %2664 = vrot.lane.b32.xlu0 %v4992_v52, %s4282_s28  ;;  %s4294_s28 = smov 40  }
0x191a   :  { %2781 = vadd.xlane.f32.xlu1 %v2780_v7 }
0x191e   :  { %2910 = vadd.xlane.f32.xlu0 %v2909_v10  ;;  %2913 = vadd.xlane.f32.xlu1 %v2912_v12 }
0x1922   :  { %3042 = vadd.xlane.f32.xlu0 %v3041_v15  ;;  %3045 = vadd.xlane.f32.xlu1 %v3044_v16  ;;  %v3630_v15 = vld [vmem:[%s5166_s2 + $0x19] ss:$0 sm:$0xff] }
0x1933   :  { %2920 = vrot.lane.b32.xlu1 %v4992_v52, %s4284_s30  ;;  %s4295_s30 = smov 8  }
0x1938   :  { %3052 = vrot.lane.b32.xlu0 %v4992_v52, %s4294_s28 }
0x196a   :  { %v2655_v14 = vpop.xlane.xlu0 %2654 }
0x196b   :  { %4251 = vrcp.f32 %v2655_v14 }
0x196e   :  { %v2658_v17 = vpop.xlane.xlu1 %2657 }
0x196f   :  { %4253 = vrcp.f32 %v2658_v17 }
0x1972   :  { %v2779_v18 = vpop.xlane.xlu0 %2778  ;;  %v2789_v57 = vpop.permute.xlu1 %2788 }
0x1973   :  { %4255 = vrcp.f32 %v2779_v18 }
0x1976   :  { %v2665_v23 = vpop.permute.xlu0 %2664 }
0x1977   :  { %3934 = vmatpush3.bf16.msra.mxu1 %v2665_v23 }
0x1978   :  { %3945 = vmatprep.subr.bf16.mxu1 %v4279_v0  ;;  %v4252_v47 = vpop.eup %4251 }
0x1979   :  { %v2661_v26 = vmul.f32 %v4252_v47, %v4236_v22 }
0x197c   :  { %v4254_v24 = vpop.eup %4253 }
0x197d   :  { %v2662_v56 = vmul.f32 %v4254_v24, %v4238_v11 }
0x197f   :  { %v2663_v27 = vpack.c.bf16 %v2662_v56, %v2661_v26 }
0x1980   :  { %v4256_v31 = vpop.eup %4255 }
0x1981   :  { %3936 = vmatmul.mubr.msk.bf16.vlgmr.msra.gmra.mxu1 %vm249_vm3, %v2663_v27  ;;  %v2785_v20 = vmul.f32 %v4256_v31, %v5037_v53 }
0x1982   :  { %3946 = vmatpush3.bf16.msra.mxu1 %v2789_v57  ;;  %3947 = vmatprep.mubr.msk.bf16.mxu1 %vm4280_vm0, %v4279_v0 }
0x1983   :  { %3957 = vmatprep.subr.bf16.mxu1 %v4279_v0 }
0x19a3   :  { %v2782_v52 = vpop.xlane.xlu1 %2781 }
0x19a4   :  { %4257 = vrcp.f32 %v2782_v52 }
0x19a7   :  { %v2911_v28 = vpop.xlane.xlu0 %2910  ;;  %v2914_v29 = vpop.xlane.xlu1 %2913 }
0x19a8   :  { %4259 = vrcp.f32 %v2911_v28 }
0x19a9   :  { %4261 = vrcp.f32 %v2914_v29 }
0x19ab   :  { %v3043_v30 = vpop.xlane.xlu0 %3042  ;;  %v3046_v19 = vpop.xlane.xlu1 %3045 }
0x19ac   :  { %4263 = vrcp.f32 %v3043_v30 }
0x19ad   :  { %4265 = vrcp.f32 %v3046_v19 }
0x19af   :  { %v2921_v38 = vpop.permute.xlu1 %2920  ;;  %v3053_v21 = vpop.permute.xlu0 %3052 }
0x19b1   :  { %v4258_v32 = vpop.eup %4257 }
0x19b2   :  { %v2786_v33 = vmul.f32 %v4258_v32, %v4242_v5 }
0x19b4   :  { %v2787_v34 = vpack.c.bf16 %v2786_v33, %v2785_v20  ;;  %v4128_v33 = vld [vmem:[%s5178_s15] sm:$0xff]  }
0x19b5   :  { %v4260_v35 = vpop.eup %4259 }
0x19b6   :  { %v4262_v36 = vpop.eup %4261  ;;  %3948 = vmatmul.mubr.msk.bf16.vlgmr.msra.gmra.mxu1 %vm249_vm3, %v2787_v34  ;;  %v2917_v39 = vmul.f32 %v4260_v35, %v4244_v6  ;;  %v4129_v34 = vld [vmem:[%s5179_s16 + $0x18] sm:$0xff]  }
0x19b7   :  { %3958 = vmatpush3.bf16.msra.mxu1 %v2921_v38  ;;  %3959 = vmatprep.mubr.msk.bf16.mxu1 %vm4280_vm0, %v4279_v0  ;;  %v2918_v40 = vmul.f32 %v4262_v36, %v4246_v8 }
0x19b8   :  { %3969 = vmatprep.subr.bf16.mxu1 %v4279_v0 }
0x19b9   :  { %v4264_v43 = vpop.eup %4263  ;;  %v2919_v44 = vpack.c.bf16 %v2918_v40, %v2917_v39 }
0x19ba   :  { %v4266_v45 = vpop.eup %4265  ;;  %v3049_v46 = vmul.f32 %v4264_v43, %v5045_v9 }
0x19bb   :  { %v3050_v22 = vmul.f32 %v4266_v45, %v4250_v13 }
0x19bd   :  { %v3051_v48 = vpack.c.bf16 %v3050_v22, %v3049_v46 }
0x19be   :  { %3960 = vmatmul.mubr.msk.bf16.vlgmr.msra.gmra.mxu1 %vm249_vm3, %v2919_v44 }
0x19bf   :  { %3970 = vmatpush3.bf16.msra.mxu1 %v3053_v21  ;;  %3971 = vmatprep.mubr.msk.bf16.mxu1 %vm4280_vm0, %v4279_v0  ;;  %v3634_v21 = vld [vmem:[%s5166_s2 + $0x1a] ss:$0 sm:$0xff] }
0x19c0   :  { %3983 = vmatprep.subr.bf16.mxu1 %v4279_v0 }
0x19c6   :  { %3972 = vmatmul.mubr.msk.bf16.vlgmr.msra.gmra.mxu1 %vm249_vm3, %v3051_v48 }
0x19c7   :  { %3987 = vmatprep.mubr.msk.bf16.mxu1 %vm4280_vm0, %v4279_v0 }
0x1a41   :  { %v2704_v11 = vpop.f32.mrf.mxu1 }
0x1a42   :  { %2711 = vst.msk [vmem:[#allocation2] sm:$0xff] %vm2593_vm7, %v2704_v11  ;;  %v3635_v11 = vld [vmem:[%s5166_s2 + $0x1b] ss:$0 sm:$0xff] }
0x1a43   :  { %v3937_v51 = vpop.f32.mrf.mxu1 }
0x1a45   :  { %v2707_v53 = vpop.f32.mrf.mxu1 }
0x1a46   :  { %2712 = vst.msk [vmem:[#allocation2 + $0x8] sm:$0xff] %vm2593_vm7, %v2707_v53 }
0x1a47   :  { %v3938_v54 = vpop.f32.mrf.mxu1 }
0x1a76   :  { %v2828_v55 = vpop.f32.mrf.mxu1 }
0x1a77   :  { %2837 = vrot.lane.b32.xlu1 %v2828_v55, %s4295_s30 }
0x1a78   :  { %v3949_v49 = vpop.f32.mrf.mxu1 }
0x1a79   :  { %v4130_v49 = vld [vmem:[%s5179_s16 + $0x10] sm:$0xff]  }
0x1a7a   :  { %v2831_v58 = vpop.f32.mrf.mxu1 }
0x1a7b   :  { %2839 = vrot.lane.b32.xlu0 %v2831_v58, %s4295_s30  ;;  %v4131_v58 = vld [vmem:[%s5179_s16 + $0x8] sm:$0xff]  }
0x1a7c   :  { %v3950_v59 = vpop.f32.mrf.mxu1 }
0x1a7d   :  { %v4132_v59 = vld [vmem:[%s5179_s16] sm:$0xff]  }
0x1a7e   :  { %v2960_v25 = vpop.f32.mrf.mxu1 }
0x1a7f   :  { %2969 = vrot.lane.b32.xlu1 %v2960_v25, %s5193_s25  ;;  %v3636_v25 = vld [vmem:[%s5166_s2 + $0x1c] ss:$0 sm:$0xff] }
0x1a80   :  { %v3961_v37 = vpop.f32.mrf.mxu1 }
0x1a82   :  { %v2963_v61 = vpop.f32.mrf.mxu1 }
0x1a83   :  { %2971 = vrot.lane.b32.xlu0 %v2963_v61, %s5193_s25 }
0x1a84   :  { %v3962_v62 = vpop.f32.mrf.mxu1 }
0x1a86   :  { %v3092_v63 = vpop.f32.mrf.mxu1 }
0x1a87   :  { %3101 = vrot.lane.b32.xlu1 %v3092_v63, %s4296_s11 }
0x1a88   :  { %v3973_v1 = vpop.f32.mrf.mxu1 }
0x1a8a   :  { %v3095_v2 = vpop.f32.mrf.mxu1 }
0x1a8b   :  { %3103 = vrot.lane.b32.xlu0 %v3095_v2, %s4296_s11 }
0x1a8c   :  { %v3974_v3 = vpop.f32.mrf.mxu1 }
0x1ae9   :  { %v2838_v4 = vpop.permute.xlu1 %2837 }
0x1aea   :  { %2844 = vst.msk [vmem:[#allocation2] sm:$0xff] %vm2843_vm8, %v2838_v4  ;;  %v3640_v4 = vld [vmem:[%s5166_s2 + $0x1d] ss:$0 sm:$0xff] }
0x1aed   :  { %v2840_v5 = vpop.permute.xlu0 %2839 }
0x1aee   :  { %2845 = vst.msk [vmem:[#allocation2 + $0x8] sm:$0xff] %vm2843_vm8, %v2840_v5 }
0x1af1   :  { %v2970_v6 = vpop.permute.xlu1 %2969 }
0x1af2   :  { %2976 = vst.msk [vmem:[#allocation2] sm:$0xff] %vm2975_vm9, %v2970_v6 }
0x1af5   :  { %v2972_v7 = vpop.permute.xlu0 %2971 }
0x1af6   :  { %2977 = vst.msk [vmem:[#allocation2 + $0x8] sm:$0xff] %vm2975_vm9, %v2972_v7 }
0x1af9   :  { %v3102_v8 = vpop.permute.xlu1 %3101 }
0x1afa   :  { %3108 = vst.msk [vmem:[#allocation2] sm:$0xff] %vm3107_vm10, %v3102_v8 }
0x1afd   :  { %v3104_v9 = vpop.permute.xlu0 %3103 }
0x1afe   :  { %3109 = vst.msk [vmem:[#allocation2 + $0x8] sm:$0xff] %vm3107_vm10, %v3104_v9 }
0x1b01   :  { %v3110_v10 = vld [vmem:[#allocation2] sm:$0xff] }
0x1b05   :  { %v3111_v12 = vld [vmem:[#allocation2 + $0x8] sm:$0xff] }
0x1b06   :  { %v3112_v13 = vpack.c.bf16 %v3111_v12, %v3110_v10 }
0x1b08   :  { %3980 = vmatmul.mubr.msk.bf16.vlgmr.msra.gmra.mxu0 %vm88_vm1, %v3112_v13 }
0x1b09   :  { %3999 = vmatprep.mubr.msk.bf16.mxu0 %vm4280_vm0, %v4279_v0  ;;  %3992 = vmatpush3.bf16.msra.mxu0 %v4129_v34 }
0x1b0a   :  { %3993 = vmatprep.subr.bf16.mxu0 %v4279_v0 }
0x1b0d   :  { %3994 = vmatpush3.bf16.msra.mxu0 %v4130_v49 }
0x1b0e   :  { %3995 = vmatprep.subr.bf16.mxu0 %v4279_v0 }
0x1b11   :  { %3996 = vmatpush3.bf16.msra.mxu0 %v4131_v58 }
0x1b12   :  { %3997 = vmatprep.subr.bf16.mxu0 %v4279_v0 }
0x1b15   :  { %3998 = vmatpush3.bf16.msra.mxu0 %v4132_v59 }
0x1bc8   :  { %v3173_v16 = vpop.f32.mrf.mxu0 }
0x1bc9   :  { %v3174_v14 = vadd.f32 %v3630_v15, %v3173_v16 }
0x1bca   :  { %v3981_v17 = vpop.f32.mrf.mxu0 }
0x1bcb   :  { %v3180_v18 = vadd.f32 %v3174_v14, %v4980_v41 }
0x1bcc   :  { %v3176_v23 = vpop.f32.mrf.mxu0 }
0x1bcd   :  { %v3177_v47 = vadd.f32 %v3630_v15, %v3176_v23  ;;  %v3184_v24 = vsel %vm88_vm1, %v3180_v18, 0.0 }
0x1bce   :  { %3185 = vadd.xlane.f32.xlu1 %v3184_v24  ;;  %v3982_v26 = vpop.f32.mrf.mxu0 }
0x1bcf   :  { %v3181_v56 = vadd.f32 %v3177_v47, %v4982_v42  ;;  %v4127_v42 = vld [vmem:[%s5178_s15 + $0x8] sm:$0xff]  }
0x1bd0   :  { %3984 = vmatpush3.bf16.msra.mxu1 %v4127_v42 }
0x1bd1   :  { %v3187_v27 = vsel %vm88_vm1, %v3181_v56, 0.0  ;;  %3985 = vmatprep.subr.bf16.mxu1 %v4279_v0 }
0x1bd2   :  { %3188 = vadd.xlane.f32.xlu0 %v3187_v27 }
0x1bd4   :  { %3986 = vmatpush3.bf16.msra.mxu1 %v4128_v33  ;;  %v3646_v33 = vld [vmem:[%s5166_s2 + $0x1e] ss:$0 sm:$0xff] }
0x1bd5   :  { %4003 = vmatprep.subr.bf16.mxu1 %v4279_v0 }
0x1c57   :  { %v3186_v57 = vpop.xlane.xlu1 %3185 }
0x1c58   :  { %v3190_v52 = vmul.f32 0.03125, %v3186_v57 }
0x1c5a   :  { %v3192_v28 = vsub.f32 %v3180_v18, %v3190_v52  ;;  %v4133_v52 = vld [vmem:[%s5180_s17 + $0x8] sm:$0xff]  }
0x1c5b   :  { %v3189_v29 = vpop.xlane.xlu0 %3188 }
0x1c5c   :  { %v3191_v30 = vmul.f32 0.03125, %v3189_v29  ;;  %v3194_v19 = vmul.f32 %v3192_v28, %v3192_v28 }
0x1c5e   :  { %v3193_v31 = vsub.f32 %v3181_v56, %v3191_v30  ;;  %v3196_v41 = vsel %vm88_vm1, %v3194_v19, 0.0 }
0x1c5f   :  { %3197 = vadd.xlane.f32.xlu0 %v3196_v41 }
0x1c60   :  { %v3195_v32 = vmul.f32 %v3193_v31, %v3193_v31 }
0x1c62   :  { %v3199_v20 = vsel %vm88_vm1, %v3195_v32, 0.0 }
0x1c63   :  { %3200 = vadd.xlane.f32.xlu1 %v3199_v20 }
0x1ce8   :  { %v3198_v35 = vpop.xlane.xlu0 %3197 }
0x1ce9   :  { %v3202_v36 = vmul.f32 0.03125, %v3198_v35 }
0x1ceb   :  { %v3204_v38 = vadd.f32 1e-05, %v3202_v36 }
0x1cec   :  { %v3201_v39 = vpop.xlane.xlu1 %3200 }
0x1ced   :  { %4267 = vrsqrt.f32 %v3204_v38  ;;  %v3203_v40 = vmul.f32 0.03125, %v3201_v39 }
0x1cef   :  { %v3205_v43 = vadd.f32 1e-05, %v3203_v40 }
0x1cf1   :  { %4269 = vrsqrt.f32 %v3205_v43 }
0x1cfa   :  { %v4268_v44 = vpop.eup %4267 }
0x1cfb   :  { %v3208_v45 = vmul.f32 %v4268_v44, %v3192_v28  ;;  %v4134_v28 = vld [vmem:[%s5180_s17] sm:$0xff]  }
0x1cfc   :  { %v3648_v44 = vld [vmem:[%s5166_s2 + $0x20] ss:$0 sm:$0xff] }
0x1cfd   :  { %v3216_v48 = vmul.f32 %v3634_v21, %v3208_v45 }
0x1cfe   :  { %v4270_v46 = vpop.eup %4269 }
0x1cff   :  { %v3209_v22 = vmul.f32 %v4270_v46, %v3193_v31  ;;  %v3224_v53 = vadd.f32 %v3635_v11, %v3216_v48 }
0x1d01   :  { %v3217_v51 = vmul.f32 %v3634_v21, %v3209_v22 }
0x1d03   :  { %v3225_v54 = vadd.f32 %v3635_v11, %v3217_v51 }
0x1d05   :  { %v3226_v55 = vpack.c.bf16 %v3225_v54, %v3224_v53 }
0x1d07   :  { %3988 = vmatmul.mubr.msk.bf16.vlgmr.msra.gmra.mxu1 %vm88_vm1, %v3226_v55 }
0x1d08   :  { %4007 = vmatprep.mubr.msk.bf16.mxu1 %vm4280_vm0, %v4279_v0  ;;  %4004 = vmatpush3.bf16.msra.mxu1 %v4133_v52 }
0x1d09   :  { %4005 = vmatprep.subr.bf16.mxu1 %v4279_v0  ;;  %v3647_v0 = vld [vmem:[%s5166_s2 + $0x1f] ss:$0 sm:$0xff] }
0x1d0c   :  { %4006 = vmatpush3.bf16.msra.mxu1 %v4134_v28 }
0x1dc7   :  { %v3287_v50 = vpop.f32.mrf.mxu1 }
0x1dc8   :  { %v3288_v60 = vadd.f32 %v3636_v25, %v3287_v50 }
0x1dc9   :  { %v3989_v37 = vpop.f32.mrf.mxu1 }
0x1dca   :  { %v3294_v1 = vmax.f32 %v3288_v60, 0.0 }
0x1dcb   :  { %v3290_v61 = vpop.f32.mrf.mxu1 }
0x1dcc   :  { %v3291_v62 = vadd.f32 %v3636_v25, %v3290_v61 }
0x1dcd   :  { %v3990_v63 = vpop.f32.mrf.mxu1 }
0x1dce   :  { %v3295_v2 = vmax.f32 %v3291_v62, 0.0 }
0x1dd0   :  { %v3296_v3 = vpack.c.bf16 %v3295_v2, %v3294_v1 }
0x1dd2   :  { %4000 = vmatmul.mubr.msk.bf16.vlgmr.msra.gmra.mxu0 %vm194_vm2, %v3296_v3 }
0x1e92   :  { %v3373_v5 = vpop.f32.mrf.mxu0 }
0x1e93   :  { %v3374_v6 = vadd.f32 %v3640_v4, %v3373_v5 }
0x1e94   :  { %v4001_v7 = vpop.f32.mrf.mxu0 }
0x1e95   :  { %v3380_v8 = vadd.f32 %v3374_v6, %v3224_v53 }
0x1e96   :  { %v3376_v9 = vpop.f32.mrf.mxu0 }
0x1e97   :  { %v3377_v10 = vadd.f32 %v3640_v4, %v3376_v9  ;;  %v3384_v12 = vsel %vm88_vm1, %v3380_v8, 0.0 }
0x1e98   :  { %3385 = vadd.xlane.f32.xlu0 %v3384_v12  ;;  %v4002_v13 = vpop.f32.mrf.mxu0 }
0x1e99   :  { %v3381_v15 = vadd.f32 %v3377_v10, %v3225_v54 }
0x1e9b   :  { %v3387_v16 = vsel %vm88_vm1, %v3381_v15, 0.0 }
0x1e9c   :  { %3388 = vadd.xlane.f32.xlu1 %v3387_v16 }
0x1f21   :  { %v3386_v14 = vpop.xlane.xlu0 %3385 }
0x1f22   :  { %v3390_v17 = vmul.f32 0.03125, %v3386_v14 }
0x1f24   :  { %v3392_v18 = vsub.f32 %v3380_v8, %v3390_v17 }
0x1f25   :  { %v3389_v23 = vpop.xlane.xlu1 %3388 }
0x1f26   :  { %v3391_v47 = vmul.f32 0.03125, %v3389_v23  ;;  %v3394_v24 = vmul.f32 %v3392_v18, %v3392_v18 }
0x1f28   :  { %v3393_v26 = vsub.f32 %v3381_v15, %v3391_v47  ;;  %v3396_v56 = vsel %vm88_vm1, %v3394_v24, 0.0 }
0x1f29   :  { %3397 = vadd.xlane.f32.xlu0 %v3396_v56 }
0x1f2a   :  { %v3395_v27 = vmul.f32 %v3393_v26, %v3393_v26 }
0x1f2c   :  { %v3399_v57 = vsel %vm88_vm1, %v3395_v27, 0.0 }
0x1f2d   :  { %3400 = vadd.xlane.f32.xlu1 %v3399_v57 }
0x1fb2   :  { %v3398_v29 = vpop.xlane.xlu0 %3397 }
0x1fb3   :  { %v3402_v30 = vmul.f32 0.03125, %v3398_v29 }
0x1fb5   :  { %v3404_v19 = vadd.f32 1e-05, %v3402_v30 }
0x1fb6   :  { %v3401_v31 = vpop.xlane.xlu1 %3400 }
0x1fb7   :  { %4271 = vrsqrt.f32 %v3404_v19  ;;  %v3403_v41 = vmul.f32 0.03125, %v3401_v31 }
0x1fb9   :  { %v3405_v32 = vadd.f32 1e-05, %v3403_v41 }
0x1fbb   :  { %4273 = vrsqrt.f32 %v3405_v32 }
0x1fc4   :  { %v4272_v20 = vpop.eup %4271 }
0x1fc5   :  { %v3408_v42 = vmul.f32 %v4272_v20, %v3392_v18 }
0x1fc7   :  { %v3416_v36 = vmul.f32 %v3646_v33, %v3408_v42 }
0x1fc8   :  { %v4274_v34 = vpop.eup %4273 }
0x1fc9   :  { %v3409_v35 = vmul.f32 %v4274_v34, %v3393_v26  ;;  %v3424_v39 = vadd.f32 %v3647_v0, %v3416_v36 }
0x1fcb   :  { %v3417_v38 = vmul.f32 %v3646_v33, %v3409_v35 }
0x1fcd   :  { %v3425_v40 = vadd.f32 %v3647_v0, %v3417_v38 }
0x1fcf   :  { %v3426_v43 = vpack.c.bf16 %v3425_v40, %v3424_v39 }
0x1fd1   :  { %4008 = vmatmul.mubr.msk.bf16.vlgmr.msra.gmra.mxu1 %vm88_vm1, %v3426_v43 }
0x2091   :  { %v3487_v45 = vpop.f32.mrf.mxu1 }
0x2092   :  { %v3488_v21 = vadd.f32 %v3648_v44, %v3487_v45 }
0x2093   :  { %v4009_v46 = vpop.f32.mrf.mxu1 }
0x2094   :  { %3494 = vst [vmem:[%s5181_s18] sm:$0xff] %v3488_v21 }
0x2095   :  { %v3490_v22 = vpop.f32.mrf.mxu1 }
0x2096   :  { %v3491_v48 = vadd.f32 %v3648_v44, %v3490_v22 }
0x2097   :  { %v4010_v11 = vpop.f32.mrf.mxu1 }
0x2098   :  { %3495 = vst [vmem:[%s5181_s18 + $0x8] sm:$0xff] %v3491_v48 }

</bundles_post_ra>
